<compile_context>
chip_gen: v7x
topology: tpu7x:2x2x1
jax: 0.10.0
libtpu: 0.0.40
codegen_flags: <defaults>
</compile_context>

<pallas_src>
import functools

import jax
import jax.numpy as jnp
from jax import lax
from jax.experimental import pallas as pl
from jax.experimental.pallas import tpu as pltpu


def _round_up(x, m):
    return (x + m - 1) // m * m


# ----------------------------------------------------------------------------
# Fused Conv2d(5x5, padding=2) + bias + MaxPool2d(2) kernel.
#
# The wrapper supplies xg[b, r, c, kw*Cin+ci] = xpad[b, r, c+kw, ci] (bf16), so the
# 5x5 conv collapses to 5 fat accumulating MXU dots (one per kh) with K = 5*Cin.
# The 2x2 max-pool and per-channel bias run in the f32 epilogue (bias commutes
# with max, so it is added after pooling).
# ----------------------------------------------------------------------------
def _conv5x5_pool_kernel(xg_ref, w_ref, b_ref, o_ref, row_ref,
                         *, hb, nt, W, Cin5, Cout):
    # xg_ref : (1, H+4, W, 5*Cin) bf16  row-padded, kw-gathered NHWC image
    # w_ref  : (5, 5*Cin, Cout)   bf16  taps grouped by kh
    # b_ref  : (1, Cout)          f32
    # o_ref  : (1, Ho, Wo, Cout)  f32   pooled output for this image
    # row_ref: (hb, W, Cout)      f32   scratch holding H-pooled conv rows of a tile
    nrows = 2 * hb                      # conv rows produced per row tile
    Wo = W // 2
    bias = b_ref[...].reshape(1, 1, Cout)

    def tile(t):
        r0 = t * nrows
        h0 = t * hb
        if not isinstance(r0, int):     # dynamic loop index -> alignment hints
            r0 = pl.multiple_of(r0, nrows)
            h0 = pl.multiple_of(h0, hb)

        # 5 fat accumulating dots (K = 5*Cin), bf16 operands -> f32 accumulator.
        acc = jnp.zeros((nrows * W, Cout), jnp.float32)
        for kh in range(5):
            tap = xg_ref[0, pl.ds(r0 + kh, nrows), :, :]        # (nrows, W, 5*Cin)
            acc = acc + jnp.dot(tap.reshape(nrows * W, Cin5), w_ref[kh],
                                preferred_element_type=jnp.float32)

        # 2x2 max-pool epilogue (f32).
        a = acc.reshape(hb, 2, W, Cout)                         # trivial: W % 8 == 0
        row_ref[...] = jnp.maximum(a[:, 0], a[:, 1])            # H-pair max (VPU)
        even = row_ref[:, pl.ds(0, Wo, 2), :]                   # strided sublane loads
        odd = row_ref[:, pl.ds(1, Wo, 2), :]
        pooled = jnp.maximum(even, odd) + bias                  # (hb, Wo, Cout)
        o_ref[0, pl.ds(h0, hb), :, :] = pooled

    if nt == 1:
        tile(0)
    else:
        def _body(t, carry):
            tile(t)
            return carry
        lax.fori_loop(0, nt, _body, 0)


def conv5x5_pool(xg, w, b):
    """xg: (B,H+4,W,5*Cin) bf16 (row-padded, kw-gathered NHWC), w: (5,5*Cin,Cout) bf16,
    b: (Cout,) f32  ->  (B, H//2, W//2, Cout) f32."""
    B, Hp, W, Cin5 = xg.shape
    H = Hp - 4
    Cout = w.shape[-1]
    Ho, Wo = H // 2, W // 2
    assert W % 8 == 0 and H % 2 == 0
    hb = min(4, Ho)                     # pooled rows per in-kernel tile
    assert Ho % hb == 0
    nt = Ho // hb

    kernel = functools.partial(_conv5x5_pool_kernel,
                               hb=hb, nt=nt, W=W, Cin5=Cin5, Cout=Cout)
    return pl.pallas_call(
        kernel,
        out_shape=jax.ShapeDtypeStruct((B, Ho, Wo, Cout), jnp.float32),
        grid_spec=pltpu.PrefetchScalarGridSpec(
            num_scalar_prefetch=0,
            grid=(B,),
            in_specs=[
                pl.BlockSpec((1, Hp, W, Cin5), lambda bi: (bi, 0, 0, 0)),
                pl.BlockSpec((5, Cin5, Cout), lambda bi: (0, 0, 0)),
                pl.BlockSpec((1, Cout), lambda bi: (0, 0)),
            ],
            out_specs=pl.BlockSpec((1, Ho, Wo, Cout), lambda bi: (bi, 0, 0, 0)),
            scratch_shapes=[pltpu.VMEM((hb, W, Cout), jnp.float32)],
        ),
        compiler_params=pltpu.CompilerParams(
            dimension_semantics=("parallel",)),
    )(xg, w, b.reshape(1, Cout))


def _pad_gather_bf16(x):
    """Zero-pad by 2 and fold the horizontal (kw) im2col + bf16 cast into one small
    XLA fusion: (B,H,W,Cin) f32 -> (B,H+4,W,5*Cin) bf16 with
    xg[b, r, c, kw*Cin+ci] = xpad[b, r, c+kw, ci]."""
    B, H, W, Cin = x.shape
    xp = jnp.pad(x, ((0, 0), (2, 2), (2, 2), (0, 0)))
    xg = jnp.concatenate([xp[:, :, kw:kw + W, :] for kw in range(5)], axis=-1)
    return xg.astype(jnp.bfloat16)


# ----------------------------------------------------------------------------
# Fused Linear(1024,64) -> Linear(64,10) kernel (weights pre-laid out as (in,out), bf16)
# ----------------------------------------------------------------------------
def _mlp2_kernel(x_ref, w1_ref, b1_ref, w2_ref, b2_ref, o_ref):
    h = jnp.dot(x_ref[...].astype(jnp.bfloat16), w1_ref[...],
                preferred_element_type=jnp.float32) + b1_ref[...]
    y = jnp.dot(h.astype(jnp.bfloat16), w2_ref[...],
                preferred_element_type=jnp.float32) + b2_ref[...]
    o_ref[...] = y


def mlp2(x, w1, b1, w2, b2):
    """y = (x @ w1 + b1) @ w2 + b2 in a single pallas_call."""
    B, K = x.shape
    H = w1.shape[1]
    N = w2.shape[1]
    nblk = -(-B // 256)                          # number of batch tiles
    bm = _round_up(-(-B // nblk), 8)             # minimal 8-aligned tile (no 2x over-pad)
    Bp = nblk * bm
    if Bp != B:
        x = jnp.pad(x, ((0, Bp - B), (0, 0)))
    out = pl.pallas_call(
        _mlp2_kernel,
        out_shape=jax.ShapeDtypeStruct((Bp, N), jnp.float32),
        grid_spec=pltpu.PrefetchScalarGridSpec(
            num_scalar_prefetch=0,
            grid=(nblk,),
            in_specs=[
                pl.BlockSpec((bm, K), lambda i: (i, 0)),
                pl.BlockSpec((K, H), lambda i: (0, 0)),
                pl.BlockSpec((1, H), lambda i: (0, 0)),
                pl.BlockSpec((H, N), lambda i: (0, 0)),
                pl.BlockSpec((1, N), lambda i: (0, 0)),
            ],
            out_specs=pl.BlockSpec((bm, N), lambda i: (i, 0)),
        ),
        compiler_params=pltpu.CompilerParams(dimension_semantics=("parallel",)),
    )(x, w1, b1.reshape(1, H), w2, b2.reshape(1, N))
    return out[:B]


# ----------------------------------------------------------------------------
# Parameter layout prep (torch layouts -> kernel layouts), forward pass
# ----------------------------------------------------------------------------
def prepare_params(p):
    def conv_w(w):   # (Cout, Cin, 5, 5) -> (5, 5*Cin, Cout) bf16, K index = kw*Cin+ci
        cout, cin = w.shape[0], w.shape[1]
        return (jnp.transpose(w, (2, 3, 1, 0))
                .reshape(5, 5 * cin, cout).astype(jnp.bfloat16))

    # fc1 columns: NCHW flatten order (c,h,w) -> NHWC (h,w,c) order produced by
    # the conv stack, then transpose to (in, out).
    fc1 = p["fc1_w"].reshape(64, 64, 4, 4)                 # (out, c, h, w)
    fc1 = jnp.transpose(fc1, (0, 2, 3, 1)).reshape(64, 1024)
    return {
        "w1": conv_w(p["w1"]), "b1": p["b1"],
        "w2": conv_w(p["w2"]), "b2": p["b2"],
        "w3": conv_w(p["w3"]), "b3": p["b3"],
        "fc1_w": jnp.transpose(fc1).astype(jnp.bfloat16), "fc1_b": p["fc1_b"],
        "fc2_w": jnp.transpose(p["fc2_w"]).astype(jnp.bfloat16), "fc2_b": p["fc2_b"],
    }


@jax.jit
def model_forward(x_nchw, kp):
    x = jnp.transpose(x_nchw, (0, 2, 3, 1))               # NCHW -> NHWC (channels -> lanes)
    x = conv5x5_pool(_pad_gather_bf16(x), kp["w1"], kp["b1"])    # (B, 16, 16, 32)
    x = conv5x5_pool(_pad_gather_bf16(x), kp["w2"], kp["b2"])    # (B,  8,  8, 32)
    x = conv5x5_pool(_pad_gather_bf16(x), kp["w3"], kp["b3"])    # (B,  4,  4, 64)
    feats = x.reshape(x.shape[0], -1)                     # NHWC flatten; fc1_w pre-permuted
    return mlp2(feats, kp["fc1_w"], kp["fc1_b"], kp["fc2_w"], kp["fc2_b"])


# ----------------------------------------------------------------------------
# Pure-JAX (XLA) reference mirroring the torch module, for a correctness check
# ----------------------------------------------------------------------------
def reference_forward(x, p):
    def conv(x, w, b):
        y = lax.conv_general_dilated(x, w, (1, 1), ((2, 2), (2, 2)),
                                     dimension_numbers=("NCHW", "OIHW", "NCHW"))
        return y + b[None, :, None, None]

    def pool(x):
        return lax.reduce_window(x, jnp.float32(-jnp.inf), lax.max,
                                 (1, 1, 2, 2), (1, 1, 2, 2), "VALID")

    x = pool(conv(x, p["w1"], p["b1"]))
    x = pool(conv(x, p["w2"], p["b2"]))
    x = pool(conv(x, p["w3"], p["b3"]))
    x = x.reshape(x.shape[0], -1)                         # NCHW flatten (torch order)
    x = x @ p["fc1_w"].T + p["fc1_b"]
    return x @ p["fc2_w"].T + p["fc2_b"]


# ----------------------------------------------------------------------------
# Deterministic parameter init (shapes follow the torch module __init__)
# ----------------------------------------------------------------------------
def init_params(key):
    ks = jax.random.split(key, 10)

    def rnd(k, shape, fan_in):
        return jax.random.normal(k, shape, jnp.float32) * (1.0 / jnp.sqrt(fan_in))

    return {
        "w1": rnd(ks[0], (32, 3, 5, 5), 3 * 25),
        "b1": rnd(ks[1], (32,), 3 * 25),
        "w2": rnd(ks[2], (32, 32, 5, 5), 32 * 25),
        "b2": rnd(ks[3], (32,), 32 * 25),
        "w3": rnd(ks[4], (64, 32, 5, 5), 32 * 25),
        "b3": rnd(ks[5], (64,), 32 * 25),
        "fc1_w": rnd(ks[6], (64, 1024), 1024),
        "fc1_b": rnd(ks[7], (64,), 1024),
        "fc2_w": rnd(ks[8], (10, 64), 64),
        "fc2_b": rnd(ks[9], (10,), 64),
    }


if __name__ == "__main__":
    key = jax.random.PRNGKey(0)
    kx, kp = jax.random.split(key)
    # Linear(1024, 64) after three 2x pools with 64 channels implies a 3x32x32 input.
    x = jax.random.normal(kx, (2, 3, 32, 32), jnp.float32)
    params = init_params(kp)
    kparams = prepare_params(params)

    out = jax.block_until_ready(model_forward(x, kparams))
    assert out.shape == (2, 10), out.shape
    assert out.dtype == jnp.float32

    ref = jax.block_until_ready(jax.jit(reference_forward)(x, params))
    err = float(jnp.max(jnp.abs(out - ref)))
    # bf16 MXU operands (per perf review): tolerance scaled to the logit magnitude.
    tol = 5e-2 * (1.0 + float(jnp.max(jnp.abs(ref))))
    assert err < tol, f"mismatch vs reference: max abs err = {err} (tol {tol})"
    print("KERNEL_OK")
</pallas_src>

<mosaic_0001>
module attributes {stable_mosaic.version = 11 : i64} {
  func.func @_conv5x5_pool_kernel(%arg0: i32, %arg1: memref<1x36x32x15xbf16, #tpu.memory_space<vmem>>, %arg2: memref<5x15x32xbf16, #tpu.memory_space<vmem>>, %arg3: memref<1x32xf32, #tpu.memory_space<vmem>>, %arg4: memref<1x16x16x32xf32, #tpu.memory_space<vmem>>, %arg5: memref<4x32x32xf32, #tpu.memory_space<vmem>>) attributes {dimension_semantics = [#tpu.dimension_semantics<parallel>], iteration_bounds = array<i64: 2>, scalar_prefetch = 0 : i64, scratch_operands = 1 : i64, tpu.core_type = #tpu.core_type<tc>, window_params = [{transform_indices = @transform_0, window_bounds = array<i64: 1, 36, 32, 15>}, {pipeline_mode = #tpu.pipeline_mode<synchronous>, transform_indices = @transform_1, window_bounds = array<i64: 5, 15, 32>}, {pipeline_mode = #tpu.pipeline_mode<synchronous>, transform_indices = @transform_2, window_bounds = array<i64: 1, 32>}, {transform_indices = @transform_3, window_bounds = array<i64: 1, 16, 16, 32>}]} {
    %c0 = arith.constant 0 : index
    %c0_0 = arith.constant 0 : index
    %0 = vector.load %arg3[%c0, %c0_0] : memref<1x32xf32, #tpu.memory_space<vmem>>, vector<1x32xf32>
    %1 = vector.shape_cast %0 : vector<1x32xf32> to vector<1x1x32xf32>
    %c0_i32 = arith.constant 0 : i32
    %c4_i32 = arith.constant 4 : i32
    %2 = arith.addi %c0_i32, %c4_i32 : i32
    %c1_i32 = arith.constant 1 : i32
    scf.for %arg6 = %c0_i32 to %2 step %c1_i32  : i32 {
      %c8_i32 = arith.constant 8 : i32
      %3 = arith.muli %arg6, %c8_i32 : i32
      %c4_i32_2 = arith.constant 4 : i32
      %4 = arith.muli %arg6, %c4_i32_2 : i32
      %5 = tpu.assume_multiple %3, 8 : i32
      %6 = tpu.assume_multiple %4, 4 : i32
      %cst = arith.constant 0.000000e+00 : f32
      %7 = vector.broadcast %cst : f32 to vector<256x32xf32>
      %c0_i32_3 = arith.constant 0 : i32
      %8 = arith.addi %5, %c0_i32_3 : i32
      %c0_4 = arith.constant 0 : index
      %9 = arith.index_cast %8 : i32 to index
      %c0_5 = arith.constant 0 : index
      %c0_6 = arith.constant 0 : index
      %10 = vector.load %arg1[%c0_4, %9, %c0_5, %c0_6] : memref<1x36x32x15xbf16, #tpu.memory_space<vmem>>, vector<1x8x32x15xbf16>
      %11 = vector.shape_cast %10 : vector<1x8x32x15xbf16> to vector<8x32x15xbf16>
      %12 = vector.shape_cast %11 : vector<8x32x15xbf16> to vector<256x15xbf16>
      %c0_7 = arith.constant 0 : index
      %c0_8 = arith.constant 0 : index
      %c0_9 = arith.constant 0 : index
      %13 = vector.load %arg2[%c0_7, %c0_8, %c0_9] : memref<5x15x32xbf16, #tpu.memory_space<vmem>>, vector<1x15x32xbf16>
      %14 = vector.shape_cast %13 : vector<1x15x32xbf16> to vector<15x32xbf16>
      %cst_10 = arith.constant dense<0.000000e+00> : vector<256x32xf32>
      %15 = tpu.matmul %12, %14, %cst_10 {dimension_numbers = #tpu.dot_dimension_numbers<[1], [0], [0], [1], [0, 0, 1, 1], [], []>} : vector<256x15xbf16>, vector<15x32xbf16>, vector<256x32xf32> -> vector<256x32xf32>
      %16 = arith.addf %7, %15 : vector<256x32xf32>
      %c1_i32_11 = arith.constant 1 : i32
      %17 = arith.addi %5, %c1_i32_11 : i32
      %c0_12 = arith.constant 0 : index
      %18 = arith.index_cast %17 : i32 to index
      %c0_13 = arith.constant 0 : index
      %c0_14 = arith.constant 0 : index
      %19 = vector.load %arg1[%c0_12, %18, %c0_13, %c0_14] : memref<1x36x32x15xbf16, #tpu.memory_space<vmem>>, vector<1x8x32x15xbf16>
      %20 = vector.shape_cast %19 : vector<1x8x32x15xbf16> to vector<8x32x15xbf16>
      %21 = vector.shape_cast %20 : vector<8x32x15xbf16> to vector<256x15xbf16>
      %c1 = arith.constant 1 : index
      %c0_15 = arith.constant 0 : index
      %c0_16 = arith.constant 0 : index
      %22 = vector.load %arg2[%c1, %c0_15, %c0_16] : memref<5x15x32xbf16, #tpu.memory_space<vmem>>, vector<1x15x32xbf16>
      %23 = vector.shape_cast %22 : vector<1x15x32xbf16> to vector<15x32xbf16>
      %cst_17 = arith.constant dense<0.000000e+00> : vector<256x32xf32>
      %24 = tpu.matmul %21, %23, %cst_17 {dimension_numbers = #tpu.dot_dimension_numbers<[1], [0], [0], [1], [0, 0, 1, 1], [], []>} : vector<256x15xbf16>, vector<15x32xbf16>, vector<256x32xf32> -> vector<256x32xf32>
      %25 = arith.addf %16, %24 : vector<256x32xf32>
      %c2_i32 = arith.constant 2 : i32
      %26 = arith.addi %5, %c2_i32 : i32
      %c0_18 = arith.constant 0 : index
      %27 = arith.index_cast %26 : i32 to index
      %c0_19 = arith.constant 0 : index
      %c0_20 = arith.constant 0 : index
      %28 = vector.load %arg1[%c0_18, %27, %c0_19, %c0_20] : memref<1x36x32x15xbf16, #tpu.memory_space<vmem>>, vector<1x8x32x15xbf16>
      %29 = vector.shape_cast %28 : vector<1x8x32x15xbf16> to vector<8x32x15xbf16>
      %30 = vector.shape_cast %29 : vector<8x32x15xbf16> to vector<256x15xbf16>
      %c2 = arith.constant 2 : index
      %c0_21 = arith.constant 0 : index
      %c0_22 = arith.constant 0 : index
      %31 = vector.load %arg2[%c2, %c0_21, %c0_22] : memref<5x15x32xbf16, #tpu.memory_space<vmem>>, vector<1x15x32xbf16>
      %32 = vector.shape_cast %31 : vector<1x15x32xbf16> to vector<15x32xbf16>
      %cst_23 = arith.constant dense<0.000000e+00> : vector<256x32xf32>
      %33 = tpu.matmul %30, %32, %cst_23 {dimension_numbers = #tpu.dot_dimension_numbers<[1], [0], [0], [1], [0, 0, 1, 1], [], []>} : vector<256x15xbf16>, vector<15x32xbf16>, vector<256x32xf32> -> vector<256x32xf32>
      %34 = arith.addf %25, %33 : vector<256x32xf32>
      %c3_i32 = arith.constant 3 : i32
      %35 = arith.addi %5, %c3_i32 : i32
      %c0_24 = arith.constant 0 : index
      %36 = arith.index_cast %35 : i32 to index
      %c0_25 = arith.constant 0 : index
      %c0_26 = arith.constant 0 : index
      %37 = vector.load %arg1[%c0_24, %36, %c0_25, %c0_26] : memref<1x36x32x15xbf16, #tpu.memory_space<vmem>>, vector<1x8x32x15xbf16>
      %38 = vector.shape_cast %37 : vector<1x8x32x15xbf16> to vector<8x32x15xbf16>
      %39 = vector.shape_cast %38 : vector<8x32x15xbf16> to vector<256x15xbf16>
      %c3 = arith.constant 3 : index
      %c0_27 = arith.constant 0 : index
      %c0_28 = arith.constant 0 : index
      %40 = vector.load %arg2[%c3, %c0_27, %c0_28] : memref<5x15x32xbf16, #tpu.memory_space<vmem>>, vector<1x15x32xbf16>
      %41 = vector.shape_cast %40 : vector<1x15x32xbf16> to vector<15x32xbf16>
      %cst_29 = arith.constant dense<0.000000e+00> : vector<256x32xf32>
      %42 = tpu.matmul %39, %41, %cst_29 {dimension_numbers = #tpu.dot_dimension_numbers<[1], [0], [0], [1], [0, 0, 1, 1], [], []>} : vector<256x15xbf16>, vector<15x32xbf16>, vector<256x32xf32> -> vector<256x32xf32>
      %43 = arith.addf %34, %42 : vector<256x32xf32>
      %c4_i32_30 = arith.constant 4 : i32
      %44 = arith.addi %5, %c4_i32_30 : i32
      %c0_31 = arith.constant 0 : index
      %45 = arith.index_cast %44 : i32 to index
      %c0_32 = arith.constant 0 : index
      %c0_33 = arith.constant 0 : index
      %46 = vector.load %arg1[%c0_31, %45, %c0_32, %c0_33] : memref<1x36x32x15xbf16, #tpu.memory_space<vmem>>, vector<1x8x32x15xbf16>
      %47 = vector.shape_cast %46 : vector<1x8x32x15xbf16> to vector<8x32x15xbf16>
      %48 = vector.shape_cast %47 : vector<8x32x15xbf16> to vector<256x15xbf16>
      %c4 = arith.constant 4 : index
      %c0_34 = arith.constant 0 : index
      %c0_35 = arith.constant 0 : index
      %49 = vector.load %arg2[%c4, %c0_34, %c0_35] : memref<5x15x32xbf16, #tpu.memory_space<vmem>>, vector<1x15x32xbf16>
      %50 = vector.shape_cast %49 : vector<1x15x32xbf16> to vector<15x32xbf16>
      %cst_36 = arith.constant dense<0.000000e+00> : vector<256x32xf32>
      %51 = tpu.matmul %48, %50, %cst_36 {dimension_numbers = #tpu.dot_dimension_numbers<[1], [0], [0], [1], [0, 0, 1, 1], [], []>} : vector<256x15xbf16>, vector<15x32xbf16>, vector<256x32xf32> -> vector<256x32xf32>
      %52 = arith.addf %43, %51 : vector<256x32xf32>
      %53 = vector.shape_cast %52 : vector<256x32xf32> to vector<4x2x32x32xf32>
      %54 = vector.extract_strided_slice %53 {offsets = [0, 0, 0, 0], sizes = [4, 1, 32, 32], strides = [1, 1, 1, 1]} : vector<4x2x32x32xf32> to vector<4x1x32x32xf32>
      %55 = vector.shape_cast %54 : vector<4x1x32x32xf32> to vector<4x32x32xf32>
      %56 = vector.extract_strided_slice %53 {offsets = [0, 1, 0, 0], sizes = [4, 1, 32, 32], strides = [1, 1, 1, 1]} : vector<4x2x32x32xf32> to vector<4x1x32x32xf32>
      %57 = vector.shape_cast %56 : vector<4x1x32x32xf32> to vector<4x32x32xf32>
      %58 = arith.maximumf %55, %57 : vector<4x32x32xf32>
      %c0_37 = arith.constant 0 : index
      %c0_38 = arith.constant 0 : index
      %c0_39 = arith.constant 0 : index
      %59 = vector.load %arg5[%c0_37, %c0_38, %c0_39] : memref<4x32x32xf32, #tpu.memory_space<vmem>>, vector<4x32x32xf32>
      tpu.vector_store %arg5[%c0_37, %c0_38, %c0_39], %58 {strides = array<i32>} : memref<4x32x32xf32, #tpu.memory_space<vmem>>, vector<4x32x32xf32>,
      %c0_40 = arith.constant 0 : index
      %c0_41 = arith.constant 0 : index
      %c0_42 = arith.constant 0 : index
      %60 = tpu.strided_load %arg5[%c0_40, %c0_41, %c0_42] {strides = array<i32: 1, 2, 1>} : memref<4x32x32xf32, #tpu.memory_space<vmem>>, vector<4x16x32xf32>
      %c0_43 = arith.constant 0 : index
      %c1_44 = arith.constant 1 : index
      %c0_45 = arith.constant 0 : index
      %61 = tpu.strided_load %arg5[%c0_43, %c1_44, %c0_45] {strides = array<i32: 1, 2, 1>} : memref<4x32x32xf32, #tpu.memory_space<vmem>>, vector<4x16x32xf32>
      %62 = arith.maximumf %60, %61 : vector<4x16x32xf32>
      %63 = vector.broadcast %1 : vector<1x1x32xf32> to vector<4x16x32xf32>
      %64 = arith.addf %62, %63 : vector<4x16x32xf32>
      %c0_46 = arith.constant 0 : index
      %65 = arith.index_cast %6 : i32 to index
      %c0_47 = arith.constant 0 : index
      %c0_48 = arith.constant 0 : index
      %66 = vector.load %arg4[%c0_46, %65, %c0_47, %c0_48] : memref<1x16x16x32xf32, #tpu.memory_space<vmem>>, vector<1x4x16x32xf32>
      %67 = vector.shape_cast %66 : vector<1x4x16x32xf32> to vector<4x16x32xf32>
      %68 = vector.shape_cast %64 : vector<4x16x32xf32> to vector<1x4x16x32xf32>
      tpu.vector_store %arg4[%c0_46, %65, %c0_47, %c0_48], %68 {strides = array<i32>} : memref<1x16x16x32xf32, #tpu.memory_space<vmem>>, vector<1x4x16x32xf32>,
    }
    %c4_i32_1 = arith.constant 4 : i32
    return
  }
  func.func @transform_0(%arg0: i32) -> (i32, i32, i32, i32) {
    %c0_i32 = arith.constant 0 : i32
    %c0_i32_0 = arith.constant 0 : i32
    %c0_i32_1 = arith.constant 0 : i32
    %c0_i32_2 = arith.constant 0 : i32
    return %arg0, %c0_i32, %c0_i32_0, %c0_i32_1 : i32, i32, i32, i32
  }
  func.func @transform_1(%arg0: i32) -> (i32, i32, i32) {
    %c0_i32 = arith.constant 0 : i32
    %c0_i32_0 = arith.constant 0 : i32
    %c0_i32_1 = arith.constant 0 : i32
    %c0_i32_2 = arith.constant 0 : i32
    return %c0_i32, %c0_i32_0, %c0_i32_1 : i32, i32, i32
  }
  func.func @transform_2(%arg0: i32) -> (i32, i32) {
    %c0_i32 = arith.constant 0 : i32
    %c0_i32_0 = arith.constant 0 : i32
    %c0_i32_1 = arith.constant 0 : i32
    return %c0_i32, %c0_i32_0 : i32, i32
  }
  func.func @transform_3(%arg0: i32) -> (i32, i32, i32, i32) {
    %c0_i32 = arith.constant 0 : i32
    %c0_i32_0 = arith.constant 0 : i32
    %c0_i32_1 = arith.constant 0 : i32
    %c0_i32_2 = arith.constant 0 : i32
    return %arg0, %c0_i32, %c0_i32_0, %c0_i32_1 : i32, i32, i32, i32
  }
}

module attributes {stable_mosaic.version = 11 : i64} {
  func.func @_conv5x5_pool_kernel(%arg0: i32, %arg1: memref<1x20x16x160xbf16, #tpu.memory_space<vmem>>, %arg2: memref<5x160x32xbf16, #tpu.memory_space<vmem>>, %arg3: memref<1x32xf32, #tpu.memory_space<vmem>>, %arg4: memref<1x8x8x32xf32, #tpu.memory_space<vmem>>, %arg5: memref<4x16x32xf32, #tpu.memory_space<vmem>>) attributes {dimension_semantics = [#tpu.dimension_semantics<parallel>], iteration_bounds = array<i64: 2>, scalar_prefetch = 0 : i64, scratch_operands = 1 : i64, tpu.core_type = #tpu.core_type<tc>, window_params = [{transform_indices = @transform_0, window_bounds = array<i64: 1, 20, 16, 160>}, {pipeline_mode = #tpu.pipeline_mode<synchronous>, transform_indices = @transform_1, window_bounds = array<i64: 5, 160, 32>}, {pipeline_mode = #tpu.pipeline_mode<synchronous>, transform_indices = @transform_2, window_bounds = array<i64: 1, 32>}, {transform_indices = @transform_3, window_bounds = array<i64: 1, 8, 8, 32>}]} {
    %c0 = arith.constant 0 : index
    %c0_0 = arith.constant 0 : index
    %0 = vector.load %arg3[%c0, %c0_0] : memref<1x32xf32, #tpu.memory_space<vmem>>, vector<1x32xf32>
    %1 = vector.shape_cast %0 : vector<1x32xf32> to vector<1x1x32xf32>
    %c0_i32 = arith.constant 0 : i32
    %c2_i32 = arith.constant 2 : i32
    %2 = arith.addi %c0_i32, %c2_i32 : i32
    %c1_i32 = arith.constant 1 : i32
    scf.for %arg6 = %c0_i32 to %2 step %c1_i32  : i32 {
      %c8_i32 = arith.constant 8 : i32
      %3 = arith.muli %arg6, %c8_i32 : i32
      %c4_i32 = arith.constant 4 : i32
      %4 = arith.muli %arg6, %c4_i32 : i32
      %5 = tpu.assume_multiple %3, 8 : i32
      %6 = tpu.assume_multiple %4, 4 : i32
      %cst = arith.constant 0.000000e+00 : f32
      %7 = vector.broadcast %cst : f32 to vector<128x32xf32>
      %c0_i32_2 = arith.constant 0 : i32
      %8 = arith.addi %5, %c0_i32_2 : i32
      %c0_3 = arith.constant 0 : index
      %9 = arith.index_cast %8 : i32 to index
      %c0_4 = arith.constant 0 : index
      %c0_5 = arith.constant 0 : index
      %10 = vector.load %arg1[%c0_3, %9, %c0_4, %c0_5] : memref<1x20x16x160xbf16, #tpu.memory_space<vmem>>, vector<1x8x16x160xbf16>
      %11 = vector.shape_cast %10 : vector<1x8x16x160xbf16> to vector<8x16x160xbf16>
      %12 = vector.shape_cast %11 : vector<8x16x160xbf16> to vector<128x160xbf16>
      %c0_6 = arith.constant 0 : index
      %c0_7 = arith.constant 0 : index
      %c0_8 = arith.constant 0 : index
      %13 = vector.load %arg2[%c0_6, %c0_7, %c0_8] : memref<5x160x32xbf16, #tpu.memory_space<vmem>>, vector<1x160x32xbf16>
      %14 = vector.shape_cast %13 : vector<1x160x32xbf16> to vector<160x32xbf16>
      %cst_9 = arith.constant dense<0.000000e+00> : vector<128x32xf32>
      %15 = tpu.matmul %12, %14, %cst_9 {dimension_numbers = #tpu.dot_dimension_numbers<[1], [0], [0], [1], [0, 0, 1, 1], [], []>} : vector<128x160xbf16>, vector<160x32xbf16>, vector<128x32xf32> -> vector<128x32xf32>
      %16 = arith.addf %7, %15 : vector<128x32xf32>
      %c1_i32_10 = arith.constant 1 : i32
      %17 = arith.addi %5, %c1_i32_10 : i32
      %c0_11 = arith.constant 0 : index
      %18 = arith.index_cast %17 : i32 to index
      %c0_12 = arith.constant 0 : index
      %c0_13 = arith.constant 0 : index
      %19 = vector.load %arg1[%c0_11, %18, %c0_12, %c0_13] : memref<1x20x16x160xbf16, #tpu.memory_space<vmem>>, vector<1x8x16x160xbf16>
      %20 = vector.shape_cast %19 : vector<1x8x16x160xbf16> to vector<8x16x160xbf16>
      %21 = vector.shape_cast %20 : vector<8x16x160xbf16> to vector<128x160xbf16>
      %c1 = arith.constant 1 : index
      %c0_14 = arith.constant 0 : index
      %c0_15 = arith.constant 0 : index
      %22 = vector.load %arg2[%c1, %c0_14, %c0_15] : memref<5x160x32xbf16, #tpu.memory_space<vmem>>, vector<1x160x32xbf16>
      %23 = vector.shape_cast %22 : vector<1x160x32xbf16> to vector<160x32xbf16>
      %cst_16 = arith.constant dense<0.000000e+00> : vector<128x32xf32>
      %24 = tpu.matmul %21, %23, %cst_16 {dimension_numbers = #tpu.dot_dimension_numbers<[1], [0], [0], [1], [0, 0, 1, 1], [], []>} : vector<128x160xbf16>, vector<160x32xbf16>, vector<128x32xf32> -> vector<128x32xf32>
      %25 = arith.addf %16, %24 : vector<128x32xf32>
      %c2_i32_17 = arith.constant 2 : i32
      %26 = arith.addi %5, %c2_i32_17 : i32
      %c0_18 = arith.constant 0 : index
      %27 = arith.index_cast %26 : i32 to index
      %c0_19 = arith.constant 0 : index
      %c0_20 = arith.constant 0 : index
      %28 = vector.load %arg1[%c0_18, %27, %c0_19, %c0_20] : memref<1x20x16x160xbf16, #tpu.memory_space<vmem>>, vector<1x8x16x160xbf16>
      %29 = vector.shape_cast %28 : vector<1x8x16x160xbf16> to vector<8x16x160xbf16>
      %30 = vector.shape_cast %29 : vector<8x16x160xbf16> to vector<128x160xbf16>
      %c2 = arith.constant 2 : index
      %c0_21 = arith.constant 0 : index
      %c0_22 = arith.constant 0 : index
      %31 = vector.load %arg2[%c2, %c0_21, %c0_22] : memref<5x160x32xbf16, #tpu.memory_space<vmem>>, vector<1x160x32xbf16>
      %32 = vector.shape_cast %31 : vector<1x160x32xbf16> to vector<160x32xbf16>
      %cst_23 = arith.constant dense<0.000000e+00> : vector<128x32xf32>
      %33 = tpu.matmul %30, %32, %cst_23 {dimension_numbers = #tpu.dot_dimension_numbers<[1], [0], [0], [1], [0, 0, 1, 1], [], []>} : vector<128x160xbf16>, vector<160x32xbf16>, vector<128x32xf32> -> vector<128x32xf32>
      %34 = arith.addf %25, %33 : vector<128x32xf32>
      %c3_i32 = arith.constant 3 : i32
      %35 = arith.addi %5, %c3_i32 : i32
      %c0_24 = arith.constant 0 : index
      %36 = arith.index_cast %35 : i32 to index
      %c0_25 = arith.constant 0 : index
      %c0_26 = arith.constant 0 : index
      %37 = vector.load %arg1[%c0_24, %36, %c0_25, %c0_26] : memref<1x20x16x160xbf16, #tpu.memory_space<vmem>>, vector<1x8x16x160xbf16>
      %38 = vector.shape_cast %37 : vector<1x8x16x160xbf16> to vector<8x16x160xbf16>
      %39 = vector.shape_cast %38 : vector<8x16x160xbf16> to vector<128x160xbf16>
      %c3 = arith.constant 3 : index
      %c0_27 = arith.constant 0 : index
      %c0_28 = arith.constant 0 : index
      %40 = vector.load %arg2[%c3, %c0_27, %c0_28] : memref<5x160x32xbf16, #tpu.memory_space<vmem>>, vector<1x160x32xbf16>
      %41 = vector.shape_cast %40 : vector<1x160x32xbf16> to vector<160x32xbf16>
      %cst_29 = arith.constant dense<0.000000e+00> : vector<128x32xf32>
      %42 = tpu.matmul %39, %41, %cst_29 {dimension_numbers = #tpu.dot_dimension_numbers<[1], [0], [0], [1], [0, 0, 1, 1], [], []>} : vector<128x160xbf16>, vector<160x32xbf16>, vector<128x32xf32> -> vector<128x32xf32>
      %43 = arith.addf %34, %42 : vector<128x32xf32>
      %c4_i32_30 = arith.constant 4 : i32
      %44 = arith.addi %5, %c4_i32_30 : i32
      %c0_31 = arith.constant 0 : index
      %45 = arith.index_cast %44 : i32 to index
      %c0_32 = arith.constant 0 : index
      %c0_33 = arith.constant 0 : index
      %46 = vector.load %arg1[%c0_31, %45, %c0_32, %c0_33] : memref<1x20x16x160xbf16, #tpu.memory_space<vmem>>, vector<1x8x16x160xbf16>
      %47 = vector.shape_cast %46 : vector<1x8x16x160xbf16> to vector<8x16x160xbf16>
      %48 = vector.shape_cast %47 : vector<8x16x160xbf16> to vector<128x160xbf16>
      %c4 = arith.constant 4 : index
      %c0_34 = arith.constant 0 : index
      %c0_35 = arith.constant 0 : index
      %49 = vector.load %arg2[%c4, %c0_34, %c0_35] : memref<5x160x32xbf16, #tpu.memory_space<vmem>>, vector<1x160x32xbf16>
      %50 = vector.shape_cast %49 : vector<1x160x32xbf16> to vector<160x32xbf16>
      %cst_36 = arith.constant dense<0.000000e+00> : vector<128x32xf32>
      %51 = tpu.matmul %48, %50, %cst_36 {dimension_numbers = #tpu.dot_dimension_numbers<[1], [0], [0], [1], [0, 0, 1, 1], [], []>} : vector<128x160xbf16>, vector<160x32xbf16>, vector<128x32xf32> -> vector<128x32xf32>
      %52 = arith.addf %43, %51 : vector<128x32xf32>
      %53 = vector.shape_cast %52 : vector<128x32xf32> to vector<4x2x16x32xf32>
      %54 = vector.extract_strided_slice %53 {offsets = [0, 0, 0, 0], sizes = [4, 1, 16, 32], strides = [1, 1, 1, 1]} : vector<4x2x16x32xf32> to vector<4x1x16x32xf32>
      %55 = vector.shape_cast %54 : vector<4x1x16x32xf32> to vector<4x16x32xf32>
      %56 = vector.extract_strided_slice %53 {offsets = [0, 1, 0, 0], sizes = [4, 1, 16, 32], strides = [1, 1, 1, 1]} : vector<4x2x16x32xf32> to vector<4x1x16x32xf32>
      %57 = vector.shape_cast %56 : vector<4x1x16x32xf32> to vector<4x16x32xf32>
      %58 = arith.maximumf %55, %57 : vector<4x16x32xf32>
      %c0_37 = arith.constant 0 : index
      %c0_38 = arith.constant 0 : index
      %c0_39 = arith.constant 0 : index
      %59 = vector.load %arg5[%c0_37, %c0_38, %c0_39] : memref<4x16x32xf32, #tpu.memory_space<vmem>>, vector<4x16x32xf32>
      tpu.vector_store %arg5[%c0_37, %c0_38, %c0_39], %58 {strides = array<i32>} : memref<4x16x32xf32, #tpu.memory_space<vmem>>, vector<4x16x32xf32>,
      %c0_40 = arith.constant 0 : index
      %c0_41 = arith.constant 0 : index
      %c0_42 = arith.constant 0 : index
      %60 = tpu.strided_load %arg5[%c0_40, %c0_41, %c0_42] {strides = array<i32: 1, 2, 1>} : memref<4x16x32xf32, #tpu.memory_space<vmem>>, vector<4x8x32xf32>
      %c0_43 = arith.constant 0 : index
      %c1_44 = arith.constant 1 : index
      %c0_45 = arith.constant 0 : index
      %61 = tpu.strided_load %arg5[%c0_43, %c1_44, %c0_45] {strides = array<i32: 1, 2, 1>} : memref<4x16x32xf32, #tpu.memory_space<vmem>>, vector<4x8x32xf32>
      %62 = arith.maximumf %60, %61 : vector<4x8x32xf32>
      %63 = vector.broadcast %1 : vector<1x1x32xf32> to vector<4x8x32xf32>
      %64 = arith.addf %62, %63 : vector<4x8x32xf32>
      %c0_46 = arith.constant 0 : index
      %65 = arith.index_cast %6 : i32 to index
      %c0_47 = arith.constant 0 : index
      %c0_48 = arith.constant 0 : index
      %66 = vector.load %arg4[%c0_46, %65, %c0_47, %c0_48] : memref<1x8x8x32xf32, #tpu.memory_space<vmem>>, vector<1x4x8x32xf32>
      %67 = vector.shape_cast %66 : vector<1x4x8x32xf32> to vector<4x8x32xf32>
      %68 = vector.shape_cast %64 : vector<4x8x32xf32> to vector<1x4x8x32xf32>
      tpu.vector_store %arg4[%c0_46, %65, %c0_47, %c0_48], %68 {strides = array<i32>} : memref<1x8x8x32xf32, #tpu.memory_space<vmem>>, vector<1x4x8x32xf32>,
    }
    %c2_i32_1 = arith.constant 2 : i32
    return
  }
  func.func @transform_0(%arg0: i32) -> (i32, i32, i32, i32) {
    %c0_i32 = arith.constant 0 : i32
    %c0_i32_0 = arith.constant 0 : i32
    %c0_i32_1 = arith.constant 0 : i32
    %c0_i32_2 = arith.constant 0 : i32
    return %arg0, %c0_i32, %c0_i32_0, %c0_i32_1 : i32, i32, i32, i32
  }
  func.func @transform_1(%arg0: i32) -> (i32, i32, i32) {
    %c0_i32 = arith.constant 0 : i32
    %c0_i32_0 = arith.constant 0 : i32
    %c0_i32_1 = arith.constant 0 : i32
    %c0_i32_2 = arith.constant 0 : i32
    return %c0_i32, %c0_i32_0, %c0_i32_1 : i32, i32, i32
  }
  func.func @transform_2(%arg0: i32) -> (i32, i32) {
    %c0_i32 = arith.constant 0 : i32
    %c0_i32_0 = arith.constant 0 : i32
    %c0_i32_1 = arith.constant 0 : i32
    return %c0_i32, %c0_i32_0 : i32, i32
  }
  func.func @transform_3(%arg0: i32) -> (i32, i32, i32, i32) {
    %c0_i32 = arith.constant 0 : i32
    %c0_i32_0 = arith.constant 0 : i32
    %c0_i32_1 = arith.constant 0 : i32
    %c0_i32_2 = arith.constant 0 : i32
    return %arg0, %c0_i32, %c0_i32_0, %c0_i32_1 : i32, i32, i32, i32
  }
}

module attributes {stable_mosaic.version = 11 : i64} {
  func.func @_conv5x5_pool_kernel(%arg0: i32, %arg1: memref<1x12x8x160xbf16, #tpu.memory_space<vmem>>, %arg2: memref<5x160x64xbf16, #tpu.memory_space<vmem>>, %arg3: memref<1x64xf32, #tpu.memory_space<vmem>>, %arg4: memref<1x4x4x64xf32, #tpu.memory_space<vmem>>, %arg5: memref<4x8x64xf32, #tpu.memory_space<vmem>>) attributes {dimension_semantics = [#tpu.dimension_semantics<parallel>], iteration_bounds = array<i64: 2>, scalar_prefetch = 0 : i64, scratch_operands = 1 : i64, tpu.core_type = #tpu.core_type<tc>, window_params = [{transform_indices = @transform_0, window_bounds = array<i64: 1, 12, 8, 160>}, {pipeline_mode = #tpu.pipeline_mode<synchronous>, transform_indices = @transform_1, window_bounds = array<i64: 5, 160, 64>}, {pipeline_mode = #tpu.pipeline_mode<synchronous>, transform_indices = @transform_2, window_bounds = array<i64: 1, 64>}, {transform_indices = @transform_3, window_bounds = array<i64: 1, 4, 4, 64>}]} {
    %c0 = arith.constant 0 : index
    %c0_0 = arith.constant 0 : index
    %0 = vector.load %arg3[%c0, %c0_0] : memref<1x64xf32, #tpu.memory_space<vmem>>, vector<1x64xf32>
    %1 = vector.shape_cast %0 : vector<1x64xf32> to vector<1x1x64xf32>
    %cst = arith.constant 0.000000e+00 : f32
    %2 = vector.broadcast %cst : f32 to vector<64x64xf32>
    %c0_1 = arith.constant 0 : index
    %c0_2 = arith.constant 0 : index
    %c0_3 = arith.constant 0 : index
    %c0_4 = arith.constant 0 : index
    %3 = vector.load %arg1[%c0_1, %c0_2, %c0_3, %c0_4] : memref<1x12x8x160xbf16, #tpu.memory_space<vmem>>, vector<1x8x8x160xbf16>
    %4 = vector.shape_cast %3 : vector<1x8x8x160xbf16> to vector<8x8x160xbf16>
    %5 = vector.shape_cast %4 : vector<8x8x160xbf16> to vector<64x160xbf16>
    %c0_5 = arith.constant 0 : index
    %c0_6 = arith.constant 0 : index
    %c0_7 = arith.constant 0 : index
    %6 = vector.load %arg2[%c0_5, %c0_6, %c0_7] : memref<5x160x64xbf16, #tpu.memory_space<vmem>>, vector<1x160x64xbf16>
    %7 = vector.shape_cast %6 : vector<1x160x64xbf16> to vector<160x64xbf16>
    %cst_8 = arith.constant dense<0.000000e+00> : vector<64x64xf32>
    %8 = tpu.matmul %5, %7, %cst_8 {dimension_numbers = #tpu.dot_dimension_numbers<[1], [0], [0], [1], [0, 0, 1, 1], [], []>} : vector<64x160xbf16>, vector<160x64xbf16>, vector<64x64xf32> -> vector<64x64xf32>
    %9 = arith.addf %2, %8 : vector<64x64xf32>
    %c0_9 = arith.constant 0 : index
    %c1 = arith.constant 1 : index
    %c0_10 = arith.constant 0 : index
    %c0_11 = arith.constant 0 : index
    %10 = vector.load %arg1[%c0_9, %c1, %c0_10, %c0_11] : memref<1x12x8x160xbf16, #tpu.memory_space<vmem>>, vector<1x8x8x160xbf16>
    %11 = vector.shape_cast %10 : vector<1x8x8x160xbf16> to vector<8x8x160xbf16>
    %12 = vector.shape_cast %11 : vector<8x8x160xbf16> to vector<64x160xbf16>
    %c1_12 = arith.constant 1 : index
    %c0_13 = arith.constant 0 : index
    %c0_14 = arith.constant 0 : index
    %13 = vector.load %arg2[%c1_12, %c0_13, %c0_14] : memref<5x160x64xbf16, #tpu.memory_space<vmem>>, vector<1x160x64xbf16>
    %14 = vector.shape_cast %13 : vector<1x160x64xbf16> to vector<160x64xbf16>
    %cst_15 = arith.constant dense<0.000000e+00> : vector<64x64xf32>
    %15 = tpu.matmul %12, %14, %cst_15 {dimension_numbers = #tpu.dot_dimension_numbers<[1], [0], [0], [1], [0, 0, 1, 1], [], []>} : vector<64x160xbf16>, vector<160x64xbf16>, vector<64x64xf32> -> vector<64x64xf32>
    %16 = arith.addf %9, %15 : vector<64x64xf32>
    %c0_16 = arith.constant 0 : index
    %c2 = arith.constant 2 : index
    %c0_17 = arith.constant 0 : index
    %c0_18 = arith.constant 0 : index
    %17 = vector.load %arg1[%c0_16, %c2, %c0_17, %c0_18] : memref<1x12x8x160xbf16, #tpu.memory_space<vmem>>, vector<1x8x8x160xbf16>
    %18 = vector.shape_cast %17 : vector<1x8x8x160xbf16> to vector<8x8x160xbf16>
    %19 = vector.shape_cast %18 : vector<8x8x160xbf16> to vector<64x160xbf16>
    %c2_19 = arith.constant 2 : index
    %c0_20 = arith.constant 0 : index
    %c0_21 = arith.constant 0 : index
    %20 = vector.load %arg2[%c2_19, %c0_20, %c0_21] : memref<5x160x64xbf16, #tpu.memory_space<vmem>>, vector<1x160x64xbf16>
    %21 = vector.shape_cast %20 : vector<1x160x64xbf16> to vector<160x64xbf16>
    %cst_22 = arith.constant dense<0.000000e+00> : vector<64x64xf32>
    %22 = tpu.matmul %19, %21, %cst_22 {dimension_numbers = #tpu.dot_dimension_numbers<[1], [0], [0], [1], [0, 0, 1, 1], [], []>} : vector<64x160xbf16>, vector<160x64xbf16>, vector<64x64xf32> -> vector<64x64xf32>
    %23 = arith.addf %16, %22 : vector<64x64xf32>
    %c0_23 = arith.constant 0 : index
    %c3 = arith.constant 3 : index
    %c0_24 = arith.constant 0 : index
    %c0_25 = arith.constant 0 : index
    %24 = vector.load %arg1[%c0_23, %c3, %c0_24, %c0_25] : memref<1x12x8x160xbf16, #tpu.memory_space<vmem>>, vector<1x8x8x160xbf16>
    %25 = vector.shape_cast %24 : vector<1x8x8x160xbf16> to vector<8x8x160xbf16>
    %26 = vector.shape_cast %25 : vector<8x8x160xbf16> to vector<64x160xbf16>
    %c3_26 = arith.constant 3 : index
    %c0_27 = arith.constant 0 : index
    %c0_28 = arith.constant 0 : index
    %27 = vector.load %arg2[%c3_26, %c0_27, %c0_28] : memref<5x160x64xbf16, #tpu.memory_space<vmem>>, vector<1x160x64xbf16>
    %28 = vector.shape_cast %27 : vector<1x160x64xbf16> to vector<160x64xbf16>
    %cst_29 = arith.constant dense<0.000000e+00> : vector<64x64xf32>
    %29 = tpu.matmul %26, %28, %cst_29 {dimension_numbers = #tpu.dot_dimension_numbers<[1], [0], [0], [1], [0, 0, 1, 1], [], []>} : vector<64x160xbf16>, vector<160x64xbf16>, vector<64x64xf32> -> vector<64x64xf32>
    %30 = arith.addf %23, %29 : vector<64x64xf32>
    %c0_30 = arith.constant 0 : index
    %c4 = arith.constant 4 : index
    %c0_31 = arith.constant 0 : index
    %c0_32 = arith.constant 0 : index
    %31 = vector.load %arg1[%c0_30, %c4, %c0_31, %c0_32] : memref<1x12x8x160xbf16, #tpu.memory_space<vmem>>, vector<1x8x8x160xbf16>
    %32 = vector.shape_cast %31 : vector<1x8x8x160xbf16> to vector<8x8x160xbf16>
    %33 = vector.shape_cast %32 : vector<8x8x160xbf16> to vector<64x160xbf16>
    %c4_33 = arith.constant 4 : index
    %c0_34 = arith.constant 0 : index
    %c0_35 = arith.constant 0 : index
    %34 = vector.load %arg2[%c4_33, %c0_34, %c0_35] : memref<5x160x64xbf16, #tpu.memory_space<vmem>>, vector<1x160x64xbf16>
    %35 = vector.shape_cast %34 : vector<1x160x64xbf16> to vector<160x64xbf16>
    %cst_36 = arith.constant dense<0.000000e+00> : vector<64x64xf32>
    %36 = tpu.matmul %33, %35, %cst_36 {dimension_numbers = #tpu.dot_dimension_numbers<[1], [0], [0], [1], [0, 0, 1, 1], [], []>} : vector<64x160xbf16>, vector<160x64xbf16>, vector<64x64xf32> -> vector<64x64xf32>
    %37 = arith.addf %30, %36 : vector<64x64xf32>
    %38 = vector.shape_cast %37 : vector<64x64xf32> to vector<4x2x8x64xf32>
    %39 = vector.extract_strided_slice %38 {offsets = [0, 0, 0, 0], sizes = [4, 1, 8, 64], strides = [1, 1, 1, 1]} : vector<4x2x8x64xf32> to vector<4x1x8x64xf32>
    %40 = vector.shape_cast %39 : vector<4x1x8x64xf32> to vector<4x8x64xf32>
    %41 = vector.extract_strided_slice %38 {offsets = [0, 1, 0, 0], sizes = [4, 1, 8, 64], strides = [1, 1, 1, 1]} : vector<4x2x8x64xf32> to vector<4x1x8x64xf32>
    %42 = vector.shape_cast %41 : vector<4x1x8x64xf32> to vector<4x8x64xf32>
    %43 = arith.maximumf %40, %42 : vector<4x8x64xf32>
    %c0_37 = arith.constant 0 : index
    %c0_38 = arith.constant 0 : index
    %c0_39 = arith.constant 0 : index
    %44 = vector.load %arg5[%c0_37, %c0_38, %c0_39] : memref<4x8x64xf32, #tpu.memory_space<vmem>>, vector<4x8x64xf32>
    tpu.vector_store %arg5[%c0_37, %c0_38, %c0_39], %43 {strides = array<i32>} : memref<4x8x64xf32, #tpu.memory_space<vmem>>, vector<4x8x64xf32>,
    %c0_40 = arith.constant 0 : index
    %c0_41 = arith.constant 0 : index
    %c0_42 = arith.constant 0 : index
    %45 = tpu.strided_load %arg5[%c0_40, %c0_41, %c0_42] {strides = array<i32: 1, 2, 1>} : memref<4x8x64xf32, #tpu.memory_space<vmem>>, vector<4x4x64xf32>
    %c0_43 = arith.constant 0 : index
    %c1_44 = arith.constant 1 : index
    %c0_45 = arith.constant 0 : index
    %46 = tpu.strided_load %arg5[%c0_43, %c1_44, %c0_45] {strides = array<i32: 1, 2, 1>} : memref<4x8x64xf32, #tpu.memory_space<vmem>>, vector<4x4x64xf32>
    %47 = arith.maximumf %45, %46 : vector<4x4x64xf32>
    %48 = vector.broadcast %1 : vector<1x1x64xf32> to vector<4x4x64xf32>
    %49 = arith.addf %47, %48 : vector<4x4x64xf32>
    %c0_46 = arith.constant 0 : index
    %c0_47 = arith.constant 0 : index
    %c0_48 = arith.constant 0 : index
    %c0_49 = arith.constant 0 : index
    %50 = vector.load %arg4[%c0_46, %c0_47, %c0_48, %c0_49] : memref<1x4x4x64xf32, #tpu.memory_space<vmem>>, vector<1x4x4x64xf32>
    %51 = vector.shape_cast %50 : vector<1x4x4x64xf32> to vector<4x4x64xf32>
    %52 = vector.shape_cast %49 : vector<4x4x64xf32> to vector<1x4x4x64xf32>
    tpu.vector_store %arg4[%c0_46, %c0_47, %c0_48, %c0_49], %52 {strides = array<i32>} : memref<1x4x4x64xf32, #tpu.memory_space<vmem>>, vector<1x4x4x64xf32>,
    return
  }
  func.func @transform_0(%arg0: i32) -> (i32, i32, i32, i32) {
    %c0_i32 = arith.constant 0 : i32
    %c0_i32_0 = arith.constant 0 : i32
    %c0_i32_1 = arith.constant 0 : i32
    %c0_i32_2 = arith.constant 0 : i32
    return %arg0, %c0_i32, %c0_i32_0, %c0_i32_1 : i32, i32, i32, i32
  }
  func.func @transform_1(%arg0: i32) -> (i32, i32, i32) {
    %c0_i32 = arith.constant 0 : i32
    %c0_i32_0 = arith.constant 0 : i32
    %c0_i32_1 = arith.constant 0 : i32
    %c0_i32_2 = arith.constant 0 : i32
    return %c0_i32, %c0_i32_0, %c0_i32_1 : i32, i32, i32
  }
  func.func @transform_2(%arg0: i32) -> (i32, i32) {
    %c0_i32 = arith.constant 0 : i32
    %c0_i32_0 = arith.constant 0 : i32
    %c0_i32_1 = arith.constant 0 : i32
    return %c0_i32, %c0_i32_0 : i32, i32
  }
  func.func @transform_3(%arg0: i32) -> (i32, i32, i32, i32) {
    %c0_i32 = arith.constant 0 : i32
    %c0_i32_0 = arith.constant 0 : i32
    %c0_i32_1 = arith.constant 0 : i32
    %c0_i32_2 = arith.constant 0 : i32
    return %arg0, %c0_i32, %c0_i32_0, %c0_i32_1 : i32, i32, i32, i32
  }
}

module attributes {stable_mosaic.version = 11 : i64} {
  func.func @_mlp2_kernel(%arg0: i32, %arg1: memref<8x1024xf32, #tpu.memory_space<vmem>>, %arg2: memref<1024x64xbf16, #tpu.memory_space<vmem>>, %arg3: memref<1x64xf32, #tpu.memory_space<vmem>>, %arg4: memref<64x10xbf16, #tpu.memory_space<vmem>>, %arg5: memref<1x10xf32, #tpu.memory_space<vmem>>, %arg6: memref<8x10xf32, #tpu.memory_space<vmem>>) attributes {dimension_semantics = [#tpu.dimension_semantics<parallel>], iteration_bounds = array<i64: 1>, scalar_prefetch = 0 : i64, scratch_operands = 0 : i64, tpu.core_type = #tpu.core_type<tc>, window_params = [{transform_indices = @transform_0, window_bounds = array<i64: 8, 1024>}, {pipeline_mode = #tpu.pipeline_mode<synchronous>, transform_indices = @transform_1, window_bounds = array<i64: 1024, 64>}, {pipeline_mode = #tpu.pipeline_mode<synchronous>, transform_indices = @transform_2, window_bounds = array<i64: 1, 64>}, {pipeline_mode = #tpu.pipeline_mode<synchronous>, transform_indices = @transform_3, window_bounds = array<i64: 64, 10>}, {pipeline_mode = #tpu.pipeline_mode<synchronous>, transform_indices = @transform_4, window_bounds = array<i64: 1, 10>}, {transform_indices = @transform_5, window_bounds = array<i64: 8, 10>}]} {
    %c0 = arith.constant 0 : index
    %c0_0 = arith.constant 0 : index
    %0 = vector.load %arg1[%c0, %c0_0] : memref<8x1024xf32, #tpu.memory_space<vmem>>, vector<8x1024xf32>
    %1 = arith.truncf %0 : vector<8x1024xf32> to vector<8x1024xbf16>
    %c0_1 = arith.constant 0 : index
    %c0_2 = arith.constant 0 : index
    %2 = vector.load %arg2[%c0_1, %c0_2] : memref<1024x64xbf16, #tpu.memory_space<vmem>>, vector<1024x64xbf16>
    %cst = arith.constant dense<0.000000e+00> : vector<8x64xf32>
    %3 = tpu.matmul %1, %2, %cst {dimension_numbers = #tpu.dot_dimension_numbers<[1], [0], [0], [1], [0, 0, 1, 1], [], []>} : vector<8x1024xbf16>, vector<1024x64xbf16>, vector<8x64xf32> -> vector<8x64xf32>
    %c0_3 = arith.constant 0 : index
    %c0_4 = arith.constant 0 : index
    %4 = vector.load %arg3[%c0_3, %c0_4] : memref<1x64xf32, #tpu.memory_space<vmem>>, vector<1x64xf32>
    %5 = vector.broadcast %4 : vector<1x64xf32> to vector<8x64xf32>
    %6 = arith.addf %3, %5 : vector<8x64xf32>
    %7 = arith.truncf %6 : vector<8x64xf32> to vector<8x64xbf16>
    %c0_5 = arith.constant 0 : index
    %c0_6 = arith.constant 0 : index
    %8 = vector.load %arg4[%c0_5, %c0_6] : memref<64x10xbf16, #tpu.memory_space<vmem>>, vector<64x10xbf16>
    %cst_7 = arith.constant dense<0.000000e+00> : vector<8x10xf32>
    %9 = tpu.matmul %7, %8, %cst_7 {dimension_numbers = #tpu.dot_dimension_numbers<[1], [0], [0], [1], [0, 0, 1, 1], [], []>} : vector<8x64xbf16>, vector<64x10xbf16>, vector<8x10xf32> -> vector<8x10xf32>
    %c0_8 = arith.constant 0 : index
    %c0_9 = arith.constant 0 : index
    %10 = vector.load %arg5[%c0_8, %c0_9] : memref<1x10xf32, #tpu.memory_space<vmem>>, vector<1x10xf32>
    %11 = vector.broadcast %10 : vector<1x10xf32> to vector<8x10xf32>
    %12 = arith.addf %9, %11 : vector<8x10xf32>
    %c0_10 = arith.constant 0 : index
    %c0_11 = arith.constant 0 : index
    %13 = vector.load %arg6[%c0_10, %c0_11] : memref<8x10xf32, #tpu.memory_space<vmem>>, vector<8x10xf32>
    tpu.vector_store %arg6[%c0_10, %c0_11], %12 {strides = array<i32>} : memref<8x10xf32, #tpu.memory_space<vmem>>, vector<8x10xf32>,
    return
  }
  func.func @transform_0(%arg0: i32) -> (i32, i32) {
    %c0_i32 = arith.constant 0 : i32
    %c0_i32_0 = arith.constant 0 : i32
    return %arg0, %c0_i32 : i32, i32
  }
  func.func @transform_1(%arg0: i32) -> (i32, i32) {
    %c0_i32 = arith.constant 0 : i32
    %c0_i32_0 = arith.constant 0 : i32
    %c0_i32_1 = arith.constant 0 : i32
    return %c0_i32, %c0_i32_0 : i32, i32
  }
  func.func @transform_2(%arg0: i32) -> (i32, i32) {
    %c0_i32 = arith.constant 0 : i32
    %c0_i32_0 = arith.constant 0 : i32
    %c0_i32_1 = arith.constant 0 : i32
    return %c0_i32, %c0_i32_0 : i32, i32
  }
  func.func @transform_3(%arg0: i32) -> (i32, i32) {
    %c0_i32 = arith.constant 0 : i32
    %c0_i32_0 = arith.constant 0 : i32
    %c0_i32_1 = arith.constant 0 : i32
    return %c0_i32, %c0_i32_0 : i32, i32
  }
  func.func @transform_4(%arg0: i32) -> (i32, i32) {
    %c0_i32 = arith.constant 0 : i32
    %c0_i32_0 = arith.constant 0 : i32
    %c0_i32_1 = arith.constant 0 : i32
    return %c0_i32, %c0_i32_0 : i32, i32
  }
  func.func @transform_5(%arg0: i32) -> (i32, i32) {
    %c0_i32 = arith.constant 0 : i32
    %c0_i32_0 = arith.constant 0 : i32
    return %arg0, %c0_i32 : i32, i32
  }
}

</mosaic_0001>

<bundles_post_ra>
// kernel: model_forward.4
= control target key start
LH: loop header
LB: loop body
LE: loop exit
PB: predicated region body
PF: predicated region fallthrough
CT: control target
= control target key end

     0   :  { %s2994_s12 = smov 0   ;;  %s3257_s0 = inlined_call_operand.vmem [shape: bf16[2,36,32,15], index: 0, kind: input, shape index: {}]   ;;  %s3258_s1 = inlined_call_operand.vmem [shape: bf16[5,15,32], index: 1, kind: input, shape index: {}]   ;;  %s3259_s2 = inlined_call_operand.vmem [shape: f32[1,32], index: 2, kind: input, shape index: {}]   ;;  %s3260_s3 = inlined_call_operand.vmem [shape: f32[2,16,16,32], index: 3, kind: output, shape index: {}]  }
   0x1 LB: > { %s2136_s13 = sadd.s32 4294967295, %s2967_s12   ;;  %p2140_p0 = scmp.ge.s32.totalorder %s2967_s12, 1  ;;  %s2967_s12 = sphi %s2994_s12, %s13_s12  }
   0x2   : > { %p137_p1 = scmp.lt.s32.totalorder %s2967_s12, 3 }
   0x4   : > { %p138_p2 = pnand %p2140_p0, %p137_p1 }
   0x5   : > { %p161_p3 = scmp.lt.s32.totalorder (!%p138_p2), %s2136_s13, 1  ;;  %v3005_v0 = vld [vmem:[%s3259_s2] ss:$0 sm:$0xff] (!%p138_p2)  ;;  %s3017_s24 = smov (!%p138_p2), 0  }
   0x6   : > { %141 = sbr.rel (%p138_p2) target bundleno = 410 (0x19a), region = 32 }
   0xd   : > { %s3262_s13 = smov (!%p161_p3, %s2136_s13), 1 }
   0xe   : > { %s2854_s16 = smul.u32 576, %s3262_s13  ;;  %s2461_s17 = sshll.u32 %s3262_s13, 8 }
   0xf   : > { %s3010_s20 = scalar_lea.vmem %s3260_s3, %s2461_s17 }
  0x10   : > { %s3015_s23 = scalar_lea.vmem %s3257_s0, %s2854_s16 }
  0x11 LB: >> { %v2872_v1 = vld [vmem:[%s3258_s1 + $0x8] sm:$0xff]   ;;  %vm391_vm0 = vcmask 1046528   ;;  %vm392_vm1 = vcmask 1047552   ;;  %v2973_v2 = vmov 65535   ;;  %v2873_v4 = vld [vmem:[%s3258_s1 + $0x10] sm:$0xff]   ;;  %s2463_s29 = sshll.u32 %s2971_s24, 7  ;;  %s2971_s24 = sphi %s3017_s24, %s178_s24  }
  0x12   : >> { %v393_v3 = vsel %vm391_vm0, 4294967295, %v2973_v2  ;;  %s3030_s30 = scalar_lea.vmem %s3015_s23, %s2463_s29  ;;  %v2877_v6 = vld [vmem:[%s3258_s1] sm:$0xff]   ;;  %vm342_vm2 = vcmask 121856   ;;  %v2879_v14 = vld [vmem:[%s3258_s1 + $0x18] sm:$0xff]   ;;  %vm1976_vm3 = vcmask 261120   ;;  %s2468_s10 = sshll.u32 %s2971_s24, 6 }
  0x13   : >> { %v394_v5 = vsel %vm392_vm1, %v393_v3, 0  ;;  %v2874_v9 = vld [vmem:[%s3030_s30 + $0x10] sm:$0xff]   ;;  %v2875_v10 = vld [vmem:[%s3030_s30 + $0x20] sm:$0xff]   ;;  %v2876_v12 = vld [vmem:[%s3030_s30 + $0x18] sm:$0xff]   ;;  %s3213_s11 = scalar_lea.vmem %s3010_s20, %s2468_s10  ;;  %s178_s24 = sadd.s32 1, %s2971_s24  }
  0x14   : >> { %v396_v7 = vand.u32 %v2872_v1, %v394_v5  ;;  %v3035_v8 = vand.u32 %v2873_v4, %v394_v5  ;;  %v693_v11 = vand.u32 %v2877_v6, %v394_v5  ;;  %v2878_v13 = vld [vmem:[%s3030_s30 + $0x28] sm:$0xff]   ;;  %2556 = vmatprep.mubr.msk.bf16.mxu1 %vm342_vm2, %v2874_v9  ;;  %2624 = vmatprep.mubr.msk.bf16.mxu0 %vm342_vm2, %v2875_v10  ;;  %v2880_v15 = vld [vmem:[%s3030_s30 + $0x20] sm:$0xff]   ;;  %v2881_v17 = vld [vmem:[%s3030_s30 + $0x30] sm:$0xff]   ;;  %p175_p4 = scmp.ge.s32.totalorder %s178_s24, 4  }
  0x15   : >> { %v1397_v16 = vand.u32 %v2879_v14, %v394_v5  ;;  %v2882_v18 = vld [vmem:[%s3030_s30 + $0x28] sm:$0xff]   ;;  %v2883_v19 = vld [vmem:[%s3030_s30 + $0x38] sm:$0xff]   ;;  %v2884_v20 = vld [vmem:[%s3030_s30 + $0x30] sm:$0xff]  }
  0x16   : >> { %2554 = vmatprep.subr.bf16.mxu1 %v396_v7  ;;  %2622 = vmatprep.subr.bf16.mxu0 %v3035_v8  ;;  %v2885_v21 = vld [vmem:[%s3030_s30 + $0x40] sm:$0xff]   ;;  %v2886_v22 = vld [vmem:[%s3030_s30 + $0x38] sm:$0xff]   ;;  %v2887_v23 = vld [vmem:[%s3030_s30 + $0x48] sm:$0xff]  }
  0x17   : >> { %2555 = vmatpush3.bf16.msra.mxu1 %v396_v7  ;;  %2623 = vmatpush3.bf16.msra.mxu0 %v3035_v8  ;;  %v2888_v24 = vld [vmem:[%s3030_s30 + $0x40] sm:$0xff]   ;;  %v2889_v25 = vld [vmem:[%s3030_s30 + $0x50] sm:$0xff]   ;;  %v2890_v28 = vld [vmem:[%s3030_s30 + $0x48] sm:$0xff]  }
  0x18   : >> { %2588 = vmatprep.subr.bf16.mxu1 %v693_v11  ;;  %2656 = vmatprep.subr.bf16.mxu0 %v1397_v16  ;;  %v2896_v26 = vld [vmem:[%s3258_s1 + $0x20] sm:$0xff]   ;;  %v2891_v29 = vld [vmem:[%s3030_s30 + $0x58] sm:$0xff]   ;;  %v2892_v30 = vld [vmem:[%s3030_s30 + $0x50] sm:$0xff]  }
  0x19   : >> { %v1765_v27 = vand.u32 %v2896_v26, %v394_v5  ;;  %v2893_v31 = vld [vmem:[%s3030_s30 + $0x30] sm:$0xff]   ;;  %v2894_v32 = vld [vmem:[%s3030_s30 + $0x58] sm:$0xff]   ;;  %v2897_v34 = vld [vmem:[%s3030_s30 + $0x60] sm:$0xff]  }
  0x1a   : >> { %2557 = vmatmul.mubr.msk.bf16.vlgmr.msra.gmra.mrb[0].mxu1 %vm342_vm2, %v2876_v12  ;;  %2625 = vmatmul.mubr.msk.bf16.vlgmr.msra.gmra.mrb[0].mxu0 %vm342_vm2, %v2878_v13  ;;  %v2895_v33 = vld [vmem:[%s3030_s30 + $0x38] sm:$0xff]   ;;  %v2898_v35 = vld [vmem:[%s3030_s30 + $0x40] sm:$0xff]   ;;  %v2899_v36 = vld [vmem:[%s3030_s30 + $0x68] sm:$0xff]  }
  0x1b   : >> { %2589 = vmatpush3.bf16.msra.mxu1 %v693_v11  ;;  %2560 = vmatprep.mubr.msk.bf16.mxu1 %vm342_vm2, %v2880_v15  ;;  %v2900_v37 = vld [vmem:[%s3030_s30 + $0x48] sm:$0xff]   ;;  %v2901_v38 = vld [vmem:[%s3030_s30 + $0x70] sm:$0xff]   ;;  %v2903_v40 = vld [vmem:[%s3030_s30 + $0x78] sm:$0xff]  }
  0x1c   : >> { %2628 = vmatprep.mubr.msk.bf16.mxu0 %vm342_vm2, %v2881_v17  ;;  %2657 = vmatpush3.bf16.msra.mxu0 %v1397_v16  ;;  %v2902_v39 = vld [vmem:[%s3030_s30 + $0x50] sm:$0xff]   ;;  %v2904_v41 = vld [vmem:[%s3030_s30 + $0x58] sm:$0xff]   ;;  %v2905_v42 = vld [vmem:[%s3030_s30 + $0x80] sm:$0xff]  }
  0x1d   : >> { %2724 = vmatprep.subr.bf16.mxu1 %v3035_v8  ;;  %2690 = vmatprep.subr.bf16.mxu0 %v1765_v27  ;;  %v2906_v43 = vld [vmem:[%s3030_s30 + $0x60] sm:$0xff]   ;;  %v2907_v44 = vld [vmem:[%s3030_s30 + $0x88] sm:$0xff]   ;;  %v2910_v47 = vld [vmem:[%s3030_s30 + $0x70] sm:$0xff]  }
  0x1e   : >> { %v2908_v45 = vld [vmem:[%s3030_s30 + $0x68] sm:$0xff]   ;;  %v2909_v46 = vld [vmem:[%s3030_s30] sm:$0xff]   ;;  %v2912_v49 = vld [vmem:[%s3030_s30 + $0x78] sm:$0xff]  }
  0x1f   : >> { %v2911_v48 = vld [vmem:[%s3030_s30 + $0x8] sm:$0xff]   ;;  %v2913_v50 = vld [vmem:[%s3030_s30 + $0x10] sm:$0xff]   ;;  %v2914_v51 = vld [vmem:[%s3030_s30 + $0x80] sm:$0xff]  }
  0x20   : >> { %v2915_v52 = vld [vmem:[%s3030_s30 + $0x18] sm:$0xff]   ;;  %v2916_v53 = vld [vmem:[%s3030_s30 + $0x88] sm:$0xff]   ;;  %v2917_v54 = vld [vmem:[%s3030_s30 + $0x20] sm:$0xff]  }
  0x21   : >> { %v2918_v55 = vld [vmem:[%s3030_s30 + $0x90] sm:$0xff]   ;;  %v2919_v56 = vld [vmem:[%s3030_s30 + $0x28] sm:$0xff]   ;;  %v2920_v57 = vld [vmem:[%s3030_s30 + $0x98] sm:$0xff]  }
  0x22   : >> { %2561 = vmatmul.mubr.msk.bf16.gmra.mrb[4].mxu1 %vm342_vm2, %v2882_v18  ;;  %2629 = vmatmul.mubr.msk.bf16.gmra.mrb[4].mxu0 %vm342_vm2, %v2883_v19  ;;  %v2921_v58 = vld [vmem:[%s3030_s30 + $0x30] sm:$0xff]   ;;  %v2922_v59 = vld [vmem:[%s3030_s30 + $0xa0] sm:$0xff]   ;;  %v2923_v60 = vld [vmem:[%s3030_s30 + $0x38] sm:$0xff]  }
  0x23   : >> { %2564 = vmatprep.mubr.msk.bf16.mxu1 %vm342_vm2, %v2884_v20  ;;  %2632 = vmatprep.mubr.msk.bf16.mxu0 %vm342_vm2, %v2885_v21  ;;  %v2924_v61 = vld [vmem:[%s3030_s30 + $0xa8] sm:$0xff]   ;;  %v2925_v62 = vld [vmem:[%s3030_s30 + $0x40] sm:$0xff]   ;;  %v2929_v3 = vld [vmem:[%s3030_s30 + $0x50] sm:$0xff]  }
  0x24   : >> { %v2926_v63 = vld [vmem:[%s3030_s30 + $0x40] sm:$0xff]   ;;  %v2927_v1 = vld [vmem:[%s3030_s30 + $0x48] sm:$0xff]   ;;  %v2930_v4 = vld [vmem:[%s3030_s30 + $0x50] sm:$0xff]  }
  0x25   : >> { %v2928_v2 = vld [vmem:[%s3030_s30 + $0x48] sm:$0xff]   ;;  %v2931_v5 = vld [vmem:[%s3030_s30 + $0x58] sm:$0xff]   ;;  %v2933_v7 = vld [vmem:[%s3030_s30 + $0x60] sm:$0xff]  }
  0x26   : >> { %v2932_v6 = vld [vmem:[%s3030_s30 + $0x58] sm:$0xff]   ;;  %v2935_v9 = vld [vmem:[%s3030_s30 + $0x68] sm:$0xff]   ;;  %v2937_v11 = vld [vmem:[%s3030_s30 + $0x70] sm:$0xff]  }
  0x27   : >> { %v2936_v10 = vld [vmem:[%s3030_s30 + $0x68] sm:$0xff]   ;;  %v2938_v12 = vld [vmem:[%s3030_s30 + $0x70] sm:$0xff]   ;;  %v2939_v13 = vld [vmem:[%s3030_s30 + $0x78] sm:$0xff]  }
  0x28   : >> { %v2940_v14 = vld [vmem:[%s3030_s30 + $0x78] sm:$0xff]   ;;  %v2941_v15 = vld [vmem:[%s3030_s30 + $0x60] sm:$0xff]   ;;  %v2943_v17 = vld [vmem:[%s3030_s30 + $0x68] sm:$0xff]  }
  0x29   : >> { %v2942_v16 = vld [vmem:[%s3030_s30 + $0x80] sm:$0xff]   ;;  %v2944_v18 = vld [vmem:[%s3030_s30 + $0x88] sm:$0xff]   ;;  %v2945_v19 = vld [vmem:[%s3030_s30 + $0x70] sm:$0xff]  }
  0x2a   : >> { %2565 = vmatmul.mubr.msk.bf16.gmra.mrb[8].mxu1 %vm342_vm2, %v2886_v22  ;;  %2633 = vmatmul.mubr.msk.bf16.gmra.mrb[8].mxu0 %vm342_vm2, %v2887_v23  ;;  %v2946_v20 = vld [vmem:[%s3030_s30 + $0x90] sm:$0xff]   ;;  %v2947_v21 = vld [vmem:[%s3030_s30 + $0x78] sm:$0xff]   ;;  %v2949_v23 = vld [vmem:[%s3030_s30 + $0x80] sm:$0xff]  }
  0x2b   : >> { %2568 = vmatprep.mubr.msk.bf16.mxu1 %vm342_vm2, %v2888_v24  ;;  %2636 = vmatprep.mubr.msk.bf16.mxu0 %vm342_vm2, %v2889_v25  ;;  %v2948_v22 = vld [vmem:[%s3030_s30 + $0x98] sm:$0xff]   ;;  %v2950_v24 = vld [vmem:[%s3030_s30 + $0xa0] sm:$0xff]   ;;  %v2951_v25 = vld [vmem:[%s3030_s30 + $0x88] sm:$0xff]  }
  0x2c   : >> { %v2952_v26 = vld [vmem:[%s3030_s30 + $0xa8] sm:$0xff]  }
  0x32   : >> { %2569 = vmatmul.mubr.msk.bf16.gmra.mrb[12].mxu1 %vm342_vm2, %v2890_v28  ;;  %2637 = vmatmul.mubr.msk.bf16.gmra.mrb[12].mxu0 %vm342_vm2, %v2891_v29  ;;  %v2954_v28 = vld [vmem:[%s3030_s30 + $0xb0] sm:$0xff]   ;;  %v2955_v29 = vld [vmem:[%s3030_s30 + $0x98] sm:$0xff]  }
  0x33   : >> { %2572 = vmatprep.mubr.msk.bf16.mxu1 %vm342_vm2, %v2892_v30  ;;  %2658 = vmatprep.mubr.msk.bf16.mxu0 %vm342_vm2, %v2893_v31  ;;  %v2956_v30 = vld [vmem:[%s3030_s30 + $0xb8] sm:$0xff]  }
  0x3a   : >> { %2573 = vmatmul.mubr.msk.bf16.gmra.mrb[16].mxu1 %vm342_vm2, %v2894_v32  ;;  %2659 = vmatmul.mubr.msk.bf16.vlgmr.msra.gmra.mrb[0].mxu0 %vm342_vm2, %v2895_v33 }
  0x3b   : >> { %2691 = vmatpush3.bf16.msra.mxu0 %v1765_v27  ;;  %2576 = vmatprep.mubr.msk.bf16.mxu1 %vm342_vm2, %v2897_v34  ;;  %v2953_v27 = vld [vmem:[%s3030_s30 + $0x90] sm:$0xff]  }
  0x3c   : >> { %2662 = vmatprep.mubr.msk.bf16.mxu0 %vm342_vm2, %v2898_v35 }
  0x42   : >> { %2577 = vmatmul.mubr.msk.bf16.gmra.mrb[20].mxu1 %vm342_vm2, %v2899_v36  ;;  %2663 = vmatmul.mubr.msk.bf16.gmra.mrb[4].mxu0 %vm342_vm2, %v2900_v37 }
  0x43   : >> { %2580 = vmatprep.mubr.msk.bf16.mxu1 %vm342_vm2, %v2901_v38  ;;  %2666 = vmatprep.mubr.msk.bf16.mxu0 %vm342_vm2, %v2902_v39 }
  0x4a   : >> { %2581 = vmatmul.mubr.msk.bf16.gmra.mrb[24].mxu1 %vm342_vm2, %v2903_v40  ;;  %2667 = vmatmul.mubr.msk.bf16.gmra.mrb[8].mxu0 %vm342_vm2, %v2904_v41 }
  0x4b   : >> { %2584 = vmatprep.mubr.msk.bf16.mxu1 %vm342_vm2, %v2905_v42  ;;  %2670 = vmatprep.mubr.msk.bf16.mxu0 %vm342_vm2, %v2906_v43 }
  0x52   : >> { %2585 = vmatmul.mubr.msk.bf16.gmra.mrb[28].mxu1 %vm342_vm2, %v2907_v44  ;;  %2671 = vmatmul.mubr.msk.bf16.gmra.mrb[12].mxu0 %vm342_vm2, %v2908_v45 }
  0x53   : >> { %2590 = vmatprep.mubr.msk.bf16.mxu1 %vm342_vm2, %v2909_v46  ;;  %2674 = vmatprep.mubr.msk.bf16.mxu0 %vm342_vm2, %v2910_v47 }
  0x5a   : >> { %2591 = vmatmul.mubr.msk.bf16.vlgmr.msra.gmra.mrb[0].mxu1 %vm342_vm2, %v2911_v48  ;;  %2675 = vmatmul.mubr.msk.bf16.gmra.mrb[16].mxu0 %vm342_vm2, %v2912_v49 }
  0x5b   : >> { %2725 = vmatpush3.bf16.msra.mxu1 %v3035_v8  ;;  %2594 = vmatprep.mubr.msk.bf16.mxu1 %vm342_vm2, %v2913_v50  ;;  %v2934_v8 = vld [vmem:[%s3030_s30 + $0x60] sm:$0xff]  }
  0x5c   : >> { %2678 = vmatprep.mubr.msk.bf16.mxu0 %vm342_vm2, %v2914_v51 }
  0x62   : >> { %2595 = vmatmul.mubr.msk.bf16.gmra.mrb[4].mxu1 %vm342_vm2, %v2915_v52  ;;  %2679 = vmatmul.mubr.msk.bf16.gmra.mrb[20].mxu0 %vm342_vm2, %v2916_v53 }
  0x63   : >> { %2598 = vmatprep.mubr.msk.bf16.mxu1 %vm342_vm2, %v2917_v54  ;;  %2682 = vmatprep.mubr.msk.bf16.mxu0 %vm342_vm2, %v2918_v55 }
  0x6a   : >> { %2599 = vmatmul.mubr.msk.bf16.gmra.mrb[8].mxu1 %vm342_vm2, %v2919_v56  ;;  %2683 = vmatmul.mubr.msk.bf16.gmra.mrb[24].mxu0 %vm342_vm2, %v2920_v57 }
  0x6b   : >> { %2602 = vmatprep.mubr.msk.bf16.mxu1 %vm342_vm2, %v2921_v58  ;;  %2686 = vmatprep.mubr.msk.bf16.mxu0 %vm342_vm2, %v2922_v59 }
  0x72   : >> { %2603 = vmatmul.mubr.msk.bf16.gmra.mrb[12].mxu1 %vm342_vm2, %v2923_v60  ;;  %2687 = vmatmul.mubr.msk.bf16.gmra.mrb[28].mxu0 %vm342_vm2, %v2924_v61 }
  0x73   : >> { %2606 = vmatprep.mubr.msk.bf16.mxu1 %vm342_vm2, %v2925_v62  ;;  %2692 = vmatprep.mubr.msk.bf16.mxu0 %vm342_vm2, %v2926_v63 }
  0x7a   : >> { %2607 = vmatmul.mubr.msk.bf16.gmra.mrb[16].mxu1 %vm342_vm2, %v2927_v1  ;;  %2693 = vmatmul.mubr.msk.bf16.vlgmr.msra.gmra.mrb[0].mxu0 %vm342_vm2, %v2928_v2 }
  0x7b   : >> { %2610 = vmatprep.mubr.msk.bf16.mxu1 %vm342_vm2, %v2929_v3  ;;  %2696 = vmatprep.mubr.msk.bf16.mxu0 %vm342_vm2, %v2930_v4 }
  0x82   : >> { %2611 = vmatmul.mubr.msk.bf16.gmra.mrb[20].mxu1 %vm342_vm2, %v2931_v5  ;;  %2697 = vmatmul.mubr.msk.bf16.gmra.mrb[4].mxu0 %vm342_vm2, %v2932_v6 }
  0x83   : >> { %2614 = vmatprep.mubr.msk.bf16.mxu1 %vm342_vm2, %v2933_v7  ;;  %2700 = vmatprep.mubr.msk.bf16.mxu0 %vm342_vm2, %v2934_v8 }
  0x8a   : >> { %2615 = vmatmul.mubr.msk.bf16.gmra.mrb[24].mxu1 %vm342_vm2, %v2935_v9  ;;  %2701 = vmatmul.mubr.msk.bf16.gmra.mrb[8].mxu0 %vm342_vm2, %v2936_v10 }
  0x8b   : >> { %2618 = vmatprep.mubr.msk.bf16.mxu1 %vm342_vm2, %v2937_v11  ;;  %2704 = vmatprep.mubr.msk.bf16.mxu0 %vm342_vm2, %v2938_v12 }
  0x92   : >> { %2619 = vmatmul.mubr.msk.bf16.gmra.mrb[28].mxu1 %vm342_vm2, %v2939_v13  ;;  %2705 = vmatmul.mubr.msk.bf16.gmra.mrb[12].mxu0 %vm342_vm2, %v2940_v14 }
  0x93   : >> { %2640 = vmatprep.mubr.msk.bf16.mxu1 %vm342_vm2, %v2941_v15  ;;  %2708 = vmatprep.mubr.msk.bf16.mxu0 %vm342_vm2, %v2942_v16 }
  0x9a   : >> { %2641 = vmatmul.mubr.msk.bf16.vlgmr.msra.gmra.mrb[16].mxu1 %vm342_vm2, %v2943_v17  ;;  %2709 = vmatmul.mubr.msk.bf16.gmra.mrb[16].mxu0 %vm342_vm2, %v2944_v18 }
  0x9b   : >> { %2644 = vmatprep.mubr.msk.bf16.mxu1 %vm342_vm2, %v2945_v19  ;;  %2712 = vmatprep.mubr.msk.bf16.mxu0 %vm342_vm2, %v2946_v20 }
  0xa2   : >> { %2645 = vmatmul.mubr.msk.bf16.gmra.mrb[20].mxu1 %vm342_vm2, %v2947_v21  ;;  %2713 = vmatmul.mubr.msk.bf16.gmra.mrb[20].mxu0 %vm342_vm2, %v2948_v22 }
  0xa3   : >> { %2648 = vmatprep.mubr.msk.bf16.mxu1 %vm342_vm2, %v2949_v23  ;;  %2716 = vmatprep.mubr.msk.bf16.mxu0 %vm342_vm2, %v2950_v24 }
  0xaa   : >> { %2649 = vmatmul.mubr.msk.bf16.gmra.mrb[24].mxu1 %vm342_vm2, %v2951_v25  ;;  %2717 = vmatmul.mubr.msk.bf16.gmra.mrb[24].mxu0 %vm342_vm2, %v2952_v26 }
  0xab   : >> { %2652 = vmatprep.mubr.msk.bf16.mxu1 %vm342_vm2, %v2953_v27  ;;  %2720 = vmatprep.mubr.msk.bf16.mxu0 %vm342_vm2, %v2954_v28 }
  0xb2   : >> { %2653 = vmatmul.mubr.msk.bf16.gmra.mrb[28].mxu1 %vm342_vm2, %v2955_v29  ;;  %2721 = vmatmul.mubr.msk.bf16.gmra.mrb[28].mxu0 %vm342_vm2, %v2956_v30 }
 0x12d   : >> { %v2592_v31 = vpop.f32.mrb[0].mxu1 }
 0x12e   : >> { %v729_v32 = vpop.f32.mrb[1].mxu1 }
 0x12f   : >> { %v2593_v33 = vpop.f32.mrb[2].mxu1 }
 0x130   : >> { %v732_v34 = vpop.f32.mrb[3].mxu1 }
 0x135   : >> { %v2596_v35 = vpop.f32.mrb[4].mxu1 }
 0x136   : >> { %v745_v36 = vpop.f32.mrb[5].mxu1 }
 0x137   : >> { %v2597_v37 = vpop.f32.mrb[6].mxu1 }
 0x138   : >> { %v748_v38 = vpop.f32.mrb[7].mxu1 }
 0x13d   : >> { %v2600_v39 = vpop.f32.mrb[8].mxu1 }
 0x13e   : >> { %v761_v40 = vpop.f32.mrb[9].mxu1 }
 0x13f   : >> { %v2601_v41 = vpop.f32.mrb[10].mxu1 }
 0x140   : >> { %v764_v42 = vpop.f32.mrb[11].mxu1 }
 0x145   : >> { %v2604_v43 = vpop.f32.mrb[12].mxu1 }
 0x146   : >> { %v777_v44 = vpop.f32.mrb[13].mxu1 }
 0x147   : >> { %v2605_v45 = vpop.f32.mrb[14].mxu1 }
 0x148   : >> { %v780_v46 = vpop.f32.mrb[15].mxu1 }
 0x14d   : >> { %v2694_v47 = vpop.f32.mrb[0].mxu0 }
 0x14e   : >> { %v2726_v48 = vadd.f32 %v2694_v47, %v2592_v31  ;;  %v1801_v49 = vpop.f32.mrb[1].mxu0 }
 0x14f   : >> { %v2727_v50 = vadd.f32 %v1801_v49, %v729_v32  ;;  %v2695_v51 = vpop.f32.mrb[2].mxu0 }
 0x150   : >> { %v2728_v52 = vadd.f32 %v2695_v51, %v2593_v33  ;;  %v1804_v53 = vpop.f32.mrb[3].mxu0 }
 0x151   : >> { %v2729_v54 = vadd.f32 %v1804_v53, %v732_v34 }
 0x155   : >> { %v2698_v55 = vpop.f32.mrb[4].mxu0 }
 0x156   : >> { %v2730_v56 = vadd.f32 %v2698_v55, %v2596_v35  ;;  %v1817_v57 = vpop.f32.mrb[5].mxu0 }
 0x157   : >> { %v2731_v58 = vadd.f32 %v1817_v57, %v745_v36  ;;  %v2699_v59 = vpop.f32.mrb[6].mxu0 }
 0x158   : >> { %v1962_v60 = vmax.f32 %v2726_v48, %v2730_v56  ;;  %v2732_v61 = vadd.f32 %v2699_v59, %v2597_v37  ;;  %v1820_v62 = vpop.f32.mrb[7].mxu0 }
 0x159   : >> { %v1960_v63 = vmax.f32 %v2727_v50, %v2731_v58  ;;  %v2733_v1 = vadd.f32 %v1820_v62, %v748_v38 }
 0x15a   : >> { %1979 = vst.msk [vmem:[#allocation2 + $0x10] sm:$0xff] %vm1976_vm3, %v1962_v60  ;;  %v1963_v2 = vmax.f32 %v2728_v52, %v2732_v61 }
 0x15b   : >> { %1977 = vst.msk [vmem:[#allocation2] sm:$0xff] %vm1976_vm3, %v1960_v63  ;;  %v1961_v3 = vmax.f32 %v2729_v54, %v2733_v1 }
 0x15c   : >> { %1980 = vst.msk [vmem:[#allocation2 + $0x18] sm:$0xff] %vm1976_vm3, %v1963_v2 }
 0x15d   : >> { %1978 = vst.msk [vmem:[#allocation2 + $0x8] sm:$0xff] %vm1976_vm3, %v1961_v3  ;;  %v2702_v4 = vpop.f32.mrb[8].mxu0 }
 0x15e   : >> { %v2734_v5 = vadd.f32 %v2702_v4, %v2600_v39  ;;  %v1833_v6 = vpop.f32.mrb[9].mxu0 }
 0x15f   : >> { %v2735_v7 = vadd.f32 %v1833_v6, %v761_v40  ;;  %v2703_v8 = vpop.f32.mrb[10].mxu0 }
 0x160   : >> { %v2736_v9 = vadd.f32 %v2703_v8, %v2601_v41  ;;  %v1836_v10 = vpop.f32.mrb[11].mxu0 }
 0x161   : >> { %v2737_v11 = vadd.f32 %v1836_v10, %v764_v42 }
 0x163   : >> { %v1995_v12 = vld [vmem:[#allocation2 + $0x10] ss:$2 sm:$0xff]  ;;  %v2011_v13 = vld [vmem:[#allocation2 + $0x11] ss:$2 sm:$0xff] }
 0x164   : >> { %v2025_v14 = vmax.f32 %v1995_v12, %v2011_v13  ;;  %v1993_v15 = vld [vmem:[#allocation2] ss:$2 sm:$0xff]  ;;  %v2009_v16 = vld [vmem:[#allocation2 + $0x1] ss:$2 sm:$0xff] }
 0x165   : >> { %v2024_v17 = vmax.f32 %v1993_v15, %v2009_v16  ;;  %v2706_v18 = vpop.f32.mrb[12].mxu0 }
 0x166   : >> { %v2039_v19 = vadd.f32 %v3005_v0, %v2025_v14  ;;  %v2738_v20 = vadd.f32 %v2706_v18, %v2604_v43  ;;  %v1849_v21 = vpop.f32.mrb[13].mxu0 }
 0x167   : >> { %v2038_v22 = vadd.f32 %v3005_v0, %v2024_v17  ;;  %v2739_v23 = vadd.f32 %v1849_v21, %v777_v44  ;;  %v2707_v24 = vpop.f32.mrb[14].mxu0 }
 0x168   : >> { %2049 = vst.msk [vmem:[%s3213_s11 + $0x8] sm:$0xff] %vm1976_vm3, %v2039_v19  ;;  %v1966_v25 = vmax.f32 %v2734_v5, %v2738_v20  ;;  %v2740_v26 = vadd.f32 %v2707_v24, %v2605_v45  ;;  %v1852_v27 = vpop.f32.mrb[15].mxu0 }
 0x169   : >> { %2048 = vst.msk [vmem:[%s3213_s11] sm:$0xff] %vm1976_vm3, %v2038_v22  ;;  %v1964_v28 = vmax.f32 %v2735_v7, %v2739_v23  ;;  %v2741_v29 = vadd.f32 %v1852_v27, %v780_v46 }
 0x16a   : >> { %1983 = vst.msk [vmem:[#allocation2 + $0x30] sm:$0xff] %vm1976_vm3, %v1966_v25  ;;  %v1967_v30 = vmax.f32 %v2736_v9, %v2740_v26 }
 0x16b   : >> { %1981 = vst.msk [vmem:[#allocation2 + $0x20] sm:$0xff] %vm1976_vm3, %v1964_v28  ;;  %v1965_v31 = vmax.f32 %v2737_v11, %v2741_v29 }
 0x16c   : >> { %1984 = vst.msk [vmem:[#allocation2 + $0x38] sm:$0xff] %vm1976_vm3, %v1967_v30 }
 0x16d   : >> { %1982 = vst.msk [vmem:[#allocation2 + $0x28] sm:$0xff] %vm1976_vm3, %v1965_v31  ;;  %v2642_v32 = vpop.f32.mrb[16].mxu1  ;;  %v2710_v33 = vpop.f32.mrb[16].mxu0 }
 0x16e   : >> { %v2742_v34 = vadd.f32 %v2710_v33, %v2642_v32  ;;  %v1129_v35 = vpop.f32.mrb[17].mxu1  ;;  %v1865_v36 = vpop.f32.mrb[17].mxu0 }
 0x16f   : >> { %v2743_v37 = vadd.f32 %v1865_v36, %v1129_v35  ;;  %v2643_v38 = vpop.f32.mrb[18].mxu1  ;;  %v2711_v39 = vpop.f32.mrb[18].mxu0 }
 0x170   : >> { %v2744_v40 = vadd.f32 %v2711_v39, %v2643_v38  ;;  %v1132_v41 = vpop.f32.mrb[19].mxu1  ;;  %v1868_v42 = vpop.f32.mrb[19].mxu0 }
 0x171   : >> { %v2745_v43 = vadd.f32 %v1868_v42, %v1132_v41 }
 0x173   : >> { %v1999_v44 = vld [vmem:[#allocation2 + $0x30] ss:$2 sm:$0xff]  ;;  %v2015_v45 = vld [vmem:[#allocation2 + $0x31] ss:$2 sm:$0xff] }
 0x174   : >> { %v2027_v46 = vmax.f32 %v1999_v44, %v2015_v45  ;;  %v1997_v47 = vld [vmem:[#allocation2 + $0x20] ss:$2 sm:$0xff]  ;;  %v2013_v48 = vld [vmem:[#allocation2 + $0x21] ss:$2 sm:$0xff] }
 0x175   : >> { %v2026_v49 = vmax.f32 %v1997_v47, %v2013_v48  ;;  %v2646_v50 = vpop.f32.mrb[20].mxu1  ;;  %v2714_v51 = vpop.f32.mrb[20].mxu0 }
 0x176   : >> { %v2041_v52 = vadd.f32 %v3005_v0, %v2027_v46  ;;  %v2746_v53 = vadd.f32 %v2714_v51, %v2646_v50  ;;  %v1145_v54 = vpop.f32.mrb[21].mxu1  ;;  %v1881_v55 = vpop.f32.mrb[21].mxu0 }
 0x177   : >> { %v2040_v56 = vadd.f32 %v3005_v0, %v2026_v49  ;;  %v2747_v57 = vadd.f32 %v1881_v55, %v1145_v54  ;;  %v2647_v58 = vpop.f32.mrb[22].mxu1  ;;  %v2715_v59 = vpop.f32.mrb[22].mxu0 }
 0x178   : >> { %2051 = vst.msk [vmem:[%s3213_s11 + $0x18] sm:$0xff] %vm1976_vm3, %v2041_v52  ;;  %v1970_v60 = vmax.f32 %v2742_v34, %v2746_v53  ;;  %v2748_v61 = vadd.f32 %v2715_v59, %v2647_v58  ;;  %v1148_v62 = vpop.f32.mrb[23].mxu1  ;;  %v1884_v63 = vpop.f32.mrb[23].mxu0 }
 0x179   : >> { %2050 = vst.msk [vmem:[%s3213_s11 + $0x10] sm:$0xff] %vm1976_vm3, %v2040_v56  ;;  %v1968_v1 = vmax.f32 %v2743_v37, %v2747_v57  ;;  %v2749_v2 = vadd.f32 %v1884_v63, %v1148_v62 }
 0x17a   : >> { %1987 = vst.msk [vmem:[#allocation2 + $0x50] sm:$0xff] %vm1976_vm3, %v1970_v60  ;;  %v1971_v3 = vmax.f32 %v2744_v40, %v2748_v61 }
 0x17b   : >> { %1985 = vst.msk [vmem:[#allocation2 + $0x40] sm:$0xff] %vm1976_vm3, %v1968_v1  ;;  %v1969_v4 = vmax.f32 %v2745_v43, %v2749_v2 }
 0x17c   : >> { %1988 = vst.msk [vmem:[#allocation2 + $0x58] sm:$0xff] %vm1976_vm3, %v1971_v3 }
 0x17d   : >> { %1986 = vst.msk [vmem:[#allocation2 + $0x48] sm:$0xff] %vm1976_vm3, %v1969_v4  ;;  %v2650_v5 = vpop.f32.mrb[24].mxu1  ;;  %v2718_v6 = vpop.f32.mrb[24].mxu0 }
 0x17e   : >> { %v2750_v7 = vadd.f32 %v2718_v6, %v2650_v5  ;;  %v1161_v8 = vpop.f32.mrb[25].mxu1  ;;  %v1897_v9 = vpop.f32.mrb[25].mxu0 }
 0x17f   : >> { %v2751_v10 = vadd.f32 %v1897_v9, %v1161_v8  ;;  %v2651_v11 = vpop.f32.mrb[26].mxu1  ;;  %v2719_v12 = vpop.f32.mrb[26].mxu0 }
 0x180   : >> { %v2752_v13 = vadd.f32 %v2719_v12, %v2651_v11  ;;  %v1164_v14 = vpop.f32.mrb[27].mxu1  ;;  %v1900_v15 = vpop.f32.mrb[27].mxu0 }
 0x181   : >> { %v2753_v16 = vadd.f32 %v1900_v15, %v1164_v14 }
 0x183   : >> { %v2003_v17 = vld [vmem:[#allocation2 + $0x50] ss:$2 sm:$0xff]  ;;  %v2019_v18 = vld [vmem:[#allocation2 + $0x51] ss:$2 sm:$0xff] }
 0x184   : >> { %v2029_v19 = vmax.f32 %v2003_v17, %v2019_v18  ;;  %v2001_v20 = vld [vmem:[#allocation2 + $0x40] ss:$2 sm:$0xff]  ;;  %v2017_v21 = vld [vmem:[#allocation2 + $0x41] ss:$2 sm:$0xff] }
 0x185   : >> { %v2028_v22 = vmax.f32 %v2001_v20, %v2017_v21  ;;  %v2654_v23 = vpop.f32.mrb[28].mxu1  ;;  %v2722_v24 = vpop.f32.mrb[28].mxu0 }
 0x186   : >> { %v2043_v25 = vadd.f32 %v3005_v0, %v2029_v19  ;;  %v2754_v26 = vadd.f32 %v2722_v24, %v2654_v23  ;;  %v1177_v27 = vpop.f32.mrb[29].mxu1  ;;  %v1913_v28 = vpop.f32.mrb[29].mxu0 }
 0x187   : >> { %v2042_v29 = vadd.f32 %v3005_v0, %v2028_v22  ;;  %v2755_v30 = vadd.f32 %v1913_v28, %v1177_v27  ;;  %v2655_v31 = vpop.f32.mrb[30].mxu1  ;;  %v2723_v32 = vpop.f32.mrb[30].mxu0 }
 0x188   : >> { %2053 = vst.msk [vmem:[%s3213_s11 + $0x28] sm:$0xff] %vm1976_vm3, %v2043_v25  ;;  %v1974_v33 = vmax.f32 %v2750_v7, %v2754_v26  ;;  %v2756_v34 = vadd.f32 %v2723_v32, %v2655_v31  ;;  %v1180_v35 = vpop.f32.mrb[31].mxu1  ;;  %v1916_v36 = vpop.f32.mrb[31].mxu0 }
 0x189   : >> { %2052 = vst.msk [vmem:[%s3213_s11 + $0x20] sm:$0xff] %vm1976_vm3, %v2042_v29  ;;  %v1972_v37 = vmax.f32 %v2751_v10, %v2755_v30  ;;  %v2757_v38 = vadd.f32 %v1916_v36, %v1180_v35 }
 0x18a   : >> { %1991 = vst.msk [vmem:[#allocation2 + $0x70] sm:$0xff] %vm1976_vm3, %v1974_v33  ;;  %v1975_v39 = vmax.f32 %v2752_v13, %v2756_v34 }
 0x18b   : >> { %1989 = vst.msk [vmem:[#allocation2 + $0x60] sm:$0xff] %vm1976_vm3, %v1972_v37  ;;  %v1973_v40 = vmax.f32 %v2753_v16, %v2757_v38 }
 0x18c   : >> { %1992 = vst.msk [vmem:[#allocation2 + $0x78] sm:$0xff] %vm1976_vm3, %v1975_v39 }
 0x18d   : >> { %1990 = vst.msk [vmem:[#allocation2 + $0x68] sm:$0xff] %vm1976_vm3, %v1973_v40 }
 0x193   : >> { %v2007_v41 = vld [vmem:[#allocation2 + $0x70] ss:$2 sm:$0xff]  ;;  %v2023_v42 = vld [vmem:[#allocation2 + $0x71] ss:$2 sm:$0xff]  ;;  %177 = sbr.rel (!%p175_p4) target bundleno = 17 (0x11), region = 94 }
 0x194   : >> { %v2031_v43 = vmax.f32 %v2007_v41, %v2023_v42  ;;  %v2005_v44 = vld [vmem:[#allocation2 + $0x60] ss:$2 sm:$0xff]  ;;  %v2021_v45 = vld [vmem:[#allocation2 + $0x61] ss:$2 sm:$0xff] }
 0x195   : >> { %v2030_v46 = vmax.f32 %v2005_v44, %v2021_v45 }
 0x196   : >> { %v2045_v47 = vadd.f32 %v3005_v0, %v2031_v43 }
 0x197   : >> { %v2044_v48 = vadd.f32 %v3005_v0, %v2030_v46 }
 0x198   : >> { %2055 = vst.msk [vmem:[%s3213_s11 + $0x38] sm:$0xff] %vm1976_vm3, %v2045_v47 }
 0x199   : >> { %2054 = vst.msk [vmem:[%s3213_s11 + $0x30] sm:$0xff] %vm1976_vm3, %v2044_v48 }
 0x19a PF: > { %s13_s12 = sadd.s32 1, %s2967_s12  }
 0x19b   : > { %p10_p5 = scmp.ge.s32.totalorder %s13_s12, 4  }
 0x19d   :  { %12 = sbr.rel (!%p10_p5) target bundleno = 1 (0x1), region = 105 }

// kernel: model_forward.5
= control target key start
LH: loop header
LB: loop body
LE: loop exit
PB: predicated region body
PF: predicated region fallthrough
CT: control target
= control target key end

     0   :  { %s2440_s12 = smov 0   ;;  %s2908_s0 = inlined_call_operand.vmem [shape: bf16[2,20,16,160], index: 0, kind: input, shape index: {}]   ;;  %s2909_s1 = inlined_call_operand.vmem [shape: bf16[5,160,32], index: 1, kind: input, shape index: {}]   ;;  %s2910_s2 = inlined_call_operand.vmem [shape: f32[1,32], index: 2, kind: input, shape index: {}]   ;;  %s2911_s3 = inlined_call_operand.vmem [shape: f32[2,8,8,32], index: 3, kind: output, shape index: {}]  }
   0x1 LB: > { %s1829_s13 = sadd.s32 4294967295, %s2413_s12   ;;  %p1833_p0 = scmp.ge.s32.totalorder %s2413_s12, 1  ;;  %s2413_s12 = sphi %s2440_s12, %s13_s12  }
   0x2   : > { %p137_p1 = scmp.lt.s32.totalorder %s2413_s12, 3 }
   0x4   : > { %p138_p2 = pnand %p1833_p0, %p137_p1 }
   0x5   : > { %p161_p3 = scmp.lt.s32.totalorder (!%p138_p2), %s1829_s13, 1  ;;  %v2451_v0 = vld [vmem:[%s2910_s2] ss:$0 sm:$0xff] (!%p138_p2)  ;;  %s2463_s24 = smov (!%p138_p2), 0  }
   0x6   : > { %141 = sbr.rel (%p138_p2) target bundleno = 442 (0x1ba), region = 32 }
   0xd   : > { %s2913_s13 = smov (!%p161_p3, %s1829_s13), 1 }
   0xe   : > { %s2299_s16 = smul.u32 320, %s2913_s13  ;;  %s2167_s17 = sshll.u32 %s2913_s13, 6 }
   0xf   : > { %s2456_s20 = scalar_lea.vmem %s2911_s3, %s2167_s17 }
  0x10   : > { %s2461_s23 = scalar_lea.vmem %s2908_s0, %s2299_s16 }
  0x11 LB: >> { %v2317_v1 = vld [vmem:[%s2909_s1 + $0x50] sm:$0xff]   ;;  %v2419_v2 = vmov 0   ;;  %v2318_v3 = vld [vmem:[%s2909_s1 + $0xa0] sm:$0xff]   ;;  %v2319_v4 = vld [vmem:[%s2909_s1 + $0x58] sm:$0xff]   ;;  %s2169_s19 = sshll.u32 %s2417_s24, 7  ;;  %vm393_vm0 = vcmask 261120   ;;  %s2417_s24 = sphi %s2463_s24, %s178_s24  }
  0x12   : >> { %418 = vmatprep.subr.bf16.mxu1 %v2419_v2  ;;  %965 = vmatprep.subr.bf16.mxu0 %v2419_v2  ;;  %v2320_v5 = vld [vmem:[%s2909_s1 + $0xa8] sm:$0xff]   ;;  %v2321_v6 = vld [vmem:[%s2909_s1 + $0x60] sm:$0xff]   ;;  %v2322_v7 = vld [vmem:[%s2909_s1 + $0xb0] sm:$0xff]   ;;  %s2513_s25 = scalar_lea.vmem %s2461_s23, %s2169_s19 }
  0x13   : >> { %419 = vmatpush1.bf16.msra.mxu1 %v2317_v1  ;;  %966 = vmatpush1.bf16.msra.mxu0 %v2318_v3  ;;  %v2323_v8 = vld [vmem:[%s2909_s1 + $0x68] sm:$0xff]   ;;  %v2324_v9 = vld [vmem:[%s2909_s1 + $0xb8] sm:$0xff]   ;;  %v2325_v10 = vld [vmem:[%s2909_s1 + $0x70] sm:$0xff]  }
  0x14   : >> { %420 = vmatprep.subr.bf16.mxu1 %v2419_v2  ;;  %967 = vmatprep.subr.bf16.mxu0 %v2419_v2  ;;  %v2326_v11 = vld [vmem:[%s2909_s1 + $0xc0] sm:$0xff]   ;;  %v2327_v12 = vld [vmem:[%s2909_s1 + $0x78] sm:$0xff]   ;;  %v2328_v13 = vld [vmem:[%s2909_s1 + $0xc8] sm:$0xff]  }
  0x15   : >> { %v2521_v14 = vld [vmem:[%s2513_s25 + $0x14] ss:$8 sps:$4 sm:$0xff]   ;;  %v2329_v15 = vld [vmem:[%s2909_s1 + $0x80] sm:$0xff]   ;;  %v2331_v18 = vld [vmem:[%s2909_s1 + $0x88] sm:$0xff]  }
  0x16   : >> { %v2527_v16 = vld [vmem:[%s2513_s25 + $0x24] ss:$8 sps:$4 sm:$0xff]   ;;  %v2330_v17 = vld [vmem:[%s2909_s1 + $0xd0] sm:$0xff]   ;;  %1905 = vmatprep.mubr.msk.bf16.mxu1 %vm393_vm0, %v2521_v14  ;;  %v2332_v19 = vld [vmem:[%s2909_s1 + $0xd8] sm:$0xff]  }
  0x17   : >> { %421 = vmatpush1.bf16.msra.mxu1 %v2319_v4  ;;  %968 = vmatpush1.bf16.msra.mxu0 %v2320_v5  ;;  %v2333_v20 = vld [vmem:[%s2909_s1 + $0x90] sm:$0xff]   ;;  %v2334_v21 = vld [vmem:[%s2909_s1 + $0xe0] sm:$0xff]   ;;  %v2335_v22 = vld [vmem:[%s2909_s1 + $0x98] sm:$0xff]  }
  0x18   : >> { %422 = vmatprep.subr.bf16.mxu1 %v2419_v2  ;;  %969 = vmatprep.subr.bf16.mxu0 %v2419_v2  ;;  %v2336_v23 = vld [vmem:[%s2909_s1 + $0xe8] sm:$0xff]   ;;  %v2563_v24 = vld [vmem:[%s2513_s25 + $0x10] ss:$8 sps:$4 sm:$0xff]   ;;  %v2343_v26 = vld [vmem:[%s2909_s1] sm:$0xff]  }
  0x19   : >> { %2011 = vmatprep.mubr.msk.bf16.mxu0 %vm393_vm0, %v2527_v16  ;;  %v2566_v25 = vld [vmem:[%s2513_s25 + $0x20] ss:$8 sps:$4 sm:$0xff]   ;;  %v2344_v27 = vld [vmem:[%s2909_s1 + $0xf0] sm:$0xff]   ;;  %v2349_v30 = vld [vmem:[%s2909_s1 + $0xf8] sm:$0xff]  }
  0x1a   : >> { %v2577_v28 = vld [vmem:[%s2513_s25 + $0x34] ss:$8 sps:$4 sm:$0xff]   ;;  %v2347_v29 = vld [vmem:[%s2909_s1 + $0x8] sm:$0xff]   ;;  %v2594_v31 = vld [vmem:[%s2513_s25 + $0x30] ss:$8 sps:$4 sm:$0xff]  }
  0x1b   : >> { %423 = vmatpush1.bf16.msra.mxu1 %v2321_v6  ;;  %970 = vmatpush1.bf16.msra.mxu0 %v2322_v7  ;;  %v2350_v32 = vld [vmem:[%s2909_s1 + $0x10] sm:$0xff]   ;;  %v2351_v33 = vld [vmem:[%s2909_s1 + $0x100] sm:$0xff]   ;;  %v2355_v35 = vld [vmem:[%s2909_s1 + $0x18] sm:$0xff]  }
  0x1c   : >> { %424 = vmatprep.subr.bf16.mxu1 %v2419_v2  ;;  %971 = vmatprep.subr.bf16.mxu0 %v2419_v2  ;;  %v2605_v34 = vld [vmem:[%s2513_s25 + $0x44] ss:$8 sps:$4 sm:$0xff]   ;;  %v2621_v37 = vld [vmem:[%s2513_s25 + $0x40] ss:$8 sps:$4 sm:$0xff]   ;;  %v2625_v38 = vld [vmem:[%s2513_s25 + $0x54] ss:$8 sps:$4 sm:$0xff]  }
  0x1d   : >> { %v2356_v36 = vld [vmem:[%s2909_s1 + $0x108] sm:$0xff]   ;;  %v2360_v39 = vld [vmem:[%s2909_s1 + $0x20] sm:$0xff]   ;;  %v2361_v40 = vld [vmem:[%s2909_s1 + $0x110] sm:$0xff]  }
  0x1e   : >> { %v2365_v41 = vld [vmem:[%s2909_s1 + $0x28] sm:$0xff]   ;;  %v2366_v42 = vld [vmem:[%s2909_s1 + $0x118] sm:$0xff]   ;;  %v2369_v45 = vld [vmem:[%s2909_s1 + $0x30] sm:$0xff]  }
  0x1f   : >> { %425 = vmatpush1.bf16.msra.mxu1 %v2323_v8  ;;  %972 = vmatpush1.bf16.msra.mxu0 %v2324_v9  ;;  %v2650_v43 = vld [vmem:[%s2513_s25 + $0x50] ss:$8 sps:$4 sm:$0xff]   ;;  %v2653_v44 = vld [vmem:[%s2513_s25 + $0x64] ss:$8 sps:$4 sm:$0xff]   ;;  %v2678_v49 = vld [vmem:[%s2513_s25 + $0x60] ss:$8 sps:$4 sm:$0xff]  }
  0x20   : >> { %426 = vmatprep.subr.bf16.mxu1 %v2419_v2  ;;  %973 = vmatprep.subr.bf16.mxu0 %v2419_v2  ;;  %v2371_v46 = vld [vmem:[%s2909_s1 + $0x120] sm:$0xff]   ;;  %v2372_v47 = vld [vmem:[%s2909_s1 + $0x38] sm:$0xff]   ;;  %v2373_v48 = vld [vmem:[%s2909_s1 + $0x128] sm:$0xff]  }
  0x21   : >> { %v2681_v50 = vld [vmem:[%s2513_s25 + $0x74] ss:$8 sps:$4 sm:$0xff]   ;;  %v2377_v51 = vld [vmem:[%s2909_s1 + $0x40] sm:$0xff]   ;;  %v2382_v53 = vld [vmem:[%s2909_s1 + $0x48] sm:$0xff]  }
  0x22   : >> { %v2378_v52 = vld [vmem:[%s2909_s1 + $0x130] sm:$0xff]   ;;  %v2383_v54 = vld [vmem:[%s2909_s1 + $0x138] sm:$0xff]   ;;  %v2709_v56 = vld [vmem:[%s2513_s25 + $0x84] ss:$8 sps:$4 sm:$0xff]  }
  0x23   : >> { %427 = vmatpush1.bf16.msra.mxu1 %v2325_v10  ;;  %974 = vmatpush1.bf16.msra.mxu0 %v2326_v11  ;;  %v2706_v55 = vld [vmem:[%s2513_s25 + $0x70] ss:$8 sps:$4 sm:$0xff]   ;;  %v2720_v57 = vld [vmem:[%s2513_s25 + $0x80] ss:$8 sps:$4 sm:$0xff]   ;;  %v2723_v58 = vld [vmem:[%s2513_s25 + $0x94] ss:$8 sps:$4 sm:$0xff]  }
  0x24   : >> { %428 = vmatprep.subr.bf16.mxu1 %v2419_v2  ;;  %975 = vmatprep.subr.bf16.mxu0 %v2419_v2  ;;  %v2732_v59 = vld [vmem:[%s2513_s25 + $0x90] ss:$8 sps:$4 sm:$0xff]   ;;  %v2386_v60 = vld [vmem:[%s2513_s25 + $0x4] ss:$8 sps:$4 sm:$0xff]   ;;  %v2384_v61 = vld [vmem:[%s2513_s25] ss:$8 sps:$4 sm:$0xff]  }
  0x25   : >> { %v2387_v62 = vld [vmem:[%s2909_s1 + $0x140] sm:$0xff]   ;;  %v2388_v63 = vld [vmem:[%s2909_s1 + $0x148] sm:$0xff]   ;;  %v2389_v1 = vld [vmem:[%s2909_s1 + $0x150] sm:$0xff]  }
  0x26   : >> { %v2390_v3 = vld [vmem:[%s2909_s1 + $0x158] sm:$0xff]   ;;  %v2391_v4 = vld [vmem:[%s2909_s1 + $0x160] sm:$0xff]   ;;  %v2392_v5 = vld [vmem:[%s2909_s1 + $0x168] sm:$0xff]  }
  0x27   : >> { %429 = vmatpush1.bf16.msra.mxu1 %v2327_v12  ;;  %976 = vmatpush1.bf16.msra.mxu0 %v2328_v13  ;;  %v2393_v6 = vld [vmem:[%s2909_s1 + $0x170] sm:$0xff]   ;;  %v2394_v7 = vld [vmem:[%s2909_s1 + $0x178] sm:$0xff]   ;;  %v2395_v8 = vld [vmem:[%s2909_s1 + $0x180] sm:$0xff]  }
  0x28   : >> { %430 = vmatprep.subr.bf16.mxu1 %v2419_v2  ;;  %977 = vmatprep.subr.bf16.mxu0 %v2419_v2  ;;  %v2399_v9 = vld [vmem:[%s2909_s1 + $0x188] sm:$0xff]   ;;  %v2400_v11 = vld [vmem:[%s2513_s25 + $0xb4] ss:$8 sps:$4 sm:$0xff]   ;;  %v2402_v12 = vld [vmem:[%s2513_s25 + $0xb0] ss:$8 sps:$4 sm:$0xff]  }
  0x29   : >> { %v2396_v10 = vld [vmem:[%s2513_s25 + $0xa4] ss:$8 sps:$4 sm:$0xff]  }
  0x2b   : >> { %431 = vmatpush1.bf16.msra.mxu1 %v2329_v15  ;;  %978 = vmatpush1.bf16.msra.mxu0 %v2330_v17 }
  0x2c   : >> { %432 = vmatprep.subr.bf16.mxu1 %v2419_v2  ;;  %979 = vmatprep.subr.bf16.mxu0 %v2419_v2 }
  0x2f   : >> { %433 = vmatpush1.bf16.msra.mxu1 %v2331_v18  ;;  %980 = vmatpush1.bf16.msra.mxu0 %v2332_v19 }
  0x30   : >> { %434 = vmatprep.subr.bf16.mxu1 %v2419_v2  ;;  %981 = vmatprep.subr.bf16.mxu0 %v2419_v2 }
  0x33   : >> { %435 = vmatpush1.bf16.msra.mxu1 %v2333_v20  ;;  %982 = vmatpush1.bf16.msra.mxu0 %v2334_v21 }
  0x34   : >> { %436 = vmatprep.subr.bf16.mxu1 %v2419_v2  ;;  %983 = vmatprep.subr.bf16.mxu0 %v2419_v2 }
  0x37   : >> { %437 = vmatpush1.bf16.msra.mxu1 %v2335_v22  ;;  %984 = vmatpush1.bf16.msra.mxu0 %v2336_v23 }
  0x38   : >> { %671 = vmatprep.subr.bf16.mxu1 %v2419_v2  ;;  %1275 = vmatprep.subr.bf16.mxu0 %v2419_v2 }
  0x3a   : >> { %451 = vmatmul.mubr.bf16.vlgmr.msra.gmra.mrb[0].mxu1 %v2563_v24  ;;  %998 = vmatmul.mubr.bf16.vlgmr.msra.gmra.mrb[0].mxu0 %v2566_v25 }
  0x3b   : >> { %672 = vmatpush1.bf16.msra.mxu1 %v2343_v26  ;;  %1276 = vmatpush1.bf16.msra.mxu0 %v2344_v27 }
  0x3c   : >> { %1906 = vmatprep.mubr.msk.bf16.mxu1 %vm393_vm0, %v2527_v16  ;;  %673 = vmatprep.subr.bf16.mxu1 %v2419_v2 }
  0x3d   : >> { %2012 = vmatprep.mubr.msk.bf16.mxu0 %vm393_vm0, %v2577_v28  ;;  %1277 = vmatprep.subr.bf16.mxu0 %v2419_v2 }
  0x3f   : >> { %674 = vmatpush1.bf16.msra.mxu1 %v2347_v29  ;;  %1278 = vmatpush1.bf16.msra.mxu0 %v2349_v30 }
  0x40   : >> { %675 = vmatprep.subr.bf16.mxu1 %v2419_v2  ;;  %1279 = vmatprep.subr.bf16.mxu0 %v2419_v2 }
  0x42   : >> { %459 = vmatmul.mubr.bf16.gmra.mrb[4].mxu1 %v2566_v25  ;;  %1006 = vmatmul.mubr.bf16.gmra.mrb[4].mxu0 %v2594_v31 }
  0x43   : >> { %676 = vmatpush1.bf16.msra.mxu1 %v2350_v32  ;;  %1280 = vmatpush1.bf16.msra.mxu0 %v2351_v33 }
  0x44   : >> { %1907 = vmatprep.mubr.msk.bf16.mxu1 %vm393_vm0, %v2577_v28  ;;  %2013 = vmatprep.mubr.msk.bf16.mxu0 %vm393_vm0, %v2605_v34 }
  0x45   : >> { %677 = vmatprep.subr.bf16.mxu1 %v2419_v2  ;;  %1281 = vmatprep.subr.bf16.mxu0 %v2419_v2 }
  0x47   : >> { %678 = vmatpush1.bf16.msra.mxu1 %v2355_v35  ;;  %1282 = vmatpush1.bf16.msra.mxu0 %v2356_v36 }
  0x48   : >> { %679 = vmatprep.subr.bf16.mxu1 %v2419_v2  ;;  %1283 = vmatprep.subr.bf16.mxu0 %v2419_v2 }
  0x4a   : >> { %467 = vmatmul.mubr.bf16.gmra.mrb[8].mxu1 %v2594_v31  ;;  %1014 = vmatmul.mubr.bf16.gmra.mrb[8].mxu0 %v2621_v37 }
  0x4b   : >> { %1908 = vmatprep.mubr.msk.bf16.mxu1 %vm393_vm0, %v2605_v34  ;;  %2014 = vmatprep.mubr.msk.bf16.mxu0 %vm393_vm0, %v2625_v38 }
  0x4c   : >> { %680 = vmatpush1.bf16.msra.mxu1 %v2360_v39  ;;  %1284 = vmatpush1.bf16.msra.mxu0 %v2361_v40 }
  0x4d   : >> { %681 = vmatprep.subr.bf16.mxu1 %v2419_v2  ;;  %1285 = vmatprep.subr.bf16.mxu0 %v2419_v2 }
  0x50   : >> { %682 = vmatpush1.bf16.msra.mxu1 %v2365_v41  ;;  %1286 = vmatpush1.bf16.msra.mxu0 %v2366_v42 }
  0x51   : >> { %683 = vmatprep.subr.bf16.mxu1 %v2419_v2  ;;  %1287 = vmatprep.subr.bf16.mxu0 %v2419_v2 }
  0x52   : >> { %475 = vmatmul.mubr.bf16.gmra.mrb[12].mxu1 %v2621_v37  ;;  %1022 = vmatmul.mubr.bf16.gmra.mrb[12].mxu0 %v2650_v43 }
  0x53   : >> { %1909 = vmatprep.mubr.msk.bf16.mxu1 %vm393_vm0, %v2625_v38  ;;  %2015 = vmatprep.mubr.msk.bf16.mxu0 %vm393_vm0, %v2653_v44 }
  0x54   : >> { %684 = vmatpush1.bf16.msra.mxu1 %v2369_v45  ;;  %1288 = vmatpush1.bf16.msra.mxu0 %v2371_v46 }
  0x55   : >> { %685 = vmatprep.subr.bf16.mxu1 %v2419_v2  ;;  %1289 = vmatprep.subr.bf16.mxu0 %v2419_v2 }
  0x58   : >> { %686 = vmatpush1.bf16.msra.mxu1 %v2372_v47  ;;  %1290 = vmatpush1.bf16.msra.mxu0 %v2373_v48 }
  0x59   : >> { %687 = vmatprep.subr.bf16.mxu1 %v2419_v2  ;;  %1291 = vmatprep.subr.bf16.mxu0 %v2419_v2 }
  0x5a   : >> { %483 = vmatmul.mubr.bf16.gmra.mrb[16].mxu1 %v2650_v43  ;;  %1030 = vmatmul.mubr.bf16.gmra.mrb[16].mxu0 %v2678_v49 }
  0x5b   : >> { %1910 = vmatprep.mubr.msk.bf16.mxu1 %vm393_vm0, %v2653_v44  ;;  %2016 = vmatprep.mubr.msk.bf16.mxu0 %vm393_vm0, %v2681_v50 }
  0x5c   : >> { %688 = vmatpush1.bf16.msra.mxu1 %v2377_v51  ;;  %1292 = vmatpush1.bf16.msra.mxu0 %v2378_v52 }
  0x5d   : >> { %689 = vmatprep.subr.bf16.mxu1 %v2419_v2  ;;  %1293 = vmatprep.subr.bf16.mxu0 %v2419_v2 }
  0x60   : >> { %690 = vmatpush1.bf16.msra.mxu1 %v2382_v53  ;;  %1294 = vmatpush1.bf16.msra.mxu0 %v2383_v54 }
  0x61   : >> { %2175 = vmatprep.subr.bf16.mxu1 %v2419_v2  ;;  %1585 = vmatprep.subr.bf16.mxu0 %v2419_v2 }
  0x62   : >> { %491 = vmatmul.mubr.bf16.gmra.mrb[20].mxu1 %v2678_v49  ;;  %1038 = vmatmul.mubr.bf16.gmra.mrb[20].mxu0 %v2706_v55 }
  0x63   : >> { %1911 = vmatprep.mubr.msk.bf16.mxu1 %vm393_vm0, %v2681_v50  ;;  %2017 = vmatprep.mubr.msk.bf16.mxu0 %vm393_vm0, %v2709_v56 }
  0x6a   : >> { %499 = vmatmul.mubr.bf16.gmra.mrb[24].mxu1 %v2706_v55  ;;  %1046 = vmatmul.mubr.bf16.gmra.mrb[24].mxu0 %v2720_v57 }
  0x6b   : >> { %1912 = vmatprep.mubr.msk.bf16.mxu1 %vm393_vm0, %v2709_v56  ;;  %2018 = vmatprep.mubr.msk.bf16.mxu0 %vm393_vm0, %v2723_v58 }
  0x72   : >> { %507 = vmatmul.mubr.bf16.gmra.mrb[28].mxu1 %v2720_v57  ;;  %1054 = vmatmul.mubr.bf16.gmra.mrb[28].mxu0 %v2732_v59 }
  0x73   : >> { %1939 = vmatprep.mubr.msk.bf16.mxu1 %vm393_vm0, %v2386_v60  ;;  %2083 = vmatprep.mubr.msk.bf16.mxu0 %vm393_vm0, %v2577_v28 }
  0x7a   : >> { %704 = vmatmul.mubr.bf16.vlgmr.msra.gmra.mrb[0].mxu1 %v2384_v61  ;;  %1308 = vmatmul.mubr.bf16.vlgmr.msra.gmra.mrb[0].mxu0 %v2594_v31 }
  0x7b   : >> { %2185 = vmatpush1.bf16.msra.mxu1 %v2387_v62  ;;  %1586 = vmatpush1.bf16.msra.mxu0 %v2387_v62 }
  0x7c   : >> { %1940 = vmatprep.mubr.msk.bf16.mxu1 %vm393_vm0, %v2521_v14  ;;  %2084 = vmatprep.mubr.msk.bf16.mxu0 %vm393_vm0, %v2605_v34 }
  0x7d   : >> { %1587 = vmatprep.subr.bf16.mxu0 %v2419_v2  ;;  %2176 = vmatprep.subr.bf16.mxu1 %v2419_v2 }
  0x7f   : >> { %2186 = vmatpush1.bf16.msra.mxu1 %v2388_v63  ;;  %1588 = vmatpush1.bf16.msra.mxu0 %v2388_v63 }
  0x80   : >> { %2177 = vmatprep.subr.bf16.mxu1 %v2419_v2  ;;  %1589 = vmatprep.subr.bf16.mxu0 %v2419_v2 }
  0x82   : >> { %712 = vmatmul.mubr.bf16.gmra.mrb[4].mxu1 %v2563_v24  ;;  %1316 = vmatmul.mubr.bf16.gmra.mrb[4].mxu0 %v2621_v37 }
  0x83   : >> { %2187 = vmatpush1.bf16.msra.mxu1 %v2389_v1  ;;  %1590 = vmatpush1.bf16.msra.mxu0 %v2389_v1 }
  0x84   : >> { %1941 = vmatprep.mubr.msk.bf16.mxu1 %vm393_vm0, %v2527_v16  ;;  %2085 = vmatprep.mubr.msk.bf16.mxu0 %vm393_vm0, %v2625_v38 }
  0x85   : >> { %1591 = vmatprep.subr.bf16.mxu0 %v2419_v2  ;;  %2178 = vmatprep.subr.bf16.mxu1 %v2419_v2 }
  0x87   : >> { %2188 = vmatpush1.bf16.msra.mxu1 %v2390_v3  ;;  %1592 = vmatpush1.bf16.msra.mxu0 %v2390_v3 }
  0x88   : >> { %2179 = vmatprep.subr.bf16.mxu1 %v2419_v2  ;;  %1593 = vmatprep.subr.bf16.mxu0 %v2419_v2 }
  0x8a   : >> { %720 = vmatmul.mubr.bf16.gmra.mrb[8].mxu1 %v2566_v25  ;;  %1324 = vmatmul.mubr.bf16.gmra.mrb[8].mxu0 %v2650_v43 }
  0x8b   : >> { %1942 = vmatprep.mubr.msk.bf16.mxu1 %vm393_vm0, %v2577_v28  ;;  %2086 = vmatprep.mubr.msk.bf16.mxu0 %vm393_vm0, %v2653_v44 }
  0x8c   : >> { %1594 = vmatpush1.bf16.msra.mxu0 %v2391_v4  ;;  %2189 = vmatpush1.bf16.msra.mxu1 %v2391_v4 }
  0x8d   : >> { %1595 = vmatprep.subr.bf16.mxu0 %v2419_v2  ;;  %2180 = vmatprep.subr.bf16.mxu1 %v2419_v2 }
  0x90   : >> { %1596 = vmatpush1.bf16.msra.mxu0 %v2392_v5  ;;  %2190 = vmatpush1.bf16.msra.mxu1 %v2392_v5 }
  0x91   : >> { %1597 = vmatprep.subr.bf16.mxu0 %v2419_v2  ;;  %2181 = vmatprep.subr.bf16.mxu1 %v2419_v2 }
  0x92   : >> { %728 = vmatmul.mubr.bf16.gmra.mrb[12].mxu1 %v2594_v31  ;;  %1332 = vmatmul.mubr.bf16.gmra.mrb[12].mxu0 %v2678_v49 }
  0x93   : >> { %1943 = vmatprep.mubr.msk.bf16.mxu1 %vm393_vm0, %v2605_v34  ;;  %2087 = vmatprep.mubr.msk.bf16.mxu0 %vm393_vm0, %v2681_v50 }
  0x94   : >> { %1598 = vmatpush1.bf16.msra.mxu0 %v2393_v6  ;;  %2191 = vmatpush1.bf16.msra.mxu1 %v2393_v6 }
  0x95   : >> { %1599 = vmatprep.subr.bf16.mxu0 %v2419_v2  ;;  %2182 = vmatprep.subr.bf16.mxu1 %v2419_v2 }
  0x98   : >> { %1600 = vmatpush1.bf16.msra.mxu0 %v2394_v7  ;;  %2192 = vmatpush1.bf16.msra.mxu1 %v2394_v7 }
  0x99   : >> { %1601 = vmatprep.subr.bf16.mxu0 %v2419_v2  ;;  %2183 = vmatprep.subr.bf16.mxu1 %v2419_v2 }
  0x9a   : >> { %736 = vmatmul.mubr.bf16.gmra.mrb[16].mxu1 %v2621_v37  ;;  %1340 = vmatmul.mubr.bf16.gmra.mrb[16].mxu0 %v2706_v55 }
  0x9b   : >> { %1944 = vmatprep.mubr.msk.bf16.mxu1 %vm393_vm0, %v2625_v38  ;;  %2088 = vmatprep.mubr.msk.bf16.mxu0 %vm393_vm0, %v2709_v56 }
  0x9c   : >> { %1602 = vmatpush1.bf16.msra.mxu0 %v2395_v8  ;;  %2193 = vmatpush1.bf16.msra.mxu1 %v2395_v8 }
  0x9d   : >> { %1603 = vmatprep.subr.bf16.mxu0 %v2419_v2  ;;  %2184 = vmatprep.subr.bf16.mxu1 %v2419_v2  ;;  %v2398_v2 = vld [vmem:[%s2513_s25 + $0xa0] ss:$8 sps:$4 sm:$0xff]   ;;  %s2174_s25 = sshll.u32 %s2417_s24, 5  ;;  %s178_s24 = sadd.s32 1, %s2417_s24  }
  0x9e   : >> { %s2881_s11 = scalar_lea.vmem %s2456_s20, %s2174_s25  ;;  %p175_p4 = scmp.ge.s32.totalorder %s178_s24, 2  }
  0xa0   : >> { %1604 = vmatpush1.bf16.msra.mxu0 %v2399_v9  ;;  %2194 = vmatpush1.bf16.msra.mxu1 %v2399_v9 }
  0xa2   : >> { %744 = vmatmul.mubr.bf16.gmra.mrb[20].mxu1 %v2650_v43  ;;  %1348 = vmatmul.mubr.bf16.gmra.mrb[20].mxu0 %v2720_v57 }
  0xa3   : >> { %1945 = vmatprep.mubr.msk.bf16.mxu1 %vm393_vm0, %v2653_v44  ;;  %2089 = vmatprep.mubr.msk.bf16.mxu0 %vm393_vm0, %v2723_v58 }
  0xaa   : >> { %752 = vmatmul.mubr.bf16.gmra.mrb[24].mxu1 %v2678_v49  ;;  %1356 = vmatmul.mubr.bf16.gmra.mrb[24].mxu0 %v2732_v59 }
  0xab   : >> { %1946 = vmatprep.mubr.msk.bf16.mxu1 %vm393_vm0, %v2681_v50  ;;  %2090 = vmatprep.mubr.msk.bf16.mxu0 %vm393_vm0, %v2396_v10 }
  0xb2   : >> { %760 = vmatmul.mubr.bf16.gmra.mrb[28].mxu1 %v2706_v55  ;;  %1364 = vmatmul.mubr.bf16.gmra.mrb[28].mxu0 %v2398_v2 }
  0xb3   : >> { %2159 = vmatprep.mubr.msk.bf16.mxu1 %vm393_vm0, %v2709_v56  ;;  %2155 = vmatprep.mubr.msk.bf16.mxu0 %vm393_vm0, %v2605_v34 }
  0xba   : >> { %1650 = vmatmul.mubr.bf16.vlgmr.msra.gmra.mrb[32].mxu1 %v2720_v57  ;;  %1618 = vmatmul.mubr.bf16.vlgmr.msra.gmra.mrb[0].mxu0 %v2621_v37 }
  0xbb   : >> { %2160 = vmatprep.mubr.msk.bf16.mxu1 %vm393_vm0, %v2723_v58  ;;  %2156 = vmatprep.mubr.msk.bf16.mxu0 %vm393_vm0, %v2625_v38 }
  0xc2   : >> { %1658 = vmatmul.mubr.bf16.gmra.mrb[36].mxu1 %v2732_v59  ;;  %1626 = vmatmul.mubr.bf16.gmra.mrb[4].mxu0 %v2650_v43 }
  0xc3   : >> { %2161 = vmatprep.mubr.msk.bf16.mxu1 %vm393_vm0, %v2396_v10  ;;  %2157 = vmatprep.mubr.msk.bf16.mxu0 %vm393_vm0, %v2653_v44 }
  0xca   : >> { %1666 = vmatmul.mubr.bf16.gmra.mrb[40].mxu1 %v2398_v2  ;;  %1634 = vmatmul.mubr.bf16.gmra.mrb[8].mxu0 %v2678_v49 }
  0xcb   : >> { %2162 = vmatprep.mubr.msk.bf16.mxu1 %vm393_vm0, %v2400_v11  ;;  %2158 = vmatprep.mubr.msk.bf16.mxu0 %vm393_vm0, %v2681_v50 }
  0xd2   : >> { %1674 = vmatmul.mubr.bf16.gmra.mrb[44].mxu1 %v2402_v12  ;;  %1642 = vmatmul.mubr.bf16.gmra.mrb[12].mxu0 %v2706_v55 }
 0x14d   : >> { %v705_v13 = vpop.f32.mrb[0].mxu1 }
 0x14e   : >> { %v707_v14 = vpop.f32.mrb[1].mxu1 }
 0x14f   : >> { %v2854_v15 = vpop.f32.mrb[2].mxu1 }
 0x150   : >> { %v710_v16 = vpop.f32.mrb[3].mxu1 }
 0x155   : >> { %v2856_v17 = vpop.f32.mrb[4].mxu1 }
 0x156   : >> { %v715_v18 = vpop.f32.mrb[5].mxu1 }
 0x157   : >> { %v2858_v19 = vpop.f32.mrb[6].mxu1 }
 0x158   : >> { %v718_v20 = vpop.f32.mrb[7].mxu1 }
 0x15d   : >> { %v2860_v21 = vpop.f32.mrb[8].mxu1 }
 0x15e   : >> { %v723_v22 = vpop.f32.mrb[9].mxu1 }
 0x15f   : >> { %v2862_v23 = vpop.f32.mrb[10].mxu1 }
 0x160   : >> { %v726_v24 = vpop.f32.mrb[11].mxu1 }
 0x165   : >> { %v2864_v25 = vpop.f32.mrb[12].mxu1 }
 0x166   : >> { %v731_v26 = vpop.f32.mrb[13].mxu1 }
 0x167   : >> { %v2866_v27 = vpop.f32.mrb[14].mxu1 }
 0x168   : >> { %v734_v28 = vpop.f32.mrb[15].mxu1 }
 0x16d   : >> { %v737_v29 = vpop.f32.mrb[16].mxu1  ;;  %v1341_v30 = vpop.f32.mrb[16].mxu0 }
 0x16e   : >> { %v739_v31 = vpop.f32.mrb[17].mxu1  ;;  %v2203_v32 = vadd.f32 %v1341_v30, %v737_v29  ;;  %v1343_v33 = vpop.f32.mrb[17].mxu0 }
 0x16f   : >> { %v740_v34 = vpop.f32.mrb[18].mxu1  ;;  %v1344_v35 = vpop.f32.mrb[18].mxu0 }
 0x170   : >> { %v742_v36 = vpop.f32.mrb[19].mxu1  ;;  %v2205_v37 = vadd.f32 %v1344_v35, %v740_v34  ;;  %v1346_v38 = vpop.f32.mrb[19].mxu0 }
 0x175   : >> { %v745_v39 = vpop.f32.mrb[20].mxu1  ;;  %v1349_v40 = vpop.f32.mrb[20].mxu0 }
 0x176   : >> { %v747_v41 = vpop.f32.mrb[21].mxu1  ;;  %v2207_v42 = vadd.f32 %v1349_v40, %v745_v39  ;;  %v1351_v43 = vpop.f32.mrb[21].mxu0 }
 0x177   : >> { %v748_v44 = vpop.f32.mrb[22].mxu1  ;;  %v1352_v45 = vpop.f32.mrb[22].mxu0 }
 0x178   : >> { %v750_v46 = vpop.f32.mrb[23].mxu1  ;;  %v2209_v47 = vadd.f32 %v1352_v45, %v748_v44  ;;  %v1354_v48 = vpop.f32.mrb[23].mxu0 }
 0x17d   : >> { %v753_v49 = vpop.f32.mrb[24].mxu1  ;;  %v1357_v50 = vpop.f32.mrb[24].mxu0 }
 0x17e   : >> { %v755_v51 = vpop.f32.mrb[25].mxu1  ;;  %v2211_v52 = vadd.f32 %v1357_v50, %v753_v49  ;;  %v1359_v53 = vpop.f32.mrb[25].mxu0 }
 0x17f   : >> { %v756_v54 = vpop.f32.mrb[26].mxu1  ;;  %v1360_v55 = vpop.f32.mrb[26].mxu0 }
 0x180   : >> { %v758_v56 = vpop.f32.mrb[27].mxu1  ;;  %v2213_v57 = vadd.f32 %v1360_v55, %v756_v54  ;;  %v1362_v58 = vpop.f32.mrb[27].mxu0 }
 0x185   : >> { %v761_v59 = vpop.f32.mrb[28].mxu1  ;;  %v1365_v60 = vpop.f32.mrb[28].mxu0 }
 0x186   : >> { %v763_v61 = vpop.f32.mrb[29].mxu1  ;;  %v2215_v62 = vadd.f32 %v1365_v60, %v761_v59  ;;  %v1367_v63 = vpop.f32.mrb[29].mxu0 }
 0x187   : >> { %v764_v1 = vpop.f32.mrb[30].mxu1  ;;  %v1368_v3 = vpop.f32.mrb[30].mxu0 }
 0x188   : >> { %v766_v4 = vpop.f32.mrb[31].mxu1  ;;  %v2868_v5 = vadd.f32 %v1368_v3, %v764_v1  ;;  %v1370_v6 = vpop.f32.mrb[31].mxu0 }
 0x18d   : >> { %v1651_v7 = vpop.f32.mrb[32].mxu1  ;;  %v1619_v8 = vpop.f32.mrb[0].mxu0 }
 0x18e   : >> { %v2204_v9 = vadd.f32 %v2203_v32, %v1651_v7  ;;  %v1653_v10 = vpop.f32.mrb[33].mxu1  ;;  %v2195_v2 = vadd.f32 %v1619_v8, %v705_v13  ;;  %v1621_v11 = vpop.f32.mrb[1].mxu0 }
 0x18f   : >> { %v1654_v12 = vpop.f32.mrb[34].mxu1  ;;  %v1622_v14 = vpop.f32.mrb[2].mxu0 }
 0x190   : >> { %v2206_v16 = vadd.f32 %v2205_v37, %v1654_v12  ;;  %v1656_v18 = vpop.f32.mrb[35].mxu1  ;;  %v2196_v20 = vadd.f32 %v1622_v14, %v2854_v15  ;;  %v1624_v22 = vpop.f32.mrb[3].mxu0 }
 0x195   : >> { %v1659_v24 = vpop.f32.mrb[36].mxu1  ;;  %v1627_v26 = vpop.f32.mrb[4].mxu0 }
 0x196   : >> { %v2208_v28 = vadd.f32 %v2207_v42, %v1659_v24  ;;  %v1661_v29 = vpop.f32.mrb[37].mxu1  ;;  %v2197_v30 = vadd.f32 %v1627_v26, %v2856_v17  ;;  %v1629_v31 = vpop.f32.mrb[5].mxu0 }
 0x197   : >> { %v1662_v33 = vpop.f32.mrb[38].mxu1  ;;  %v1630_v32 = vpop.f32.mrb[6].mxu0 }
 0x198   : >> { %v1702_v34 = vmax.f32 %v2204_v9, %v2208_v28  ;;  %v2210_v35 = vadd.f32 %v2209_v47, %v1662_v33  ;;  %v1664_v13 = vpop.f32.mrb[39].mxu1  ;;  %v1698_v36 = vmax.f32 %v2195_v2, %v2197_v30  ;;  %v2198_v38 = vadd.f32 %v1630_v32, %v2858_v19  ;;  %v1632_v37 = vpop.f32.mrb[7].mxu0 }
 0x19a   : >> { %1710 = vst.msk [vmem:[#allocation2 + $0x20] sm:$0xff] %vm393_vm0, %v1702_v34  ;;  %v1703_v15 = vmax.f32 %v2206_v16, %v2210_v35  ;;  %1706 = vst.msk [vmem:[#allocation2] sm:$0xff] %vm393_vm0, %v1698_v36  ;;  %v1699_v39 = vmax.f32 %v2196_v20, %v2198_v38 }
 0x19c   : >> { %1711 = vst.msk [vmem:[#allocation2 + $0x28] sm:$0xff] %vm393_vm0, %v1703_v15  ;;  %1707 = vst.msk [vmem:[#allocation2 + $0x8] sm:$0xff] %vm393_vm0, %v1699_v39 }
 0x19d   : >> { %v1667_v17 = vpop.f32.mrb[40].mxu1  ;;  %v1635_v40 = vpop.f32.mrb[8].mxu0 }
 0x19e   : >> { %v2212_v41 = vadd.f32 %v2211_v52, %v1667_v17  ;;  %v1669_v42 = vpop.f32.mrb[41].mxu1  ;;  %v2199_v43 = vadd.f32 %v1635_v40, %v2860_v21  ;;  %v1637_v19 = vpop.f32.mrb[9].mxu0 }
 0x19f   : >> { %v1670_v44 = vpop.f32.mrb[42].mxu1  ;;  %v1638_v45 = vpop.f32.mrb[10].mxu0 }
 0x1a0   : >> { %v2214_v46 = vadd.f32 %v2213_v57, %v1670_v44  ;;  %v1672_v47 = vpop.f32.mrb[43].mxu1  ;;  %v2200_v48 = vadd.f32 %v1638_v45, %v2862_v23  ;;  %v1640_v49 = vpop.f32.mrb[11].mxu0 }
 0x1a3   : >> { %v1718_v50 = vld [vmem:[#allocation2 + $0x20] ss:$2 sm:$0xff]  ;;  %v1726_v51 = vld [vmem:[#allocation2 + $0x21] ss:$2 sm:$0xff] }
 0x1a4   : >> { %v1714_v53 = vld [vmem:[#allocation2] ss:$2 sm:$0xff]  ;;  %v1722_v54 = vld [vmem:[#allocation2 + $0x1] ss:$2 sm:$0xff]  ;;  %v1731_v55 = vmax.f32 %v1718_v50, %v1726_v51 }
 0x1a5   : >> { %v1729_v56 = vmax.f32 %v1714_v53, %v1722_v54  ;;  %v1675_v21 = vpop.f32.mrb[44].mxu1  ;;  %v1643_v58 = vpop.f32.mrb[12].mxu0 }
 0x1a6   : >> { %v1741_v52 = vadd.f32 %v2451_v0, %v1731_v55  ;;  %v2216_v57 = vadd.f32 %v2215_v62, %v1675_v21  ;;  %v1677_v59 = vpop.f32.mrb[45].mxu1  ;;  %v2201_v60 = vadd.f32 %v1643_v58, %v2864_v25  ;;  %v1645_v61 = vpop.f32.mrb[13].mxu0 }
 0x1a7   : >> { %v1739_v23 = vadd.f32 %v2451_v0, %v1729_v56  ;;  %v1678_v63 = vpop.f32.mrb[46].mxu1  ;;  %v1646_v3 = vpop.f32.mrb[14].mxu0 }
 0x1a8   : >> { %1747 = vst.msk [vmem:[%s2881_s11 + $0x10] sm:$0xff] %vm393_vm0, %v1741_v52  ;;  %v1704_v1 = vmax.f32 %v2212_v41, %v2216_v57  ;;  %v2218_v4 = vadd.f32 %v2868_v5, %v1678_v63  ;;  %v1680_v6 = vpop.f32.mrb[47].mxu1  ;;  %v1700_v7 = vmax.f32 %v2199_v43, %v2201_v60  ;;  %v2202_v8 = vadd.f32 %v1646_v3, %v2866_v27  ;;  %v1648_v62 = vpop.f32.mrb[15].mxu0 }
 0x1a9   : >> { %1745 = vst.msk [vmem:[%s2881_s11] sm:$0xff] %vm393_vm0, %v1739_v23 }
 0x1aa   : >> { %1712 = vst.msk [vmem:[#allocation2 + $0x30] sm:$0xff] %vm393_vm0, %v1704_v1  ;;  %v1705_v25 = vmax.f32 %v2214_v46, %v2218_v4  ;;  %1708 = vst.msk [vmem:[#allocation2 + $0x10] sm:$0xff] %vm393_vm0, %v1700_v7  ;;  %v1701_v9 = vmax.f32 %v2200_v48, %v2202_v8 }
 0x1ac   : >> { %1713 = vst.msk [vmem:[#allocation2 + $0x38] sm:$0xff] %vm393_vm0, %v1705_v25  ;;  %1709 = vst.msk [vmem:[#allocation2 + $0x18] sm:$0xff] %vm393_vm0, %v1701_v9 }
 0x1b3   : >> { %v1720_v5 = vld [vmem:[#allocation2 + $0x30] ss:$2 sm:$0xff]  ;;  %v1728_v10 = vld [vmem:[#allocation2 + $0x31] ss:$2 sm:$0xff]  ;;  %177 = sbr.rel (!%p175_p4) target bundleno = 17 (0x11), region = 86 }
 0x1b4   : >> { %v1716_v2 = vld [vmem:[#allocation2 + $0x10] ss:$2 sm:$0xff]  ;;  %v1724_v11 = vld [vmem:[#allocation2 + $0x11] ss:$2 sm:$0xff]  ;;  %v1732_v12 = vmax.f32 %v1720_v5, %v1728_v10 }
 0x1b5   : >> { %v1730_v14 = vmax.f32 %v1716_v2, %v1724_v11 }
 0x1b6   : >> { %v1742_v27 = vadd.f32 %v2451_v0, %v1732_v12 }
 0x1b7   : >> { %v1740_v16 = vadd.f32 %v2451_v0, %v1730_v14 }
 0x1b8   : >> { %1748 = vst.msk [vmem:[%s2881_s11 + $0x18] sm:$0xff] %vm393_vm0, %v1742_v27 }
 0x1b9   : >> { %1746 = vst.msk [vmem:[%s2881_s11 + $0x8] sm:$0xff] %vm393_vm0, %v1740_v16 }
 0x1ba PF: > { %s13_s12 = sadd.s32 1, %s2413_s12  }
 0x1bb   : > { %p10_p5 = scmp.ge.s32.totalorder %s13_s12, 4  }
 0x1bd   :  { %12 = sbr.rel (!%p10_p5) target bundleno = 1 (0x1), region = 97 }

// kernel: model_forward.6
= control target key start
LH: loop header
LB: loop body
LE: loop exit
PB: predicated region body
PF: predicated region fallthrough
CT: control target
= control target key end

     0   :  { %s1726_s12 = smov 0   ;;  %s2070_s0 = inlined_call_operand.vmem [shape: bf16[2,12,8,160], index: 0, kind: input, shape index: {}]   ;;  %s2071_s1 = inlined_call_operand.vmem [shape: bf16[5,160,64], index: 1, kind: input, shape index: {}]   ;;  %s2072_s2 = inlined_call_operand.vmem [shape: f32[1,64], index: 2, kind: input, shape index: {}]   ;;  %s2073_s3 = inlined_call_operand.vmem [shape: f32[2,4,4,64], index: 3, kind: output, shape index: {}]  }
   0x1 LB: > { %s1309_s13 = sadd.s32 4294967295, %s1703_s12   ;;  %p1313_p0 = scmp.ge.s32.totalorder %s1703_s12, 1  ;;  %s1703_s12 = sphi %s1726_s12, %s13_s12  }
   0x2   : > { %p137_p1 = scmp.lt.s32.totalorder %s1703_s12, 3 }
   0x4   : > { %p138_p2 = pnand %p1313_p0, %p137_p1 }
   0x5   : > { %v1625_v0 = vld [vmem:[%s2071_s1 + $0x50] sm:$0xff] (!%p138_p2)   ;;  %v1705_v1 = vmov (!%p138_p2), 0   ;;  %v1626_v2 = vld [vmem:[%s2071_s1 + $0xa0] sm:$0xff] (!%p138_p2)   ;;  %v1627_v3 = vld [vmem:[%s2071_s1 + $0x58] sm:$0xff] (!%p138_p2)   ;;  %p161_p3 = scmp.lt.s32.totalorder (!%p138_p2), %s1309_s13, 1  ;;  %vm327_vm0 = vcmask (!%p138_p2), 261120  }
   0x6   : > { %141 = sbr.rel (%p138_p2) target bundleno = 367 (0x16f), region = 32  ;;  %340 = vmatprep.subr.bf16.mxu1 (!%p138_p2), %v1705_v1  ;;  %716 = vmatprep.subr.bf16.mxu0 (!%p138_p2), %v1705_v1  ;;  %v1628_v4 = vld [vmem:[%s2071_s1 + $0xa8] sm:$0xff] (!%p138_p2)   ;;  %v1629_v5 = vld [vmem:[%s2071_s1 + $0x60] sm:$0xff] (!%p138_p2)   ;;  %v1630_v6 = vld [vmem:[%s2071_s1 + $0xb0] sm:$0xff] (!%p138_p2)   ;;  %vm1215_vm1 = vcmask (!%p138_p2), 523264   ;;  %vm1249_vm2 = vcmask (!%p138_p2), 519168  }
   0x7   : > { %341 = vmatpush1.bf16.msra.mxu1 (!%p138_p2), %v1625_v0  ;;  %717 = vmatpush1.bf16.msra.mxu0 (!%p138_p2), %v1626_v2  ;;  %v1631_v7 = vld [vmem:[%s2071_s1 + $0x68] sm:$0xff] (!%p138_p2)   ;;  %v1632_v8 = vld [vmem:[%s2071_s1 + $0xb8] sm:$0xff] (!%p138_p2)   ;;  %v1633_v9 = vld [vmem:[%s2071_s1 + $0x70] sm:$0xff] (!%p138_p2)  }
   0x8   : > { %342 = vmatprep.subr.bf16.mxu1 (!%p138_p2), %v1705_v1  ;;  %718 = vmatprep.subr.bf16.mxu0 (!%p138_p2), %v1705_v1  ;;  %v1634_v10 = vld [vmem:[%s2071_s1 + $0xc0] sm:$0xff] (!%p138_p2)   ;;  %v1635_v11 = vld [vmem:[%s2071_s1 + $0x78] sm:$0xff] (!%p138_p2)   ;;  %v1636_v12 = vld [vmem:[%s2071_s1 + $0xc8] sm:$0xff] (!%p138_p2)  }
   0x9   : > { %v1637_v18 = vld [vmem:[%s2071_s1 + $0x80] sm:$0xff] (!%p138_p2)   ;;  %v1638_v19 = vld [vmem:[%s2071_s1 + $0xd0] sm:$0xff] (!%p138_p2)   ;;  %v1639_v20 = vld [vmem:[%s2071_s1 + $0x88] sm:$0xff] (!%p138_p2)  }
   0xa   : > { %v1640_v21 = vld [vmem:[%s2071_s1 + $0xd8] sm:$0xff] (!%p138_p2)   ;;  %v1641_v22 = vld [vmem:[%s2071_s1 + $0x90] sm:$0xff] (!%p138_p2)   ;;  %v1642_v23 = vld [vmem:[%s2071_s1 + $0xe0] sm:$0xff] (!%p138_p2)  }
   0xb   : > { %343 = vmatpush1.bf16.msra.mxu1 (!%p138_p2), %v1627_v3  ;;  %719 = vmatpush1.bf16.msra.mxu0 (!%p138_p2), %v1628_v4  ;;  %v1643_v24 = vld [vmem:[%s2071_s1 + $0x98] sm:$0xff] (!%p138_p2)   ;;  %v1644_v25 = vld [vmem:[%s2071_s1 + $0xe8] sm:$0xff] (!%p138_p2)   ;;  %v1649_v29 = vld [vmem:[%s2071_s1] sm:$0xff] (!%p138_p2)  }
   0xc   : > { %344 = vmatprep.subr.bf16.mxu1 (!%p138_p2), %v1705_v1  ;;  %720 = vmatprep.subr.bf16.mxu0 (!%p138_p2), %v1705_v1  ;;  %v1650_v31 = vld [vmem:[%s2071_s1 + $0xf0] sm:$0xff] (!%p138_p2)   ;;  %v1651_v34 = vld [vmem:[%s2071_s1 + $0x8] sm:$0xff] (!%p138_p2)   ;;  %v1652_v35 = vld [vmem:[%s2071_s1 + $0xf8] sm:$0xff] (!%p138_p2)  }
   0xd   : > { %s2075_s13 = smov (!%p161_p3, %s1309_s13), 1  ;;  %v1653_v36 = vld [vmem:[%s2071_s1 + $0x10] sm:$0xff]   ;;  %v1654_v41 = vld [vmem:[%s2071_s1 + $0x100] sm:$0xff]   ;;  %v1655_v44 = vld [vmem:[%s2071_s1 + $0x18] sm:$0xff]  }
   0xe   : > { %s1615_s30 = smul.u32 96, %s2075_s13  ;;  %v1656_v45 = vld [vmem:[%s2071_s1 + $0x108] sm:$0xff]   ;;  %v1661_v48 = vld [vmem:[%s2071_s1 + $0x20] sm:$0xff]   ;;  %v1662_v51 = vld [vmem:[%s2071_s1 + $0x110] sm:$0xff]  }
   0xf   : > { %345 = vmatpush1.bf16.msra.mxu1 %v1629_v5  ;;  %721 = vmatpush1.bf16.msra.mxu0 %v1630_v6  ;;  %v1663_v54 = vld [vmem:[%s2071_s1 + $0x28] sm:$0xff]   ;;  %v1664_v55 = vld [vmem:[%s2071_s1 + $0x118] sm:$0xff]   ;;  %v1669_v58 = vld [vmem:[%s2071_s1 + $0x30] sm:$0xff]  }
  0x10   : > { %346 = vmatprep.subr.bf16.mxu1 %v1705_v1  ;;  %722 = vmatprep.subr.bf16.mxu0 %v1705_v1  ;;  %s1780_s10 = scalar_lea.vmem %s2070_s0, %s1615_s30  ;;  %v1670_v60 = vld [vmem:[%s2071_s1 + $0x120] sm:$0xff]   ;;  %v1671_v62 = vld [vmem:[%s2071_s1 + $0x38] sm:$0xff]   ;;  %v1672_v63 = vld [vmem:[%s2071_s1 + $0x128] sm:$0xff]  }
  0x11   : > { %v1791_v13 = vld [vmem:[%s1780_s10 + $0x8] sm:$0xff]  ;;  %v1318_v14 = vld [vmem:[%s1780_s10 + $0x10] sm:$0xff]  ;;  %v1390_v15 = vld [vmem:[%s1780_s10 + $0x18] sm:$0xff] }
  0x12   : > { %v1346_v16 = vcombine.high %v1791_v13, %v1318_v14  ;;  %v1796_v17 = vcombine.high %v1318_v14, %v1390_v15  ;;  %v1345_v26 = vcombine.low %v1791_v13, %v1318_v14  ;;  %v1320_v27 = vld [vmem:[%s1780_s10 + $0x20] sm:$0xff]  ;;  %v1835_v28 = vcombine.low %v1318_v14, %v1390_v15  ;;  %v1392_v30 = vld [vmem:[%s1780_s10 + $0x28] sm:$0xff]  ;;  %v1322_v38 = vld [vmem:[%s1780_s10 + $0x30] sm:$0xff] }
  0x13   : > { %347 = vmatpush1.bf16.msra.mxu1 %v1631_v7  ;;  %723 = vmatpush1.bf16.msra.mxu0 %v1632_v8  ;;  %v1846_v32 = vcombine.high %v1390_v15, %v1320_v27  ;;  %v1848_v33 = vcombine.high %v1320_v27, %v1392_v30  ;;  %v1866_v37 = vcombine.low %v1390_v15, %v1320_v27  ;;  %v1394_v40 = vld [vmem:[%s1780_s10 + $0x38] sm:$0xff]  ;;  %v1324_v47 = vld [vmem:[%s1780_s10 + $0x40] sm:$0xff]  ;;  %v1904_v50 = vld [vmem:[%s1780_s10 + $0x48] sm:$0xff] }
  0x14   : > { %348 = vmatprep.subr.bf16.mxu1 %v1705_v1  ;;  %724 = vmatprep.subr.bf16.mxu0 %v1705_v1  ;;  %v1869_v39 = vcombine.low %v1320_v27, %v1392_v30  ;;  %v1877_v42 = vcombine.high %v1392_v30, %v1322_v38  ;;  %v1880_v43 = vcombine.high %v1322_v38, %v1394_v40  ;;  %v173_v57 = vld [vmem:[%s1780_s10] sm:$0xff]  ;;  %v1678_v2 = vld [vmem:[%s2071_s1 + $0x130] sm:$0xff]   ;;  %v1679_v3 = vld [vmem:[%s2071_s1 + $0x48] sm:$0xff]  }
  0x15   : > { %1363 = vmatprep.mubr.msk.bf16.mxu1 %vm327_vm0, %v1346_v16  ;;  %1435 = vmatprep.mubr.msk.bf16.mxu0 %vm327_vm0, %v1796_v17  ;;  %v1895_v46 = vcombine.low %v1392_v30, %v1322_v38  ;;  %v1901_v49 = vcombine.low %v1322_v38, %v1394_v40  ;;  %v1911_v52 = vcombine.high %v1394_v40, %v1324_v47  ;;  %v1677_v0 = vld [vmem:[%s2071_s1 + $0x40] sm:$0xff]   ;;  %v1680_v4 = vld [vmem:[%s2071_s1 + $0x138] sm:$0xff]   ;;  %v1684_v7 = vld [vmem:[%s2071_s1 + $0x148] sm:$0xff]  }
  0x16   : > { %v1915_v53 = vcombine.high %v1324_v47, %v1904_v50  ;;  %v1930_v56 = vcombine.low %v1394_v40, %v1324_v47  ;;  %v1937_v59 = vcombine.low %v1324_v47, %v1904_v50  ;;  %v1368_v61 = vcombine.high %v173_v57, %v1791_v13  ;;  %v1683_v6 = vld [vmem:[%s2071_s1 + $0x140] sm:$0xff]   ;;  %v1685_v8 = vld [vmem:[%s2071_s1 + $0x150] sm:$0xff]   ;;  %v1692_v16 = vld [vmem:[%s2071_s1 + $0x178] sm:$0xff]  }
  0x17   : > { %349 = vmatpush1.bf16.msra.mxu1 %v1633_v9  ;;  %725 = vmatpush1.bf16.msra.mxu0 %v1634_v10  ;;  %v1367_v5 = vcombine.low %v173_v57, %v1791_v13  ;;  %v1686_v9 = vld [vmem:[%s2071_s1 + $0x158] sm:$0xff]   ;;  %v1687_v10 = vld [vmem:[%s2071_s1 + $0x160] sm:$0xff]   ;;  %v1688_v13 = vld [vmem:[%s2071_s1 + $0x168] sm:$0xff]  }
  0x18   : > { %350 = vmatprep.subr.bf16.mxu1 %v1705_v1  ;;  %726 = vmatprep.subr.bf16.mxu0 %v1705_v1  ;;  %v1691_v15 = vld [vmem:[%s2071_s1 + $0x170] sm:$0xff]  }
  0x1b   : > { %351 = vmatpush1.bf16.msra.mxu1 %v1635_v11  ;;  %727 = vmatpush1.bf16.msra.mxu0 %v1636_v12  ;;  %v1446_v11 = vld [vmem:[%s1780_s10 + $0x50] sm:$0xff] }
  0x1c   : > { %352 = vmatprep.subr.bf16.mxu1 %v1705_v1  ;;  %728 = vmatprep.subr.bf16.mxu0 %v1705_v1  ;;  %v1474_v12 = vcombine.high %v1904_v50, %v1446_v11  ;;  %v1473_v14 = vcombine.low %v1904_v50, %v1446_v11 }
  0x1f   : > { %353 = vmatpush1.bf16.msra.mxu1 %v1637_v18  ;;  %729 = vmatpush1.bf16.msra.mxu0 %v1638_v19  ;;  %v1694_v18 = vld [vmem:[%s2071_s1 + $0x188] sm:$0xff]   ;;  %v1496_v19 = vld [vmem:[%s1780_s10 + $0x58] sm:$0xff]  ;;  %s1542_s10 = sshll.u32 %s2075_s13, 4 }
  0x20   : > { %354 = vmatprep.subr.bf16.mxu1 %v1705_v1  ;;  %730 = vmatprep.subr.bf16.mxu0 %v1705_v1  ;;  %s170_s25 = scalar_lea.vmem %s2073_s3, %s1542_s10 }
  0x23   : > { %355 = vmatpush1.bf16.msra.mxu1 %v1639_v20  ;;  %731 = vmatpush1.bf16.msra.mxu0 %v1640_v21  ;;  %v1524_v20 = vcombine.high %v1446_v11, %v1496_v19  ;;  %v1523_v21 = vcombine.low %v1446_v11, %v1496_v19 }
  0x24   : > { %356 = vmatprep.subr.bf16.mxu1 %v1705_v1  ;;  %732 = vmatprep.subr.bf16.mxu0 %v1705_v1 }
  0x27   : > { %357 = vmatpush1.bf16.msra.mxu1 %v1641_v22  ;;  %733 = vmatpush1.bf16.msra.mxu0 %v1642_v23 }
  0x28   : > { %358 = vmatprep.subr.bf16.mxu1 %v1705_v1  ;;  %734 = vmatprep.subr.bf16.mxu0 %v1705_v1 }
  0x2b   : > { %359 = vmatpush1.bf16.msra.mxu1 %v1643_v24  ;;  %735 = vmatpush1.bf16.msra.mxu0 %v1644_v25 }
  0x2c   : > { %513 = vmatprep.subr.bf16.mxu1 %v1705_v1  ;;  %927 = vmatprep.subr.bf16.mxu0 %v1705_v1 }
  0x2e   : > { %373 = vmatmul.mubr.bf16.vlgmr.msra.gmra.mrb[0].mxu1 %v1345_v26  ;;  %749 = vmatmul.mubr.bf16.vlgmr.msra.gmra.mrb[0].mxu0 %v1835_v28 }
  0x2f   : > { %514 = vmatpush1.bf16.msra.mxu1 %v1649_v29  ;;  %928 = vmatpush1.bf16.msra.mxu0 %v1650_v31 }
  0x30   : > { %515 = vmatprep.subr.bf16.mxu1 %v1705_v1  ;;  %929 = vmatprep.subr.bf16.mxu0 %v1705_v1 }
  0x31   : > { %1364 = vmatprep.mubr.msk.bf16.mxu1 %vm327_vm0, %v1846_v32  ;;  %1436 = vmatprep.mubr.msk.bf16.mxu0 %vm327_vm0, %v1848_v33 }
  0x33   : > { %516 = vmatpush1.bf16.msra.mxu1 %v1651_v34  ;;  %930 = vmatpush1.bf16.msra.mxu0 %v1652_v35 }
  0x34   : > { %517 = vmatprep.subr.bf16.mxu1 %v1705_v1  ;;  %931 = vmatprep.subr.bf16.mxu0 %v1705_v1 }
  0x36   : > { %381 = vmatmul.mubr.bf16.gmra.mrb[4].mxu1 %v1866_v37  ;;  %757 = vmatmul.mubr.bf16.gmra.mrb[4].mxu0 %v1869_v39 }
  0x37   : > { %518 = vmatpush1.bf16.msra.mxu1 %v1653_v36  ;;  %932 = vmatpush1.bf16.msra.mxu0 %v1654_v41 }
  0x38   : > { %519 = vmatprep.subr.bf16.mxu1 %v1705_v1  ;;  %933 = vmatprep.subr.bf16.mxu0 %v1705_v1 }
  0x39   : > { %1365 = vmatprep.mubr.msk.bf16.mxu1 %vm327_vm0, %v1877_v42  ;;  %1437 = vmatprep.mubr.msk.bf16.mxu0 %vm327_vm0, %v1880_v43 }
  0x3b   : > { %520 = vmatpush1.bf16.msra.mxu1 %v1655_v44  ;;  %934 = vmatpush1.bf16.msra.mxu0 %v1656_v45 }
  0x3c   : > { %521 = vmatprep.subr.bf16.mxu1 %v1705_v1  ;;  %935 = vmatprep.subr.bf16.mxu0 %v1705_v1 }
  0x3e   : > { %389 = vmatmul.mubr.bf16.gmra.mrb[8].mxu1 %v1895_v46  ;;  %765 = vmatmul.mubr.bf16.gmra.mrb[8].mxu0 %v1901_v49 }
  0x3f   : > { %522 = vmatpush1.bf16.msra.mxu1 %v1661_v48  ;;  %936 = vmatpush1.bf16.msra.mxu0 %v1662_v51 }
  0x40   : > { %523 = vmatprep.subr.bf16.mxu1 %v1705_v1  ;;  %937 = vmatprep.subr.bf16.mxu0 %v1705_v1 }
  0x41   : > { %1366 = vmatprep.mubr.msk.bf16.mxu1 %vm327_vm0, %v1911_v52  ;;  %1438 = vmatprep.mubr.msk.bf16.mxu0 %vm327_vm0, %v1915_v53 }
  0x43   : > { %524 = vmatpush1.bf16.msra.mxu1 %v1663_v54  ;;  %938 = vmatpush1.bf16.msra.mxu0 %v1664_v55 }
  0x44   : > { %525 = vmatprep.subr.bf16.mxu1 %v1705_v1  ;;  %939 = vmatprep.subr.bf16.mxu0 %v1705_v1 }
  0x46   : > { %397 = vmatmul.mubr.bf16.gmra.mrb[12].mxu1 %v1930_v56  ;;  %773 = vmatmul.mubr.bf16.gmra.mrb[12].mxu0 %v1937_v59 }
  0x47   : > { %526 = vmatpush1.bf16.msra.mxu1 %v1669_v58  ;;  %940 = vmatpush1.bf16.msra.mxu0 %v1670_v60 }
  0x48   : > { %527 = vmatprep.subr.bf16.mxu1 %v1705_v1  ;;  %941 = vmatprep.subr.bf16.mxu0 %v1705_v1 }
  0x49   : > { %1385 = vmatprep.mubr.msk.bf16.mxu1 %vm327_vm0, %v1368_v61  ;;  %1485 = vmatprep.mubr.msk.bf16.mxu0 %vm327_vm0, %v1846_v32 }
  0x4b   : > { %528 = vmatpush1.bf16.msra.mxu1 %v1671_v62  ;;  %942 = vmatpush1.bf16.msra.mxu0 %v1672_v63 }
  0x4c   : > { %529 = vmatprep.subr.bf16.mxu1 %v1705_v1  ;;  %943 = vmatprep.subr.bf16.mxu0 %v1705_v1 }
  0x4f   : > { %530 = vmatpush1.bf16.msra.mxu1 %v1677_v0  ;;  %944 = vmatpush1.bf16.msra.mxu0 %v1678_v2 }
  0x50   : > { %531 = vmatprep.subr.bf16.mxu1 %v1705_v1  ;;  %945 = vmatprep.subr.bf16.mxu0 %v1705_v1 }
  0x53   : > { %532 = vmatpush1.bf16.msra.mxu1 %v1679_v3  ;;  %946 = vmatpush1.bf16.msra.mxu0 %v1680_v4 }
  0x54   : > { %1543 = vmatprep.subr.bf16.mxu1 %v1705_v1  ;;  %1138 = vmatprep.subr.bf16.mxu0 %v1705_v1 }
  0x56   : > { %546 = vmatmul.mubr.bf16.vlgmr.msra.gmra.mrb[0].mxu1 %v1367_v5  ;;  %960 = vmatmul.mubr.bf16.vlgmr.msra.gmra.mrb[0].mxu0 %v1866_v37 }
  0x57   : > { %1553 = vmatpush1.bf16.msra.mxu1 %v1683_v6  ;;  %1139 = vmatpush1.bf16.msra.mxu0 %v1683_v6 }
  0x58   : > { %1544 = vmatprep.subr.bf16.mxu1 %v1705_v1  ;;  %1140 = vmatprep.subr.bf16.mxu0 %v1705_v1 }
  0x59   : > { %1386 = vmatprep.mubr.msk.bf16.mxu1 %vm327_vm0, %v1796_v17  ;;  %1486 = vmatprep.mubr.msk.bf16.mxu0 %vm327_vm0, %v1877_v42  ;;  %v1693_v17 = vld [vmem:[%s2071_s1 + $0x180] sm:$0xff]  }
  0x5b   : > { %1554 = vmatpush1.bf16.msra.mxu1 %v1684_v7  ;;  %1141 = vmatpush1.bf16.msra.mxu0 %v1684_v7 }
  0x5c   : > { %1545 = vmatprep.subr.bf16.mxu1 %v1705_v1  ;;  %1142 = vmatprep.subr.bf16.mxu0 %v1705_v1 }
  0x5e   : > { %554 = vmatmul.mubr.bf16.gmra.mrb[4].mxu1 %v1835_v28  ;;  %968 = vmatmul.mubr.bf16.gmra.mrb[4].mxu0 %v1895_v46 }
  0x5f   : > { %1555 = vmatpush1.bf16.msra.mxu1 %v1685_v8  ;;  %1143 = vmatpush1.bf16.msra.mxu0 %v1685_v8 }
  0x60   : > { %1546 = vmatprep.subr.bf16.mxu1 %v1705_v1  ;;  %1144 = vmatprep.subr.bf16.mxu0 %v1705_v1 }
  0x61   : > { %1387 = vmatprep.mubr.msk.bf16.mxu1 %vm327_vm0, %v1848_v33  ;;  %1487 = vmatprep.mubr.msk.bf16.mxu0 %vm327_vm0, %v1911_v52 }
  0x63   : > { %1556 = vmatpush1.bf16.msra.mxu1 %v1686_v9  ;;  %1145 = vmatpush1.bf16.msra.mxu0 %v1686_v9 }
  0x64   : > { %1547 = vmatprep.subr.bf16.mxu1 %v1705_v1  ;;  %1146 = vmatprep.subr.bf16.mxu0 %v1705_v1 }
  0x66   : > { %562 = vmatmul.mubr.bf16.gmra.mrb[8].mxu1 %v1869_v39  ;;  %976 = vmatmul.mubr.bf16.gmra.mrb[8].mxu0 %v1930_v56 }
  0x67   : > { %1557 = vmatpush1.bf16.msra.mxu1 %v1687_v10  ;;  %1147 = vmatpush1.bf16.msra.mxu0 %v1687_v10 }
  0x68   : > { %1548 = vmatprep.subr.bf16.mxu1 %v1705_v1  ;;  %1148 = vmatprep.subr.bf16.mxu0 %v1705_v1 }
  0x69   : > { %1388 = vmatprep.mubr.msk.bf16.mxu1 %vm327_vm0, %v1880_v43  ;;  %1488 = vmatprep.mubr.msk.bf16.mxu0 %vm327_vm0, %v1474_v12  ;;  %v1539_v12 = vld [vmem:[%s2072_s2] ss:$0 sm:$0xff] }
  0x6b   : > { %1558 = vmatpush1.bf16.msra.mxu1 %v1688_v13  ;;  %1149 = vmatpush1.bf16.msra.mxu0 %v1688_v13 }
  0x6c   : > { %1549 = vmatprep.subr.bf16.mxu1 %v1705_v1  ;;  %1150 = vmatprep.subr.bf16.mxu0 %v1705_v1 }
  0x6e   : > { %570 = vmatmul.mubr.bf16.gmra.mrb[12].mxu1 %v1901_v49  ;;  %984 = vmatmul.mubr.bf16.gmra.mrb[12].mxu0 %v1473_v14 }
  0x6f   : > { %1559 = vmatpush1.bf16.msra.mxu1 %v1691_v15  ;;  %1151 = vmatpush1.bf16.msra.mxu0 %v1691_v15 }
  0x70   : > { %1550 = vmatprep.subr.bf16.mxu1 %v1705_v1  ;;  %1152 = vmatprep.subr.bf16.mxu0 %v1705_v1 }
  0x71   : > { %1535 = vmatprep.mubr.msk.bf16.mxu0 %vm327_vm0, %v1848_v33  ;;  %1537 = vmatprep.mubr.msk.bf16.mxu1 %vm327_vm0, %v1915_v53 }
  0x73   : > { %1560 = vmatpush1.bf16.msra.mxu1 %v1692_v16  ;;  %1153 = vmatpush1.bf16.msra.mxu0 %v1692_v16 }
  0x74   : > { %1551 = vmatprep.subr.bf16.mxu1 %v1705_v1  ;;  %1154 = vmatprep.subr.bf16.mxu0 %v1705_v1 }
  0x77   : > { %1561 = vmatpush1.bf16.msra.mxu1 %v1693_v17  ;;  %1155 = vmatpush1.bf16.msra.mxu0 %v1693_v17 }
  0x78   : > { %1552 = vmatprep.subr.bf16.mxu1 %v1705_v1  ;;  %1156 = vmatprep.subr.bf16.mxu0 %v1705_v1 }
  0x7b   : > { %1562 = vmatpush1.bf16.msra.mxu1 %v1694_v18  ;;  %1157 = vmatpush1.bf16.msra.mxu0 %v1694_v18 }
  0x7e   : > { %1187 = vmatmul.mubr.bf16.vlgmr.msra.gmra.mrb[16].mxu1 %v1937_v59  ;;  %1171 = vmatmul.mubr.bf16.vlgmr.msra.gmra.mrb[0].mxu0 %v1869_v39 }
  0x7f   : > { %1538 = vmatprep.mubr.msk.bf16.mxu1 %vm327_vm0, %v1524_v20  ;;  %1536 = vmatprep.mubr.msk.bf16.mxu0 %vm327_vm0, %v1880_v43 }
  0x86   : > { %1195 = vmatmul.mubr.bf16.gmra.mrb[20].mxu1 %v1523_v21  ;;  %1179 = vmatmul.mubr.bf16.gmra.mrb[4].mxu0 %v1901_v49 }
 0x129   : > { %v547_v22 = vpop.f32.mrb[0].mxu1 }
 0x12a   : > { %v549_v23 = vpop.f32.mrb[1].mxu1 }
 0x12b   : > { %v550_v24 = vpop.f32.mrb[2].mxu1 }
 0x12c   : > { %v552_v1 = vpop.f32.mrb[3].mxu1 }
 0x131   : > { %v555_v25 = vpop.f32.mrb[4].mxu1 }
 0x132   : > { %v557_v26 = vpop.f32.mrb[5].mxu1 }
 0x133   : > { %v558_v27 = vpop.f32.mrb[6].mxu1 }
 0x134   : > { %v560_v28 = vpop.f32.mrb[7].mxu1 }
 0x139   : > { %v563_v29 = vpop.f32.mrb[8].mxu1  ;;  %v977_v30 = vpop.f32.mrb[8].mxu0 }
 0x13a   : > { %v565_v31 = vpop.f32.mrb[9].mxu1  ;;  %v1567_v32 = vadd.f32 %v977_v30, %v563_v29  ;;  %v979_v33 = vpop.f32.mrb[9].mxu0 }
 0x13b   : > { %v566_v34 = vpop.f32.mrb[10].mxu1  ;;  %v980_v35 = vpop.f32.mrb[10].mxu0 }
 0x13c   : > { %v568_v36 = vpop.f32.mrb[11].mxu1  ;;  %v1569_v37 = vadd.f32 %v980_v35, %v566_v34  ;;  %v982_v38 = vpop.f32.mrb[11].mxu0 }
 0x141   : > { %v571_v39 = vpop.f32.mrb[12].mxu1  ;;  %v985_v40 = vpop.f32.mrb[12].mxu0 }
 0x142   : > { %v573_v41 = vpop.f32.mrb[13].mxu1  ;;  %v1571_v42 = vadd.f32 %v985_v40, %v571_v39  ;;  %v987_v43 = vpop.f32.mrb[13].mxu0 }
 0x143   : > { %v574_v44 = vpop.f32.mrb[14].mxu1  ;;  %v988_v45 = vpop.f32.mrb[14].mxu0 }
 0x144   : > { %v576_v46 = vpop.f32.mrb[15].mxu1  ;;  %v1573_v47 = vadd.f32 %v988_v45, %v574_v44  ;;  %v990_v48 = vpop.f32.mrb[15].mxu0 }
 0x151   : > { %v1188_v49 = vpop.f32.mrb[16].mxu1  ;;  %v1172_v50 = vpop.f32.mrb[0].mxu0 }
 0x152   : > { %v1568_v51 = vadd.f32 %v1567_v32, %v1188_v49  ;;  %v1190_v52 = vpop.f32.mrb[17].mxu1  ;;  %v1563_v53 = vadd.f32 %v1172_v50, %v547_v22  ;;  %v1174_v54 = vpop.f32.mrb[1].mxu0 }
 0x153   : > { %v1191_v55 = vpop.f32.mrb[18].mxu1  ;;  %v1175_v56 = vpop.f32.mrb[2].mxu0 }
 0x154   : > { %v1570_v57 = vadd.f32 %v1569_v37, %v1191_v55  ;;  %v1193_v58 = vpop.f32.mrb[19].mxu1  ;;  %v1564_v59 = vadd.f32 %v1175_v56, %v550_v24  ;;  %v1177_v60 = vpop.f32.mrb[3].mxu0 }
 0x156   : > { %v1213_v61 = vmax.f32 %v1568_v51, %v1570_v57  ;;  %v1211_v62 = vmax.f32 %v1563_v53, %v1564_v59 }
 0x158   : > { %1218 = vst.msk [vmem:[#allocation2 + $0x10] sm:$0xff] %vm1215_vm1, %v1213_v61  ;;  %1216 = vst.msk [vmem:[#allocation2] sm:$0xff] %vm1215_vm1, %v1211_v62 }
 0x159   : > { %v1196_v63 = vpop.f32.mrb[20].mxu1  ;;  %v1180_v0 = vpop.f32.mrb[4].mxu0 }
 0x15a   : > { %v1572_v2 = vadd.f32 %v1571_v42, %v1196_v63  ;;  %v1198_v3 = vpop.f32.mrb[21].mxu1  ;;  %v1565_v4 = vadd.f32 %v1180_v0, %v555_v25  ;;  %v1182_v5 = vpop.f32.mrb[5].mxu0 }
 0x15b   : > { %v1199_v6 = vpop.f32.mrb[22].mxu1  ;;  %v1183_v7 = vpop.f32.mrb[6].mxu0 }
 0x15c   : > { %v1574_v8 = vadd.f32 %v1573_v47, %v1199_v6  ;;  %v1201_v9 = vpop.f32.mrb[23].mxu1  ;;  %v1566_v10 = vadd.f32 %v1183_v7, %v558_v27  ;;  %v1185_v11 = vpop.f32.mrb[7].mxu0 }
 0x15e   : > { %v1214_v13 = vmax.f32 %v1572_v2, %v1574_v8  ;;  %v1212_v16 = vmax.f32 %v1565_v4, %v1566_v10 }
 0x15f   : > { %v1224_v14 = vld [vmem:[#allocation2 + $0x10] ss:$2 sm:$0xf]  ;;  %v1232_v15 = vld [vmem:[#allocation2 + $0x11] ss:$2 sm:$0xf] }
 0x160   : > { %v1220_v17 = vld [vmem:[#allocation2] ss:$2 sm:$0xf]  ;;  %v1228_v18 = vld [vmem:[#allocation2 + $0x1] ss:$2 sm:$0xf]  ;;  %v1237_v19 = vmax.f32 %v1224_v14, %v1232_v15 }
 0x161   : > { %1219 = vst.msk [vmem:[#allocation2 + $0x18] sm:$0xff] %vm1215_vm1, %v1214_v13  ;;  %v1235_v20 = vmax.f32 %v1220_v17, %v1228_v18  ;;  %1217 = vst.msk [vmem:[#allocation2 + $0x8] sm:$0xff] %vm1215_vm1, %v1212_v16 }
 0x162   : > { %v1247_v21 = vadd.f32 %v1539_v12, %v1237_v19 }
 0x163   : > { %v1245_v22 = vadd.f32 %v1539_v12, %v1235_v20 }
 0x164   : > { %1252 = vst.msk [vmem:[%s170_s25 + $0x8] sm:$0xf] %vm1249_vm2, %v1247_v21 }
 0x165   : > { %1250 = vst.msk [vmem:[%s170_s25] sm:$0xf] %vm1249_vm2, %v1245_v22 }
 0x168   : > { %v1226_v23 = vld [vmem:[#allocation2 + $0x18] ss:$2 sm:$0xf]  ;;  %v1234_v24 = vld [vmem:[#allocation2 + $0x19] ss:$2 sm:$0xf] }
 0x169   : > { %v1222_v1 = vld [vmem:[#allocation2 + $0x8] ss:$2 sm:$0xf]  ;;  %v1230_v25 = vld [vmem:[#allocation2 + $0x9] ss:$2 sm:$0xf]  ;;  %v1238_v26 = vmax.f32 %v1226_v23, %v1234_v24 }
 0x16a   : > { %v1236_v27 = vmax.f32 %v1222_v1, %v1230_v25 }
 0x16b   : > { %v1248_v28 = vadd.f32 %v1539_v12, %v1238_v26 }
 0x16c   : > { %v1246_v29 = vadd.f32 %v1539_v12, %v1236_v27 }
 0x16d   : > { %1253 = vst.msk [vmem:[%s170_s25 + $0xc] sm:$0xf] %vm1249_vm2, %v1248_v28 }
 0x16e   : > { %1251 = vst.msk [vmem:[%s170_s25 + $0x4] sm:$0xf] %vm1249_vm2, %v1246_v29 }
 0x16f PF: > { %s13_s12 = sadd.s32 1, %s1703_s12  }
 0x170   : > { %p10_p4 = scmp.ge.s32.totalorder %s13_s12, 4  }
 0x172   :  { %12 = sbr.rel (!%p10_p4) target bundleno = 1 (0x1), region = 77 }

// kernel: model_forward.7
= control target key start
LH: loop header
LB: loop body
LE: loop exit
PB: predicated region body
PF: predicated region fallthrough
CT: control target
= control target key end

     0   :  { %vm1053_vm0 = vmmov 0   ;;  %vm756_vm1 = vcmask 523264   ;;  %vm800_vm2 = vcmask 80896   ;;  %s1321_s1 = inlined_call_operand.vmem [shape: bf16[1024,64], index: 1, kind: input, shape index: {}]   ;;  %s1322_s0 = inlined_call_operand.vmem [shape: f32[8,1024], index: 0, kind: input, shape index: {}]   ;;  %s1323_s3 = inlined_call_operand.vmem [shape: bf16[64,10], index: 3, kind: input, shape index: {}]   ;;  %s1324_s2 = inlined_call_operand.vmem [shape: f32[1,64], index: 2, kind: input, shape index: {}]   ;;  %s1325_s4 = inlined_call_operand.vmem [shape: f32[1,10], index: 4, kind: input, shape index: {}]   ;;  %s1326_s5 = inlined_call_operand.vmem [shape: f32[8,10], index: 5, kind: output, shape index: {}]  }
   0x1   :  { %v984_v0 = vld [vmem:[%s1321_s1 + $0x40] sm:$0xff]   ;;  %v988_v4 = vld [vmem:[%s1321_s1 + $0x48] sm:$0xff]   ;;  %v992_v8 = vld [vmem:[%s1321_s1 + $0x50] sm:$0xff]  }
   0x2   :  { %v985_v1 = vld [vmem:[%s1321_s1 + $0xc0] sm:$0xff]   ;;  %877 = vmatprep.subr.bf16.mxu0 %v984_v0  ;;  %v989_v5 = vld [vmem:[%s1321_s1 + $0xc8] sm:$0xff]   ;;  %v993_v9 = vld [vmem:[%s1321_s1 + $0xd0] sm:$0xff]  }
   0x3   :  { %v986_v2 = vld [vmem:[%s1321_s1] sm:$0xff]   ;;  %899 = vmatprep.subr.bf16.mxu1 %v985_v1  ;;  %v990_v6 = vld [vmem:[%s1321_s1 + $0x8] sm:$0xff]   ;;  %v994_v10 = vld [vmem:[%s1321_s1 + $0x10] sm:$0xff]  }
   0x4   :  { %v987_v3 = vld [vmem:[%s1321_s1 + $0x80] sm:$0xff]   ;;  %878 = vmatpush3.bf16.msra.mxu0 %v986_v2  ;;  %v991_v7 = vld [vmem:[%s1321_s1 + $0x88] sm:$0xff]   ;;  %v995_v11 = vld [vmem:[%s1321_s1 + $0x90] sm:$0xff]  }
   0x5   :  { %900 = vmatpush3.bf16.msra.mxu1 %v987_v3  ;;  %879 = vmatprep.subr.bf16.mxu0 %v988_v4  ;;  %v996_v12 = vld [vmem:[%s1321_s1 + $0x58] sm:$0xff]   ;;  %v1000_v16 = vld [vmem:[%s1321_s1 + $0x60] sm:$0xff]   ;;  %v1004_v20 = vld [vmem:[%s1321_s1 + $0x68] sm:$0xff]  }
   0x6   :  { %901 = vmatprep.subr.bf16.mxu1 %v989_v5  ;;  %v997_v13 = vld [vmem:[%s1321_s1 + $0xd8] sm:$0xff]   ;;  %v1001_v17 = vld [vmem:[%s1321_s1 + $0xe0] sm:$0xff]   ;;  %v1005_v21 = vld [vmem:[%s1321_s1 + $0xe8] sm:$0xff]  }
   0x7   :  { %v998_v14 = vld [vmem:[%s1321_s1 + $0x18] sm:$0xff]   ;;  %v1002_v18 = vld [vmem:[%s1321_s1 + $0x20] sm:$0xff]   ;;  %v1006_v22 = vld [vmem:[%s1321_s1 + $0x28] sm:$0xff]  }
   0x8   :  { %880 = vmatpush3.bf16.msra.mxu0 %v990_v6  ;;  %v999_v15 = vld [vmem:[%s1321_s1 + $0x98] sm:$0xff]   ;;  %v1003_v19 = vld [vmem:[%s1321_s1 + $0xa0] sm:$0xff]   ;;  %v1007_v23 = vld [vmem:[%s1321_s1 + $0xa8] sm:$0xff]  }
   0x9   :  { %902 = vmatpush3.bf16.msra.mxu1 %v991_v7  ;;  %881 = vmatprep.subr.bf16.mxu0 %v992_v8  ;;  %v1008_v24 = vld [vmem:[%s1321_s1 + $0x70] sm:$0xff]   ;;  %v1012_v28 = vld [vmem:[%s1321_s1 + $0x78] sm:$0xff]   ;;  %v22_v32 = vld [vmem:[%s1322_s0 + $0x8] sm:$0xff] }
   0xa   :  { %903 = vmatprep.subr.bf16.mxu1 %v993_v9  ;;  %v1009_v25 = vld [vmem:[%s1321_s1 + $0xf0] sm:$0xff]   ;;  %v1013_v29 = vld [vmem:[%s1321_s1 + $0xf8] sm:$0xff]   ;;  %v21_v34 = vld [vmem:[%s1322_s0] sm:$0xff]  ;;  %v30_v35 = vpack.c.bf16 %v22_v32, %v22_v32 }
   0xb   :  { %v1010_v26 = vld [vmem:[%s1321_s1 + $0x30] sm:$0xff]   ;;  %v1014_v30 = vld [vmem:[%s1321_s1 + $0x38] sm:$0xff]   ;;  %v29_v37 = vpack.c.bf16 %v21_v34, %v21_v34  ;;  %v1016_v40 = vld [vmem:[%s1321_s1 + $0x140] sm:$0xff]  }
   0xc   :  { %882 = vmatpush3.bf16.msra.mxu0 %v994_v10  ;;  %v1011_v27 = vld [vmem:[%s1321_s1 + $0xb0] sm:$0xff]   ;;  %v1015_v31 = vld [vmem:[%s1321_s1 + $0xb8] sm:$0xff]   ;;  %588 = vmatprep.mubr.bf16.mxu0 %v30_v35  ;;  %v1017_v41 = vld [vmem:[%s1321_s1 + $0x1c0] sm:$0xff]  }
   0xd   :  { %904 = vmatpush3.bf16.msra.mxu1 %v995_v11  ;;  %883 = vmatprep.subr.bf16.mxu0 %v996_v12  ;;  %v24_v33 = vld [vmem:[%s1322_s0 + $0x18] sm:$0xff]  ;;  %v23_v38 = vld [vmem:[%s1322_s0 + $0x10] sm:$0xff]  ;;  %v1018_v42 = vld [vmem:[%s1321_s1 + $0x100] sm:$0xff]  }
   0xe   :  { %905 = vmatprep.subr.bf16.mxu1 %v997_v13  ;;  %v32_v36 = vpack.c.bf16 %v24_v33, %v24_v33  ;;  %v31_v39 = vpack.c.bf16 %v23_v38, %v23_v38  ;;  %v1019_v43 = vld [vmem:[%s1321_s1 + $0x180] sm:$0xff]   ;;  %v1020_v44 = vld [vmem:[%s1321_s1 + $0x148] sm:$0xff]   ;;  %v1024_v48 = vld [vmem:[%s1321_s1 + $0x150] sm:$0xff]  }
   0xf   :  { %v1021_v45 = vld [vmem:[%s1321_s1 + $0x1c8] sm:$0xff]   ;;  %v1025_v49 = vld [vmem:[%s1321_s1 + $0x1d0] sm:$0xff]   ;;  %v1028_v52 = vld [vmem:[%s1321_s1 + $0x158] sm:$0xff]  }
  0x10   :  { %884 = vmatpush3.bf16.msra.mxu0 %v998_v14  ;;  %628 = vmatprep.mubr.bf16.mxu1 %v32_v36  ;;  %v1022_v46 = vld [vmem:[%s1321_s1 + $0x108] sm:$0xff]   ;;  %v1026_v50 = vld [vmem:[%s1321_s1 + $0x110] sm:$0xff]   ;;  %v1029_v53 = vld [vmem:[%s1321_s1 + $0x1d8] sm:$0xff]  }
  0x11   :  { %906 = vmatpush3.bf16.msra.mxu1 %v999_v15  ;;  %885 = vmatprep.subr.bf16.mxu0 %v1000_v16  ;;  %v1023_v47 = vld [vmem:[%s1321_s1 + $0x188] sm:$0xff]   ;;  %v1027_v51 = vld [vmem:[%s1321_s1 + $0x190] sm:$0xff]   ;;  %v1030_v54 = vld [vmem:[%s1321_s1 + $0x118] sm:$0xff]   ;;  %v1052_v16 = vmov 0.0  }
  0x12   :  { %907 = vmatprep.subr.bf16.mxu1 %v1001_v17  ;;  %v1031_v55 = vld [vmem:[%s1321_s1 + $0x198] sm:$0xff]   ;;  %v1032_v56 = vld [vmem:[%s1321_s1 + $0x160] sm:$0xff]   ;;  %v1036_v60 = vld [vmem:[%s1321_s1 + $0x168] sm:$0xff]  }
  0x13   :  { %v1033_v57 = vld [vmem:[%s1321_s1 + $0x1e0] sm:$0xff]   ;;  %v1037_v61 = vld [vmem:[%s1321_s1 + $0x1e8] sm:$0xff]   ;;  %v1040_v0 = vld [vmem:[%s1321_s1 + $0x170] sm:$0xff]  }
  0x14   :  { %886 = vmatpush3.bf16.msra.mxu0 %v1002_v18  ;;  %v1034_v58 = vld [vmem:[%s1321_s1 + $0x120] sm:$0xff]   ;;  %v1038_v62 = vld [vmem:[%s1321_s1 + $0x128] sm:$0xff]   ;;  %v1041_v1 = vld [vmem:[%s1321_s1 + $0x1f0] sm:$0xff]  }
  0x15   :  { %908 = vmatpush3.bf16.msra.mxu1 %v1003_v19  ;;  %887 = vmatprep.subr.bf16.mxu0 %v1004_v20  ;;  %v1035_v59 = vld [vmem:[%s1321_s1 + $0x1a0] sm:$0xff]   ;;  %v1039_v63 = vld [vmem:[%s1321_s1 + $0x1a8] sm:$0xff]   ;;  %v1042_v2 = vld [vmem:[%s1321_s1 + $0x130] sm:$0xff]  }
  0x16   :  { %909 = vmatprep.subr.bf16.mxu1 %v1005_v21  ;;  %v1043_v3 = vld [vmem:[%s1321_s1 + $0x1b0] sm:$0xff]   ;;  %v1044_v4 = vld [vmem:[%s1321_s1 + $0x178] sm:$0xff]   ;;  %v26_v8 = vld [vmem:[%s1322_s0 + $0x28] sm:$0xff] }
  0x17   :  { %v1045_v5 = vld [vmem:[%s1321_s1 + $0x1f8] sm:$0xff]   ;;  %v34_v10 = vpack.c.bf16 %v26_v8, %v26_v8  ;;  %v25_v12 = vld [vmem:[%s1322_s0 + $0x20] sm:$0xff]  ;;  %v27_v13 = vld [vmem:[%s1322_s0 + $0x30] sm:$0xff] }
  0x18   :  { %888 = vmatpush3.bf16.msra.mxu0 %v1006_v22  ;;  %v1046_v6 = vld [vmem:[%s1321_s1 + $0x138] sm:$0xff]   ;;  %v33_v14 = vpack.c.bf16 %v25_v12, %v25_v12  ;;  %v35_v15 = vpack.c.bf16 %v27_v13, %v27_v13  ;;  %v1048_v17 = vld [vmem:[%s1323_s3] sm:$0xff]   ;;  %v1049_v18 = vld [vmem:[%s1323_s3 + $0x8] sm:$0xff]  }
  0x19   :  { %910 = vmatpush3.bf16.msra.mxu1 %v1007_v23  ;;  %889 = vmatprep.subr.bf16.mxu0 %v1008_v24  ;;  %v1047_v7 = vld [vmem:[%s1321_s1 + $0x1b8] sm:$0xff]   ;;  %v1050_v19 = vld [vmem:[%s1323_s3 + $0x10] sm:$0xff]   ;;  %v806_v23 = vld [vmem:[%s1324_s2] ss:$0 sm:$0xff] }
  0x1a   :  { %911 = vmatprep.subr.bf16.mxu1 %v1009_v25  ;;  %v28_v9 = vld [vmem:[%s1322_s0 + $0x38] sm:$0xff] }
  0x1b   :  { %v36_v11 = vpack.c.bf16 %v28_v9, %v28_v9  ;;  %v1051_v20 = vld [vmem:[%s1323_s3 + $0x18] sm:$0xff]  }
  0x1c   :  { %890 = vmatpush3.bf16.msra.mxu0 %v1010_v26 }
  0x1d   :  { %912 = vmatpush3.bf16.msra.mxu1 %v1011_v27  ;;  %891 = vmatprep.subr.bf16.mxu0 %v1012_v28 }
  0x1e   :  { %913 = vmatprep.subr.bf16.mxu1 %v1013_v29 }
  0x20   :  { %892 = vmatpush3.bf16.msra.mxu0 %v1014_v30 }
  0x21   :  { %914 = vmatpush3.bf16.msra.mxu1 %v1015_v31  ;;  %921 = vmatprep.subr.bf16.mxu0 %v1016_v40 }
  0x22   :  { %943 = vmatprep.subr.bf16.mxu1 %v1017_v41 }
  0x23   :  { %589 = vmatmul.mubr.bf16.vlgmr.msra.gmra.mrb[0].mxu0 %v29_v37 }
  0x24   :  { %629 = vmatmul.mubr.bf16.vlgmr.msra.gmra.mrb[0].mxu1 %v31_v39  ;;  %922 = vmatpush3.bf16.msra.mxu0 %v1018_v42 }
  0x25   :  { %944 = vmatpush3.bf16.msra.mxu1 %v1019_v43  ;;  %923 = vmatprep.subr.bf16.mxu0 %v1020_v44 }
  0x26   :  { %945 = vmatprep.subr.bf16.mxu1 %v1021_v45  ;;  %668 = vmatprep.mubr.bf16.mxu0 %v34_v10 }
  0x27   :  { %708 = vmatprep.mubr.bf16.mxu1 %v36_v11 }
  0x28   :  { %924 = vmatpush3.bf16.msra.mxu0 %v1022_v46 }
  0x29   :  { %946 = vmatpush3.bf16.msra.mxu1 %v1023_v47  ;;  %925 = vmatprep.subr.bf16.mxu0 %v1024_v48  ;;  %v871_v47 = vld [vmem:[%s1325_s4] ss:$0 sm:$0xff] }
  0x2a   :  { %947 = vmatprep.subr.bf16.mxu1 %v1025_v49 }
  0x2c   :  { %926 = vmatpush3.bf16.msra.mxu0 %v1026_v50 }
  0x2d   :  { %948 = vmatpush3.bf16.msra.mxu1 %v1027_v51  ;;  %927 = vmatprep.subr.bf16.mxu0 %v1028_v52 }
  0x2e   :  { %949 = vmatprep.subr.bf16.mxu1 %v1029_v53 }
  0x30   :  { %928 = vmatpush3.bf16.msra.mxu0 %v1030_v54 }
  0x31   :  { %950 = vmatpush3.bf16.msra.mxu1 %v1031_v55  ;;  %929 = vmatprep.subr.bf16.mxu0 %v1032_v56 }
  0x32   :  { %951 = vmatprep.subr.bf16.mxu1 %v1033_v57 }
  0x34   :  { %930 = vmatpush3.bf16.msra.mxu0 %v1034_v58 }
  0x35   :  { %952 = vmatpush3.bf16.msra.mxu1 %v1035_v59  ;;  %931 = vmatprep.subr.bf16.mxu0 %v1036_v60 }
  0x36   :  { %953 = vmatprep.subr.bf16.mxu1 %v1037_v61 }
  0x38   :  { %932 = vmatpush3.bf16.msra.mxu0 %v1038_v62 }
  0x39   :  { %954 = vmatpush3.bf16.msra.mxu1 %v1039_v63  ;;  %933 = vmatprep.subr.bf16.mxu0 %v1040_v0 }
  0x3a   :  { %955 = vmatprep.subr.bf16.mxu1 %v1041_v1 }
  0x3c   :  { %934 = vmatpush3.bf16.msra.mxu0 %v1042_v2 }
  0x3d   :  { %956 = vmatpush3.bf16.msra.mxu1 %v1043_v3  ;;  %935 = vmatprep.subr.bf16.mxu0 %v1044_v4 }
  0x3e   :  { %957 = vmatprep.subr.bf16.mxu1 %v1045_v5 }
  0x40   :  { %936 = vmatpush3.bf16.msra.mxu0 %v1046_v6 }
  0x41   :  { %958 = vmatpush3.bf16.msra.mxu1 %v1047_v7  ;;  %970 = vmatprep.subr.bf16.mxu0 %v1052_v16 }
  0x43   :  { %669 = vmatmul.mubr.bf16.vlgmr.msra.gmra.mrb[4].mxu0 %v33_v14 }
  0x44   :  { %709 = vmatmul.mubr.bf16.vlgmr.msra.gmra.mrb[4].mxu1 %v35_v15  ;;  %971 = vmatpush3.bf16.msra.mxu0 %v1048_v17 }
  0x45   :  { %972 = vmatprep.subr.bf16.mxu0 %v1052_v16  ;;  %978 = vmatprep.mubr.msk.bf16.mxu0 %vm1053_vm0, %v1052_v16 }
  0x48   :  { %973 = vmatpush3.bf16.msra.mxu0 %v1049_v18 }
  0x49   :  { %974 = vmatprep.subr.bf16.mxu0 %v1052_v16 }
  0x4c   :  { %975 = vmatpush3.bf16.msra.mxu0 %v1050_v19 }
  0x4d   :  { %976 = vmatprep.subr.bf16.mxu0 %v1052_v16 }
  0x50   :  { %977 = vmatpush3.bf16.msra.mxu0 %v1051_v20 }
  0xf6   :  { %v893_v21 = vpop.f32.mrb[0].mxu0 }
  0xf7   :  { %v915_v22 = vpop.f32.mrb[0].mxu1  ;;  %v894_v24 = vpop.f32.mrb[1].mxu0 }
  0xf8   :  { %v916_v25 = vpop.f32.mrb[1].mxu1  ;;  %v895_v26 = vadd.f32 %v894_v24, %v893_v21  ;;  %v896_v28 = vpop.f32.mrb[2].mxu0 }
  0xf9   :  { %v917_v27 = vadd.f32 %v916_v25, %v915_v22  ;;  %v918_v29 = vpop.f32.mrb[2].mxu1  ;;  %v897_v30 = vpop.f32.mrb[3].mxu0 }
  0xfa   :  { %v919_v31 = vpop.f32.mrb[3].mxu1  ;;  %v591_v32 = vadd.f32 %v895_v26, %v806_v23 }
  0xfc   :  { %v631_v33 = vadd.f32 %v917_v27, %v591_v32 }
 0x116   :  { %v937_v34 = vpop.f32.mrb[4].mxu0 }
 0x117   :  { %v959_v35 = vpop.f32.mrb[4].mxu1  ;;  %v938_v36 = vpop.f32.mrb[5].mxu0 }
 0x118   :  { %v939_v37 = vadd.f32 %v938_v36, %v937_v34  ;;  %v960_v38 = vpop.f32.mrb[5].mxu1  ;;  %v940_v39 = vpop.f32.mrb[6].mxu0 }
 0x119   :  { %v961_v40 = vadd.f32 %v960_v38, %v959_v35  ;;  %v962_v41 = vpop.f32.mrb[6].mxu1  ;;  %v941_v42 = vpop.f32.mrb[7].mxu0 }
 0x11a   :  { %v671_v43 = vadd.f32 %v939_v37, %v631_v33  ;;  %v963_v44 = vpop.f32.mrb[7].mxu1 }
 0x11c   :  { %v711_v45 = vadd.f32 %v961_v40, %v671_v43 }
 0x11e   :  { %v716_v46 = vpack.c.bf16 %v711_v45, %v711_v45 }
 0x120   :  { %979 = vmatmul.mubr.msk.bf16.vlgmr.msra.gmra.mrb[8].mxu0 %vm756_vm1, %v716_v46 }
 0x1f3   :  { %v794_v48 = vpop.f32.mrb[8].mxu0 }
 0x1f4   :  { %v795_v49 = vadd.f32 %v871_v47, %v794_v48  ;;  %v980_v50 = vpop.f32.mrb[9].mxu0 }
 0x1f5   :  { %v797_v51 = vpop.f32.mrb[10].mxu0 }
 0x1f6   :  { %801 = vst.msk [vmem:[%s1326_s5] sm:$0xff] %vm800_vm2, %v795_v49  ;;  %v981_v52 = vpop.f32.mrb[11].mxu0 }

</bundles_post_ra>
